<compile_context>
chip_gen: v7x
topology: tpu7x:2x2x1
jax: 0.10.0
libtpu: 0.0.40
codegen_flags: <defaults>
</compile_context>

<pallas_src>
import functools
import numpy as np
import jax
import jax.numpy as jnp
from jax.experimental import pallas as pl
from jax.experimental.pallas import tpu as pltpu


# -----------------------------------------------------------------------------
# Per-chip budgets (derived from hardware when possible)
# -----------------------------------------------------------------------------
def _vmem_cap_bytes():
    try:
        info = pltpu.get_tpu_info()
        cap = getattr(info, "vmem_capacity_bytes", None)
        if cap:
            return int(cap)
    except Exception:
        pass
    return 64 * 1024 * 1024  # conservative (v7x-sized) default


_VMEM_CAP = _vmem_cap_bytes()
if _VMEM_CAP >= 100 * 1024 * 1024:        # v5e / v6e: 128 MiB physical VMEM
    _VMEM_LIMIT = 96 * 1024 * 1024
    _TQ_TARGET, _TKV_TARGET = 512, 1024
else:                                      # v7x: 64 MiB physical VMEM
    _VMEM_LIMIT = 40 * 1024 * 1024
    _TQ_TARGET, _TKV_TARGET = 256, 512


def _choose_tile(lp, target):
    """Tile for a (padded) sequence length: full extent if small/unaligned, else the
    largest 128-multiple <= target that divides lp."""
    if lp <= target:
        return lp
    if lp % 128 != 0:
        return lp                    # only hit for small, unpadded L (<= 1024)
    t = (target // 128) * 128
    while lp % t != 0:
        t -= 128
    return t


def _layernorm(x, g, b, eps=1e-5):
    mu = jnp.mean(x, axis=-1, keepdims=True)
    var = jnp.mean(jnp.square(x - mu), axis=-1, keepdims=True)
    return (x - mu) * jax.lax.rsqrt(var + eps) * g + b


# -----------------------------------------------------------------------------
# Kernel 1: fused quantize + ImageNet normalize + patch-embed + pos-embed
# -----------------------------------------------------------------------------
def _embed_kernel(x_ref, mean_ref, istd_ref, w_ref, b_ref, pos_ref, o_ref):
    x = x_ref[0]                                               # (TL, Pp) raw [0,1]
    # emulate (x*255).clamp(0,255).to(uint8).float()  (floor == trunc for x >= 0)
    x = jnp.floor(jnp.clip(x * 255.0, 0.0, 255.0)) * (1.0 / 255.0)
    x = (x - mean_ref[...]) * istd_ref[...]                    # ImageNet normalize
    y = jnp.dot(x.astype(jnp.bfloat16), w_ref[...],
                preferred_element_type=jnp.float32) + b_ref[...]
    o_ref[0] = (y + pos_ref[...]).astype(o_ref.dtype)          # + sine position embedding


def patch_embed(patches, mean_vec, istd_vec, w_embed_bf16, b_embed, pos):
    Bt, Lp, Pp = patches.shape
    C = w_embed_bf16.shape[1]
    tl = _choose_tile(Lp, 512)
    return pl.pallas_call(
        _embed_kernel,
        grid=(Bt, Lp // tl),
        in_specs=[
            pl.BlockSpec((1, tl, Pp), lambda b, l: (b, l, 0)),
            pl.BlockSpec((1, Pp), lambda b, l: (0, 0)),
            pl.BlockSpec((1, Pp), lambda b, l: (0, 0)),
            pl.BlockSpec((Pp, C), lambda b, l: (0, 0)),
            pl.BlockSpec((1, C), lambda b, l: (0, 0)),
            pl.BlockSpec((tl, C), lambda b, l: (l, 0)),
        ],
        out_specs=pl.BlockSpec((1, tl, C), lambda b, l: (b, l, 0)),
        out_shape=jax.ShapeDtypeStruct((Bt, Lp, C), jnp.bfloat16),
        compiler_params=pltpu.CompilerParams(
            dimension_semantics=("parallel", "parallel"),
            vmem_limit_bytes=_VMEM_LIMIT),
    )(patches, mean_vec, istd_vec, w_embed_bf16, b_embed, pos)


# -----------------------------------------------------------------------------
# Kernel 2: fully fused GMFlow TransformerLayer (q/kv-tiled flash attn + FFN)
# -----------------------------------------------------------------------------
def _transformer_layer_kernel(src_ref, tgt_ref,
                              wq_ref, bq_ref, wkv_ref, bkv_ref,
                              wm_ref, bm_ref, ln1g_ref, ln1b_ref,
                              w1_ref, b1_ref, w2_ref, b2_ref,
                              ln2g_ref, ln2b_ref,
                              o_ref,
                              q_s, m_s, l_s, acc_s,
                              *, scale, seq_len, tkv, need_mask):
    ki = pl.program_id(2)
    nkv = pl.num_programs(2)
    C = q_s.shape[-1]

    @pl.when(ki == 0)
    def _init():
        src = src_ref[0].astype(jnp.bfloat16)                  # (tq, C)
        q = (jnp.dot(src, wq_ref[...], preferred_element_type=jnp.float32)
             + bq_ref[...])
        q_s[...] = (q * scale).astype(jnp.bfloat16)            # fold softmax scale into q
        m_s[...] = jnp.full_like(m_s[...], -jnp.inf)
        l_s[...] = jnp.zeros_like(l_s[...])
        acc_s[...] = jnp.zeros_like(acc_s[...])

    # packed K|V projection of the current target tile
    tgt = tgt_ref[0].astype(jnp.bfloat16)                      # (tkv, C)
    kvp = (jnp.dot(tgt, wkv_ref[...], preferred_element_type=jnp.float32)
           + bkv_ref[...])                                     # (tkv, 2C)
    k = kvp[:, :C].astype(jnp.bfloat16)
    v = kvp[:, C:].astype(jnp.bfloat16)

    # online-softmax attention update (no explicit K transpose: contract last dims)
    s = jax.lax.dot_general(q_s[...], k, (((1,), (1,)), ((), ())),
                            preferred_element_type=jnp.float32)   # (tq, tkv)
    if need_mask:
        key_idx = ki * tkv + jax.lax.broadcasted_iota(jnp.int32, s.shape, 1)
        s = jnp.where(key_idx < seq_len, s, jnp.float32(-1e30))
    m_new = jnp.maximum(m_s[...], jnp.max(s, axis=-1, keepdims=True))
    alpha = jnp.exp(m_s[...] - m_new)
    p = jnp.exp(s - m_new)
    l_s[...] = alpha * l_s[...] + jnp.sum(p, axis=-1, keepdims=True)
    acc_s[...] = alpha * acc_s[...] + jnp.dot(
        p.astype(jnp.bfloat16), v, preferred_element_type=jnp.float32)
    m_s[...] = m_new

    @pl.when(ki == nkv - 1)
    def _finalize():
        src = src_ref[0].astype(jnp.float32)                   # (tq, C)
        msg = acc_s[...] * pl.reciprocal(l_s[...], approx=True)
        msg = (jnp.dot(msg.astype(jnp.bfloat16), wm_ref[...],
                       preferred_element_type=jnp.float32) + bm_ref[...])
        msg = _layernorm(msg, ln1g_ref[...], ln1b_ref[...])
        # FFN on concat([src, msg]): single K=2C matmul (one MXU pass of the LHS)
        cat = jnp.concatenate([src, msg], axis=-1).astype(jnp.bfloat16)   # (tq, 2C)
        h = (jnp.dot(cat, w1_ref[...], preferred_element_type=jnp.float32)
             + b1_ref[...])
        h = jax.nn.gelu(h, approximate=True)   # TODO(synk): torch nn.GELU is erf-based
        msg2 = (jnp.dot(h.astype(jnp.bfloat16), w2_ref[...],
                        preferred_element_type=jnp.float32) + b2_ref[...])
        msg2 = _layernorm(msg2, ln2g_ref[...], ln2b_ref[...])
        o_ref[0] = (src + msg2).astype(o_ref.dtype)            # residual in f32, store bf16


def transformer_layer(p, feat, *, swap, half, seq_len, need_mask):
    """One fused TransformerLayer over feat=(2B, Lp, C) bf16.  swap=True -> cross
    attention (target is the other batch half) purely via the target index_map."""
    Bt, Lp, C = feat.shape
    tq = _choose_tile(Lp, _TQ_TARGET)
    tkv = _choose_tile(Lp, _TKV_TARGET)
    hidden = p["w_mlp2"].shape[0]

    wq = p["wq"].astype(jnp.bfloat16)
    wkv = p["wkv"].astype(jnp.bfloat16)
    wm = p["w_merge"].astype(jnp.bfloat16)
    w1 = p["w_mlp1"].astype(jnp.bfloat16)
    w2 = p["w_mlp2"].astype(jnp.bfloat16)

    if swap:
        tgt_map = lambda b, qi, ki: ((b + half) % Bt, ki, 0)
    else:
        tgt_map = lambda b, qi, ki: (b, ki, 0)

    def full(shape):
        return pl.BlockSpec(shape, lambda b, qi, ki: (0,) * len(shape))

    kern = functools.partial(_transformer_layer_kernel,
                             scale=1.0 / float(C) ** 0.5,
                             seq_len=seq_len, tkv=tkv, need_mask=need_mask)
    return pl.pallas_call(
        kern,
        grid=(Bt, Lp // tq, Lp // tkv),
        in_specs=[
            pl.BlockSpec((1, tq, C), lambda b, qi, ki: (b, qi, 0)),   # source (queries)
            pl.BlockSpec((1, tkv, C), tgt_map),                       # target (keys/values)
            full((C, C)), full((1, C)),                               # wq, bq
            full((C, 2 * C)), full((1, 2 * C)),                       # wkv, bkv (packed)
            full((C, C)), full((1, C)),                               # w_merge, b_merge
            full((1, C)), full((1, C)),                               # ln1 g, b
            full((2 * C, hidden)), full((1, hidden)),                 # w_mlp1, b_mlp1
            full((hidden, C)), full((1, C)),                          # w_mlp2, b_mlp2
            full((1, C)), full((1, C)),                               # ln2 g, b
        ],
        out_specs=pl.BlockSpec((1, tq, C), lambda b, qi, ki: (b, qi, 0)),
        out_shape=jax.ShapeDtypeStruct((Bt, Lp, C), jnp.bfloat16),
        scratch_shapes=[
            pltpu.VMEM((tq, C), jnp.bfloat16),   # scaled q
            pltpu.VMEM((tq, 1), jnp.float32),    # m
            pltpu.VMEM((tq, 1), jnp.float32),    # l
            pltpu.VMEM((tq, C), jnp.float32),    # acc
        ],
        compiler_params=pltpu.CompilerParams(
            dimension_semantics=("parallel", "parallel", "arbitrary"),
            vmem_limit_bytes=_VMEM_LIMIT),
    )(feat, feat, wq, p["bq"], wkv, p["bkv"], wm, p["b_merge"],
      p["ln1_g"], p["ln1_b"], w1, p["b_mlp1"], w2, p["b_mlp2"],
      p["ln2_g"], p["ln2_b"])


# -----------------------------------------------------------------------------
# Kernels 3/4: flash attention with transposed (lane-dense) values / output (Dv, L)
# Used for global correlation matching (V = pixel coords) and flow propagation
# (q/k projection fused in).
# -----------------------------------------------------------------------------
def _online_update_t(q_bf, k_bf, v, m_s, l_s, acc_s, key_offset, seq_len,
                     need_mask, cast_v_bf16):
    # transposed scores: rows = keys, cols = queries -> stats/output stay lane-dense
    s_t = jax.lax.dot_general(k_bf, q_bf, (((1,), (1,)), ((), ())),
                              preferred_element_type=jnp.float32)      # (tkv, tq)
    if need_mask:
        kidx = key_offset + jax.lax.broadcasted_iota(jnp.int32, s_t.shape, 0)
        s_t = jnp.where(kidx < seq_len, s_t, jnp.float32(-1e30))
    m_new = jnp.maximum(m_s[...], jnp.max(s_t, axis=0, keepdims=True))  # (1, tq)
    alpha = jnp.exp(m_s[...] - m_new)
    p_t = jnp.exp(s_t - m_new)
    l_s[...] = alpha * l_s[...] + jnp.sum(p_t, axis=0, keepdims=True)
    if cast_v_bf16:
        pv = jnp.dot(v.astype(jnp.bfloat16), p_t.astype(jnp.bfloat16),
                     preferred_element_type=jnp.float32)
    else:
        pv = jnp.dot(v, p_t, preferred_element_type=jnp.float32)
    acc_s[...] = alpha * acc_s[...] + pv
    m_s[...] = m_new


def _flash_vt_kernel(q_ref, k_ref, v_ref, o_ref, q_s, m_s, l_s, acc_s,
                     *, scale, seq_len, tkv, need_mask, cast_v_bf16):
    ki = pl.program_id(2)
    nkv = pl.num_programs(2)

    @pl.when(ki == 0)
    def _init():
        q_s[...] = (q_ref[0].astype(jnp.float32) * scale).astype(jnp.bfloat16)
        m_s[...] = jnp.full_like(m_s[...], -jnp.inf)
        l_s[...] = jnp.zeros_like(l_s[...])
        acc_s[...] = jnp.zeros_like(acc_s[...])

    k = k_ref[0].astype(jnp.bfloat16)
    _online_update_t(q_s[...], k, v_ref[0], m_s, l_s, acc_s,
                     ki * tkv, seq_len, need_mask, cast_v_bf16)

    @pl.when(ki == nkv - 1)
    def _finalize():
        # exact reciprocal: output is pixel-scale correspondence, avoid approx error
        o_ref[0] = acc_s[...] * pl.reciprocal(l_s[...], approx=False)


def flash_attention_vt(q, k, v_t, scale, *, seq_len, need_mask, cast_v_bf16,
                       shared_v=False):
    B, Lp, C = q.shape
    Dv = v_t.shape[1]
    tq = _choose_tile(Lp, _TQ_TARGET)
    tkv = _choose_tile(Lp, _TKV_TARGET)
    v_map = (lambda b, qi, ki: (0, 0, ki)) if shared_v else (lambda b, qi, ki: (b, 0, ki))
    kern = functools.partial(_flash_vt_kernel, scale=float(scale), seq_len=seq_len,
                             tkv=tkv, need_mask=need_mask, cast_v_bf16=cast_v_bf16)
    return pl.pallas_call(
        kern,
        grid=(B, Lp // tq, Lp // tkv),
        in_specs=[
            pl.BlockSpec((1, tq, C), lambda b, qi, ki: (b, qi, 0)),
            pl.BlockSpec((1, tkv, C), lambda b, qi, ki: (b, ki, 0)),
            pl.BlockSpec((1, Dv, tkv), v_map),
        ],
        out_specs=pl.BlockSpec((1, Dv, tq), lambda b, qi, ki: (b, 0, qi)),
        out_shape=jax.ShapeDtypeStruct((B, Dv, Lp), jnp.float32),
        scratch_shapes=[
            pltpu.VMEM((tq, C), jnp.bfloat16),
            pltpu.VMEM((1, tq), jnp.float32),
            pltpu.VMEM((1, tq), jnp.float32),
            pltpu.VMEM((Dv, tq), jnp.float32),
        ],
        compiler_params=pltpu.CompilerParams(
            dimension_semantics=("parallel", "parallel", "arbitrary"),
            vmem_limit_bytes=_VMEM_LIMIT),
    )(q, k, v_t)


def _prop_flash_vt_kernel(fq_ref, fk_ref, v_ref, wq_ref, bq_ref, wk_ref, bk_ref,
                          o_ref, q_s, m_s, l_s, acc_s,
                          *, scale, seq_len, tkv, need_mask):
    ki = pl.program_id(2)
    nkv = pl.num_programs(2)

    @pl.when(ki == 0)
    def _init():
        fq = fq_ref[0].astype(jnp.bfloat16)
        q = (jnp.dot(fq, wq_ref[...], preferred_element_type=jnp.float32)
             + bq_ref[...])
        q_s[...] = (q * scale).astype(jnp.bfloat16)
        m_s[...] = jnp.full_like(m_s[...], -jnp.inf)
        l_s[...] = jnp.zeros_like(l_s[...])
        acc_s[...] = jnp.zeros_like(acc_s[...])

    fk = fk_ref[0].astype(jnp.bfloat16)
    k = (jnp.dot(fk, wk_ref[...], preferred_element_type=jnp.float32)
         + bk_ref[...]).astype(jnp.bfloat16)
    # V is real-valued flow here -> keep the PV matmul in f32 (tiny: Dv == 2)
    _online_update_t(q_s[...], k, v_ref[0], m_s, l_s, acc_s,
                     ki * tkv, seq_len, need_mask, cast_v_bf16=False)

    @pl.when(ki == nkv - 1)
    def _finalize():
        o_ref[0] = acc_s[...] * pl.reciprocal(l_s[...], approx=False)


def prop_flash_attention_vt(feat, v_t, wq, bq, wk, bk, scale, *, seq_len, need_mask):
    B, Lp, C = feat.shape
    Dv = v_t.shape[1]
    tq = _choose_tile(Lp, _TQ_TARGET)
    tkv = _choose_tile(Lp, _TKV_TARGET)

    def full(shape):
        return pl.BlockSpec(shape, lambda b, qi, ki: (0,) * len(shape))

    kern = functools.partial(_prop_flash_vt_kernel, scale=float(scale),
                             seq_len=seq_len, tkv=tkv, need_mask=need_mask)
    return pl.pallas_call(
        kern,
        grid=(B, Lp // tq, Lp // tkv),
        in_specs=[
            pl.BlockSpec((1, tq, C), lambda b, qi, ki: (b, qi, 0)),    # q source tile
            pl.BlockSpec((1, tkv, C), lambda b, qi, ki: (b, ki, 0)),   # k source tile
            pl.BlockSpec((1, Dv, tkv), lambda b, qi, ki: (b, 0, ki)),  # values (flow)
            full((C, C)), full((1, C)),                                # wq, bq
            full((C, C)), full((1, C)),                                # wk, bk
        ],
        out_specs=pl.BlockSpec((1, Dv, tq), lambda b, qi, ki: (b, 0, qi)),
        out_shape=jax.ShapeDtypeStruct((B, Dv, Lp), jnp.float32),
        scratch_shapes=[
            pltpu.VMEM((tq, C), jnp.bfloat16),
            pltpu.VMEM((1, tq), jnp.float32),
            pltpu.VMEM((1, tq), jnp.float32),
            pltpu.VMEM((Dv, tq), jnp.float32),
        ],
        compiler_params=pltpu.CompilerParams(
            dimension_semantics=("parallel", "parallel", "arbitrary"),
            vmem_limit_bytes=_VMEM_LIMIT),
    )(feat, feat, v_t, wq, bq, wk, bk)


# -----------------------------------------------------------------------------
# Kernel 5: separable bilinear x8 upsampling (align_corners=True) + flow scaling
# -----------------------------------------------------------------------------
def _upsample_kernel(f_ref, uh_ref, uwt_ref, o_ref, *, factor):
    f = f_ref[0]                                                        # (h, w)
    tmp = jnp.dot(uh_ref[...], f, preferred_element_type=jnp.float32)   # (H, w)
    o_ref[0] = jnp.dot(tmp, uwt_ref[...],
                       preferred_element_type=jnp.float32) * factor


def bilinear_upsample(flow_lr, uh, uw_t, factor):
    BC, h, w = flow_lr.shape
    H = uh.shape[0]
    W = uw_t.shape[1]
    kern = functools.partial(_upsample_kernel, factor=float(factor))
    return pl.pallas_call(
        kern,
        grid=(BC,),
        in_specs=[
            pl.BlockSpec((1, h, w), lambda i: (i, 0, 0)),
            pl.BlockSpec((H, h), lambda i: (0, 0)),
            pl.BlockSpec((w, W), lambda i: (0, 0)),
        ],
        out_specs=pl.BlockSpec((1, H, W), lambda i: (i, 0, 0)),
        out_shape=jax.ShapeDtypeStruct((BC, H, W), jnp.float32),
        compiler_params=pltpu.CompilerParams(
            dimension_semantics=("parallel",),
            vmem_limit_bytes=_VMEM_LIMIT),
    )(flow_lr, uh, uw_t)


# -----------------------------------------------------------------------------
# Glue: parameters, position embedding, interpolation matrices, forward pass
# -----------------------------------------------------------------------------
def sine_pos_embed(h, w, c):
    npf = c // 2
    scale = 2.0 * np.pi
    y = (np.arange(h, dtype=np.float32) + 1.0) / (h + 1e-6) * scale
    x = (np.arange(w, dtype=np.float32) + 1.0) / (w + 1e-6) * scale
    dim_t = np.arange(npf, dtype=np.float32)
    dim_t = 10000.0 ** (2.0 * (dim_t // 2) / npf)
    pos_x = x[None, :, None] / dim_t
    pos_y = y[:, None, None] / dim_t
    pos_x = np.stack(
        [np.sin(pos_x[..., 0::2]), np.cos(pos_x[..., 1::2])], axis=-1
    ).reshape(1, w, npf)
    pos_y = np.stack(
        [np.sin(pos_y[..., 0::2]), np.cos(pos_y[..., 1::2])], axis=-1
    ).reshape(h, 1, npf)
    pos = np.concatenate(
        [np.broadcast_to(pos_y, (h, w, npf)), np.broadcast_to(pos_x, (h, w, npf))],
        axis=-1,
    )
    return pos.reshape(h * w, c).astype(np.float32)


def bilinear_matrix(out_size, in_size):
    # align_corners=True separable bilinear interpolation matrix (out, in)
    m = np.zeros((out_size, in_size), dtype=np.float32)
    if in_size == 1:
        m[:, 0] = 1.0
        return m
    for i in range(out_size):
        src = i * (in_size - 1) / (out_size - 1)
        i0 = int(np.floor(src))
        i1 = min(i0 + 1, in_size - 1)
        w1 = src - i0
        m[i, i0] += 1.0 - w1
        m[i, i1] += w1
    return m


def coords_grid_t_np(h, w):
    # (2, h*w): row 0 = x coords, row 1 = y coords, flattened row-major over (y, x)
    ys, xs = np.meshgrid(np.arange(h), np.arange(w), indexing="ij")
    return np.stack([xs.reshape(-1), ys.reshape(-1)], axis=0).astype(np.float32)


def init_params(key, C=32, num_blocks=6, ffn_expansion=4, patch_dim=8 * 8 * 3):
    keys = iter(jax.random.split(key, 256))

    def dense(din, dout):
        w = jax.random.normal(next(keys), (din, dout), jnp.float32) / np.sqrt(din)
        b = jnp.zeros((1, dout), jnp.float32)
        return w, b

    def layer_params():
        p = {}
        p["wq"], p["bq"] = dense(C, C)
        p["wkv"], p["bkv"] = dense(C, 2 * C)          # packed k|v projection
        p["w_merge"], p["b_merge"] = dense(C, C)
        p["ln1_g"], p["ln1_b"] = jnp.ones((1, C)), jnp.zeros((1, C))
        p["w_mlp1"], p["b_mlp1"] = dense(2 * C, 2 * C * ffn_expansion)
        p["w_mlp2"], p["b_mlp2"] = dense(2 * C * ffn_expansion, C)
        p["ln2_g"], p["ln2_b"] = jnp.ones((1, C)), jnp.zeros((1, C))
        return p

    params = {}
    params["w_embed"], params["b_embed"] = dense(patch_dim, C)
    params["blocks"] = [
        {"self": layer_params(), "cross": layer_params()} for _ in range(num_blocks)
    ]
    params["w_qk_prop"], params["b_qk_prop"] = dense(C, 2 * C)   # packed q|k projection
    return params


def gmflow_forward(params, image1, image2, upsample_factor=8, padding_factor=16):
    B, Cin, H, W = image1.shape
    assert image1.shape == image2.shape and Cin == 3
    # TODO(synk): InputPadder replicate-padding for non-multiple sizes; here H,W % 16 == 0.
    assert H % padding_factor == 0 and W % padding_factor == 0

    ds = 8
    h, w = H // ds, W // ds
    L = h * w
    C = params["w_embed"].shape[1]
    P = ds * ds * 3
    Pp = ((P + 127) // 128) * 128                 # lane-aligned patch dim (192 -> 256)
    scale = 1.0 / float(C) ** 0.5

    # sequence padding so all attention tiles are (8,128)-aligned at any image size
    if L % 128 == 0 or L <= 1024:
        Lp = L                                    # small/aligned: full-extent or exact tiles
    else:
        Lp = ((L + 127) // 128) * 128
    need_mask = Lp != L

    # --- patch extraction prologue (one-shot XLA 6-D transpose) ------------------
    def to_patches(img):
        x = jnp.transpose(img, (0, 2, 3, 1))                     # NHWC
        x = x.reshape(B, h, ds, w, ds, 3)
        return jnp.transpose(x, (0, 1, 3, 2, 4, 5)).reshape(B, L, P)

    patches = jnp.concatenate([to_patches(image1), to_patches(image2)], axis=0)  # (2B,L,P)
    patches = jnp.pad(patches, ((0, 0), (0, Lp - L), (0, Pp - P)))

    mean3 = np.array([0.485, 0.456, 0.406], np.float32)
    std3 = np.array([0.229, 0.224, 0.225], np.float32)
    mean_vec = np.zeros((1, Pp), np.float32)
    istd_vec = np.zeros((1, Pp), np.float32)
    mean_vec[0, :P] = np.tile(mean3, ds * ds)
    istd_vec[0, :P] = np.tile(1.0 / std3, ds * ds)
    pos_np = np.zeros((Lp, C), np.float32)
    pos_np[:L] = sine_pos_embed(h, w, C)
    w_embed = jnp.pad(params["w_embed"], ((0, Pp - P), (0, 0)))

    # --- steps 1-4 fused: quantize + normalize + embed + pos (bf16 features) ----
    feat = patch_embed(patches, jnp.asarray(mean_vec), jnp.asarray(istd_vec),
                       w_embed.astype(jnp.bfloat16), params["b_embed"],
                       jnp.asarray(pos_np))                      # (2B, Lp, C) bf16

    # --- transformer blocks: fused per-layer kernels on the 2B batch axis -------
    for blk in params["blocks"]:
        feat = transformer_layer(blk["self"], feat, swap=False, half=B,
                                 seq_len=L, need_mask=need_mask)
        feat = transformer_layer(blk["cross"], feat, swap=True, half=B,
                                 seq_len=L, need_mask=need_mask)

    f1 = feat[:B]
    f2 = feat[B:]

    # --- global correlation softmax matching (corr_radius = -1) -----------------
    coords_np = np.zeros((1, 2, Lp), np.float32)
    coords_np[0, :, :L] = coords_grid_t_np(h, w)
    coords = jnp.asarray(coords_np)                              # (1, 2, Lp) shared
    cast_v = max(h, w) <= 256                                    # coords exact in bf16
    corresp_t = flash_attention_vt(f1, f2, coords, scale, seq_len=L,
                                   need_mask=need_mask, cast_v_bf16=cast_v,
                                   shared_v=True)                # (B, 2, Lp)
    flow_t = corresp_t - coords                                  # lane-dense flow

    # --- self-attention flow propagation (prop_radius = -1), q/k proj fused -----
    wq_p = params["w_qk_prop"][:, :C].astype(jnp.bfloat16)
    wk_p = params["w_qk_prop"][:, C:].astype(jnp.bfloat16)
    bq_p = params["b_qk_prop"][:, :C]
    bk_p = params["b_qk_prop"][:, C:]
    flow_t = prop_flash_attention_vt(f1, flow_t, wq_p, bq_p, wk_p, bk_p, scale,
                                     seq_len=L, need_mask=need_mask)  # (B, 2, Lp)

    # --- x8 bilinear upsampling (align_corners=True) and flow scaling -----------
    flow_lr = flow_t[:, :, :L].reshape(B * 2, h, w)
    uh = jnp.asarray(bilinear_matrix(H, h))
    uw_t = jnp.asarray(bilinear_matrix(W, w).T)
    flow_up = bilinear_upsample(flow_lr, uh, uw_t, upsample_factor)
    return flow_up.reshape(B, 2, H, W)


if __name__ == "__main__":
    key = jax.random.PRNGKey(0)
    k1, k2, kp = jax.random.split(key, 3)
    B, H, W = 2, 32, 32
    image1 = jax.random.uniform(k1, (B, 3, H, W), jnp.float32)
    image2 = jax.random.uniform(k2, (B, 3, H, W), jnp.float32)
    params = init_params(kp, C=32, num_blocks=6)   # real GMFlow uses C=128; kept small here

    flow = jax.jit(gmflow_forward)(params, image1, image2)
    flow = jax.block_until_ready(flow)
    assert flow.shape == (B, 2, H, W), flow.shape
    assert bool(jnp.all(jnp.isfinite(flow)))
    print("KERNEL_OK")
</pallas_src>

<mosaic_0001>
module attributes {stable_mosaic.version = 11 : i64} {
  func.func @_embed_kernel(%arg0: i32, %arg1: i32, %arg2: memref<1x16x256xf32, #tpu.memory_space<vmem>>, %arg3: memref<1x256xf32, #tpu.memory_space<vmem>>, %arg4: memref<1x256xf32, #tpu.memory_space<vmem>>, %arg5: memref<256x32xbf16, #tpu.memory_space<vmem>>, %arg6: memref<1x32xf32, #tpu.memory_space<vmem>>, %arg7: memref<16x32xf32, #tpu.memory_space<vmem>>, %arg8: memref<1x16x32xbf16, #tpu.memory_space<vmem>>) attributes {dimension_semantics = [#tpu.dimension_semantics<parallel>, #tpu.dimension_semantics<parallel>], iteration_bounds = array<i64: 4, 1>, scalar_prefetch = 0 : i64, scratch_operands = 0 : i64, tpu.core_type = #tpu.core_type<tc>, window_params = [{transform_indices = @transform_0, window_bounds = array<i64: 1, 16, 256>}, {pipeline_mode = #tpu.pipeline_mode<synchronous>, transform_indices = @transform_1, window_bounds = array<i64: 1, 256>}, {pipeline_mode = #tpu.pipeline_mode<synchronous>, transform_indices = @transform_2, window_bounds = array<i64: 1, 256>}, {pipeline_mode = #tpu.pipeline_mode<synchronous>, transform_indices = @transform_3, window_bounds = array<i64: 256, 32>}, {pipeline_mode = #tpu.pipeline_mode<synchronous>, transform_indices = @transform_4, window_bounds = array<i64: 1, 32>}, {transform_indices = @transform_5, window_bounds = array<i64: 16, 32>}, {transform_indices = @transform_6, window_bounds = array<i64: 1, 16, 32>}]} {
    %c0 = arith.constant 0 : index
    %c0_0 = arith.constant 0 : index
    %c0_1 = arith.constant 0 : index
    %0 = vector.load %arg2[%c0, %c0_0, %c0_1] : memref<1x16x256xf32, #tpu.memory_space<vmem>>, vector<1x16x256xf32>
    %1 = vector.shape_cast %0 : vector<1x16x256xf32> to vector<16x256xf32>
    %cst = arith.constant 2.550000e+02 : f32
    %2 = vector.broadcast %cst : f32 to vector<16x256xf32>
    %3 = arith.mulf %1, %2 : vector<16x256xf32>
    %cst_2 = arith.constant 0.000000e+00 : f32
    %cst_3 = arith.constant 2.550000e+02 : f32
    %4 = vector.broadcast %cst_2 : f32 to vector<16x256xf32>
    %5 = arith.maximumf %4, %3 : vector<16x256xf32>
    %6 = vector.broadcast %cst_3 : f32 to vector<16x256xf32>
    %7 = arith.minimumf %6, %5 : vector<16x256xf32>
    %8 = math.floor %7 : vector<16x256xf32>
    %cst_4 = arith.constant 0.00392156886 : f32
    %9 = vector.broadcast %cst_4 : f32 to vector<16x256xf32>
    %10 = arith.mulf %8, %9 : vector<16x256xf32>
    %c0_5 = arith.constant 0 : index
    %c0_6 = arith.constant 0 : index
    %11 = vector.load %arg3[%c0_5, %c0_6] : memref<1x256xf32, #tpu.memory_space<vmem>>, vector<1x256xf32>
    %12 = vector.broadcast %11 : vector<1x256xf32> to vector<16x256xf32>
    %13 = arith.subf %10, %12 : vector<16x256xf32>
    %c0_7 = arith.constant 0 : index
    %c0_8 = arith.constant 0 : index
    %14 = vector.load %arg4[%c0_7, %c0_8] : memref<1x256xf32, #tpu.memory_space<vmem>>, vector<1x256xf32>
    %15 = vector.broadcast %14 : vector<1x256xf32> to vector<16x256xf32>
    %16 = arith.mulf %13, %15 : vector<16x256xf32>
    %17 = arith.truncf %16 : vector<16x256xf32> to vector<16x256xbf16>
    %c0_9 = arith.constant 0 : index
    %c0_10 = arith.constant 0 : index
    %18 = vector.load %arg5[%c0_9, %c0_10] : memref<256x32xbf16, #tpu.memory_space<vmem>>, vector<256x32xbf16>
    %cst_11 = arith.constant dense<0.000000e+00> : vector<16x32xf32>
    %19 = tpu.matmul %17, %18, %cst_11 {dimension_numbers = #tpu.dot_dimension_numbers<[1], [0], [0], [1], [0, 0, 1, 1], [], []>} : vector<16x256xbf16>, vector<256x32xbf16>, vector<16x32xf32> -> vector<16x32xf32>
    %c0_12 = arith.constant 0 : index
    %c0_13 = arith.constant 0 : index
    %20 = vector.load %arg6[%c0_12, %c0_13] : memref<1x32xf32, #tpu.memory_space<vmem>>, vector<1x32xf32>
    %21 = vector.broadcast %20 : vector<1x32xf32> to vector<16x32xf32>
    %22 = arith.addf %19, %21 : vector<16x32xf32>
    %c0_14 = arith.constant 0 : index
    %c0_15 = arith.constant 0 : index
    %23 = vector.load %arg7[%c0_14, %c0_15] : memref<16x32xf32, #tpu.memory_space<vmem>>, vector<16x32xf32>
    %24 = arith.addf %22, %23 : vector<16x32xf32>
    %25 = arith.truncf %24 : vector<16x32xf32> to vector<16x32xbf16>
    %c0_16 = arith.constant 0 : index
    %c0_17 = arith.constant 0 : index
    %c0_18 = arith.constant 0 : index
    %26 = vector.load %arg8[%c0_16, %c0_17, %c0_18] : memref<1x16x32xbf16, #tpu.memory_space<vmem>>, vector<1x16x32xbf16>
    %27 = vector.shape_cast %26 : vector<1x16x32xbf16> to vector<16x32xbf16>
    %28 = vector.shape_cast %25 : vector<16x32xbf16> to vector<1x16x32xbf16>
    tpu.vector_store %arg8[%c0_16, %c0_17, %c0_18], %28 {strides = array<i32>} : memref<1x16x32xbf16, #tpu.memory_space<vmem>>, vector<1x16x32xbf16>,
    return
  }
  func.func @transform_0(%arg0: i32, %arg1: i32) -> (i32, i32, i32) {
    %c0_i32 = arith.constant 0 : i32
    %c0_i32_0 = arith.constant 0 : i32
    return %arg0, %arg1, %c0_i32 : i32, i32, i32
  }
  func.func @transform_1(%arg0: i32, %arg1: i32) -> (i32, i32) {
    %c0_i32 = arith.constant 0 : i32
    %c0_i32_0 = arith.constant 0 : i32
    %c0_i32_1 = arith.constant 0 : i32
    return %c0_i32, %c0_i32_0 : i32, i32
  }
  func.func @transform_2(%arg0: i32, %arg1: i32) -> (i32, i32) {
    %c0_i32 = arith.constant 0 : i32
    %c0_i32_0 = arith.constant 0 : i32
    %c0_i32_1 = arith.constant 0 : i32
    return %c0_i32, %c0_i32_0 : i32, i32
  }
  func.func @transform_3(%arg0: i32, %arg1: i32) -> (i32, i32) {
    %c0_i32 = arith.constant 0 : i32
    %c0_i32_0 = arith.constant 0 : i32
    %c0_i32_1 = arith.constant 0 : i32
    return %c0_i32, %c0_i32_0 : i32, i32
  }
  func.func @transform_4(%arg0: i32, %arg1: i32) -> (i32, i32) {
    %c0_i32 = arith.constant 0 : i32
    %c0_i32_0 = arith.constant 0 : i32
    %c0_i32_1 = arith.constant 0 : i32
    return %c0_i32, %c0_i32_0 : i32, i32
  }
  func.func @transform_5(%arg0: i32, %arg1: i32) -> (i32, i32) {
    %c0_i32 = arith.constant 0 : i32
    %c0_i32_0 = arith.constant 0 : i32
    return %arg1, %c0_i32 : i32, i32
  }
  func.func @transform_6(%arg0: i32, %arg1: i32) -> (i32, i32, i32) {
    %c0_i32 = arith.constant 0 : i32
    %c0_i32_0 = arith.constant 0 : i32
    return %arg0, %arg1, %c0_i32 : i32, i32, i32
  }
}

module attributes {stable_mosaic.version = 11 : i64} {
  func.func @_transformer_layer_kernel(%arg0: i32, %arg1: i32, %arg2: i32, %arg3: memref<1x16x32xbf16, #tpu.memory_space<vmem>>, %arg4: memref<1x16x32xbf16, #tpu.memory_space<vmem>>, %arg5: memref<32x32xbf16, #tpu.memory_space<vmem>>, %arg6: memref<1x32xf32, #tpu.memory_space<vmem>>, %arg7: memref<32x64xbf16, #tpu.memory_space<vmem>>, %arg8: memref<1x64xf32, #tpu.memory_space<vmem>>, %arg9: memref<32x32xbf16, #tpu.memory_space<vmem>>, %arg10: memref<1x32xf32, #tpu.memory_space<vmem>>, %arg11: memref<1x32xf32, #tpu.memory_space<vmem>>, %arg12: memref<1x32xf32, #tpu.memory_space<vmem>>, %arg13: memref<64x256xbf16, #tpu.memory_space<vmem>>, %arg14: memref<1x256xf32, #tpu.memory_space<vmem>>, %arg15: memref<256x32xbf16, #tpu.memory_space<vmem>>, %arg16: memref<1x32xf32, #tpu.memory_space<vmem>>, %arg17: memref<1x32xf32, #tpu.memory_space<vmem>>, %arg18: memref<1x32xf32, #tpu.memory_space<vmem>>, %arg19: memref<1x16x32xbf16, #tpu.memory_space<vmem>>, %arg20: memref<16x32xbf16, #tpu.memory_space<vmem>>, %arg21: memref<16x1xf32, #tpu.memory_space<vmem>>, %arg22: memref<16x1xf32, #tpu.memory_space<vmem>>, %arg23: memref<16x32xf32, #tpu.memory_space<vmem>>) attributes {dimension_semantics = [#tpu.dimension_semantics<parallel>, #tpu.dimension_semantics<parallel>, #tpu.dimension_semantics<arbitrary>], iteration_bounds = array<i64: 4, 1, 1>, scalar_prefetch = 0 : i64, scratch_operands = 4 : i64, tpu.core_type = #tpu.core_type<tc>, window_params = [{transform_indices = @transform_0, window_bounds = array<i64: 1, 16, 32>}, {transform_indices = @transform_1, window_bounds = array<i64: 1, 16, 32>}, {pipeline_mode = #tpu.pipeline_mode<synchronous>, transform_indices = @transform_2, window_bounds = array<i64: 32, 32>}, {pipeline_mode = #tpu.pipeline_mode<synchronous>, transform_indices = @transform_3, window_bounds = array<i64: 1, 32>}, {pipeline_mode = #tpu.pipeline_mode<synchronous>, transform_indices = @transform_4, window_bounds = array<i64: 32, 64>}, {pipeline_mode = #tpu.pipeline_mode<synchronous>, transform_indices = @transform_5, window_bounds = array<i64: 1, 64>}, {pipeline_mode = #tpu.pipeline_mode<synchronous>, transform_indices = @transform_6, window_bounds = array<i64: 32, 32>}, {pipeline_mode = #tpu.pipeline_mode<synchronous>, transform_indices = @transform_7, window_bounds = array<i64: 1, 32>}, {pipeline_mode = #tpu.pipeline_mode<synchronous>, transform_indices = @transform_8, window_bounds = array<i64: 1, 32>}, {pipeline_mode = #tpu.pipeline_mode<synchronous>, transform_indices = @transform_9, window_bounds = array<i64: 1, 32>}, {pipeline_mode = #tpu.pipeline_mode<synchronous>, transform_indices = @transform_10, window_bounds = array<i64: 64, 256>}, {pipeline_mode = #tpu.pipeline_mode<synchronous>, transform_indices = @transform_11, window_bounds = array<i64: 1, 256>}, {pipeline_mode = #tpu.pipeline_mode<synchronous>, transform_indices = @transform_12, window_bounds = array<i64: 256, 32>}, {pipeline_mode = #tpu.pipeline_mode<synchronous>, transform_indices = @transform_13, window_bounds = array<i64: 1, 32>}, {pipeline_mode = #tpu.pipeline_mode<synchronous>, transform_indices = @transform_14, window_bounds = array<i64: 1, 32>}, {pipeline_mode = #tpu.pipeline_mode<synchronous>, transform_indices = @transform_15, window_bounds = array<i64: 1, 32>}, {transform_indices = @transform_16, window_bounds = array<i64: 1, 16, 32>}]} {
    %c0_i32 = arith.constant 0 : i32
    %0 = arith.cmpi eq, %arg2, %c0_i32 : i32
    %1 = arith.extui %0 : i1 to i32
    %c0_i32_0 = arith.constant 0 : i32
    %2 = arith.cmpi ne, %1, %c0_i32_0 : i32
    scf.if %2 {
      %c0_29 = arith.constant 0 : index
      %c0_30 = arith.constant 0 : index
      %c0_31 = arith.constant 0 : index
      %43 = vector.load %arg3[%c0_29, %c0_30, %c0_31] : memref<1x16x32xbf16, #tpu.memory_space<vmem>>, vector<1x16x32xbf16>
      %44 = vector.shape_cast %43 : vector<1x16x32xbf16> to vector<16x32xbf16>
      %c0_32 = arith.constant 0 : index
      %c0_33 = arith.constant 0 : index
      %45 = vector.load %arg5[%c0_32, %c0_33] : memref<32x32xbf16, #tpu.memory_space<vmem>>, vector<32x32xbf16>
      %cst_34 = arith.constant dense<0.000000e+00> : vector<16x32xf32>
      %46 = tpu.matmul %44, %45, %cst_34 {dimension_numbers = #tpu.dot_dimension_numbers<[1], [0], [0], [1], [0, 0, 1, 1], [], []>} : vector<16x32xbf16>, vector<32x32xbf16>, vector<16x32xf32> -> vector<16x32xf32>
      %c0_35 = arith.constant 0 : index
      %c0_36 = arith.constant 0 : index
      %47 = vector.load %arg6[%c0_35, %c0_36] : memref<1x32xf32, #tpu.memory_space<vmem>>, vector<1x32xf32>
      %48 = vector.broadcast %47 : vector<1x32xf32> to vector<16x32xf32>
      %49 = arith.addf %46, %48 : vector<16x32xf32>
      %cst_37 = arith.constant 0.176776692 : f32
      %50 = vector.broadcast %cst_37 : f32 to vector<16x32xf32>
      %51 = arith.mulf %49, %50 : vector<16x32xf32>
      %52 = arith.truncf %51 : vector<16x32xf32> to vector<16x32xbf16>
      %c0_38 = arith.constant 0 : index
      %c0_39 = arith.constant 0 : index
      %53 = vector.load %arg20[%c0_38, %c0_39] : memref<16x32xbf16, #tpu.memory_space<vmem>>, vector<16x32xbf16>
      tpu.vector_store %arg20[%c0_38, %c0_39], %52 {strides = array<i32>} : memref<16x32xbf16, #tpu.memory_space<vmem>>, vector<16x32xbf16>,
      %cst_40 = arith.constant 0xFF800000 : f32
      %54 = vector.broadcast %cst_40 : f32 to vector<16x1xf32>
      %c0_41 = arith.constant 0 : index
      %c0_42 = arith.constant 0 : index
      %55 = vector.load %arg21[%c0_41, %c0_42] : memref<16x1xf32, #tpu.memory_space<vmem>>, vector<16x1xf32>
      tpu.vector_store %arg21[%c0_41, %c0_42], %54 {strides = array<i32>} : memref<16x1xf32, #tpu.memory_space<vmem>>, vector<16x1xf32>,
      %cst_43 = arith.constant 0.000000e+00 : f32
      %56 = vector.broadcast %cst_43 : f32 to vector<16x1xf32>
      %c0_44 = arith.constant 0 : index
      %c0_45 = arith.constant 0 : index
      %57 = vector.load %arg22[%c0_44, %c0_45] : memref<16x1xf32, #tpu.memory_space<vmem>>, vector<16x1xf32>
      tpu.vector_store %arg22[%c0_44, %c0_45], %56 {strides = array<i32>} : memref<16x1xf32, #tpu.memory_space<vmem>>, vector<16x1xf32>,
      %cst_46 = arith.constant 0.000000e+00 : f32
      %58 = vector.broadcast %cst_46 : f32 to vector<16x32xf32>
      %c0_47 = arith.constant 0 : index
      %c0_48 = arith.constant 0 : index
      %59 = vector.load %arg23[%c0_47, %c0_48] : memref<16x32xf32, #tpu.memory_space<vmem>>, vector<16x32xf32>
      tpu.vector_store %arg23[%c0_47, %c0_48], %58 {strides = array<i32>} : memref<16x32xf32, #tpu.memory_space<vmem>>, vector<16x32xf32>,
    } else {
    }
    %c0 = arith.constant 0 : index
    %c0_1 = arith.constant 0 : index
    %c0_2 = arith.constant 0 : index
    %3 = vector.load %arg4[%c0, %c0_1, %c0_2] : memref<1x16x32xbf16, #tpu.memory_space<vmem>>, vector<1x16x32xbf16>
    %4 = vector.shape_cast %3 : vector<1x16x32xbf16> to vector<16x32xbf16>
    %c0_3 = arith.constant 0 : index
    %c0_4 = arith.constant 0 : index
    %5 = vector.load %arg7[%c0_3, %c0_4] : memref<32x64xbf16, #tpu.memory_space<vmem>>, vector<32x64xbf16>
    %cst = arith.constant dense<0.000000e+00> : vector<16x64xf32>
    %6 = tpu.matmul %4, %5, %cst {dimension_numbers = #tpu.dot_dimension_numbers<[1], [0], [0], [1], [0, 0, 1, 1], [], []>} : vector<16x32xbf16>, vector<32x64xbf16>, vector<16x64xf32> -> vector<16x64xf32>
    %c0_5 = arith.constant 0 : index
    %c0_6 = arith.constant 0 : index
    %7 = vector.load %arg8[%c0_5, %c0_6] : memref<1x64xf32, #tpu.memory_space<vmem>>, vector<1x64xf32>
    %8 = vector.broadcast %7 : vector<1x64xf32> to vector<16x64xf32>
    %9 = arith.addf %6, %8 : vector<16x64xf32>
    %10 = vector.extract_strided_slice %9 {offsets = [0, 0], sizes = [16, 32], strides = [1, 1]} : vector<16x64xf32> to vector<16x32xf32>
    %11 = arith.truncf %10 : vector<16x32xf32> to vector<16x32xbf16>
    %12 = vector.extract_strided_slice %9 {offsets = [0, 32], sizes = [16, 32], strides = [1, 1]} : vector<16x64xf32> to vector<16x32xf32>
    %13 = arith.truncf %12 : vector<16x32xf32> to vector<16x32xbf16>
    %c0_7 = arith.constant 0 : index
    %c0_8 = arith.constant 0 : index
    %14 = vector.load %arg20[%c0_7, %c0_8] : memref<16x32xbf16, #tpu.memory_space<vmem>>, vector<16x32xbf16>
    %cst_9 = arith.constant dense<0.000000e+00> : vector<16x16xf32>
    %15 = tpu.matmul %14, %11, %cst_9 {dimension_numbers = #tpu.dot_dimension_numbers<[1], [1], [0], [0], [0, 0, 1, 0], [], []>} : vector<16x32xbf16>, vector<16x32xbf16>, vector<16x16xf32> -> vector<16x16xf32>
    %c0_10 = arith.constant 0 : index
    %c0_11 = arith.constant 0 : index
    %16 = vector.load %arg21[%c0_10, %c0_11] : memref<16x1xf32, #tpu.memory_space<vmem>>, vector<16x1xf32>
    %cst_12 = arith.constant dense<0xFF800000> : vector<16xf32>
    %17 = vector.multi_reduction <maximumf>, %15, %cst_12 [1] : vector<16x16xf32> to vector<16xf32>
    %18 = vector.shape_cast %17 : vector<16xf32> to vector<16x1xf32>
    %19 = arith.maximumf %16, %18 : vector<16x1xf32>
    %c0_13 = arith.constant 0 : index
    %c0_14 = arith.constant 0 : index
    %20 = vector.load %arg21[%c0_13, %c0_14] : memref<16x1xf32, #tpu.memory_space<vmem>>, vector<16x1xf32>
    %21 = arith.subf %20, %19 : vector<16x1xf32>
    %22 = math.exp %21 : vector<16x1xf32>
    %23 = vector.broadcast %19 : vector<16x1xf32> to vector<16x16xf32>
    %24 = arith.subf %15, %23 : vector<16x16xf32>
    %25 = math.exp %24 : vector<16x16xf32>
    %c0_15 = arith.constant 0 : index
    %c0_16 = arith.constant 0 : index
    %26 = vector.load %arg22[%c0_15, %c0_16] : memref<16x1xf32, #tpu.memory_space<vmem>>, vector<16x1xf32>
    %27 = arith.mulf %22, %26 : vector<16x1xf32>
    %cst_17 = arith.constant dense<0.000000e+00> : vector<16xf32>
    %28 = vector.multi_reduction <add>, %25, %cst_17 [1] : vector<16x16xf32> to vector<16xf32>
    %29 = vector.shape_cast %28 : vector<16xf32> to vector<16x1xf32>
    %30 = arith.addf %27, %29 : vector<16x1xf32>
    %c0_18 = arith.constant 0 : index
    %c0_19 = arith.constant 0 : index
    %31 = vector.load %arg22[%c0_18, %c0_19] : memref<16x1xf32, #tpu.memory_space<vmem>>, vector<16x1xf32>
    tpu.vector_store %arg22[%c0_18, %c0_19], %30 {strides = array<i32>} : memref<16x1xf32, #tpu.memory_space<vmem>>, vector<16x1xf32>,
    %c0_20 = arith.constant 0 : index
    %c0_21 = arith.constant 0 : index
    %32 = vector.load %arg23[%c0_20, %c0_21] : memref<16x32xf32, #tpu.memory_space<vmem>>, vector<16x32xf32>
    %33 = vector.broadcast %22 : vector<16x1xf32> to vector<16x32xf32>
    %34 = arith.mulf %33, %32 : vector<16x32xf32>
    %35 = arith.truncf %25 : vector<16x16xf32> to vector<16x16xbf16>
    %cst_22 = arith.constant dense<0.000000e+00> : vector<16x32xf32>
    %36 = tpu.matmul %35, %13, %cst_22 {dimension_numbers = #tpu.dot_dimension_numbers<[1], [0], [0], [1], [0, 0, 1, 1], [], []>} : vector<16x16xbf16>, vector<16x32xbf16>, vector<16x32xf32> -> vector<16x32xf32>
    %37 = arith.addf %34, %36 : vector<16x32xf32>
    %c0_23 = arith.constant 0 : index
    %c0_24 = arith.constant 0 : index
    %38 = vector.load %arg23[%c0_23, %c0_24] : memref<16x32xf32, #tpu.memory_space<vmem>>, vector<16x32xf32>
    tpu.vector_store %arg23[%c0_23, %c0_24], %37 {strides = array<i32>} : memref<16x32xf32, #tpu.memory_space<vmem>>, vector<16x32xf32>,
    %c0_25 = arith.constant 0 : index
    %c0_26 = arith.constant 0 : index
    %39 = vector.load %arg21[%c0_25, %c0_26] : memref<16x1xf32, #tpu.memory_space<vmem>>, vector<16x1xf32>
    tpu.vector_store %arg21[%c0_25, %c0_26], %19 {strides = array<i32>} : memref<16x1xf32, #tpu.memory_space<vmem>>, vector<16x1xf32>,
    %c0_i32_27 = arith.constant 0 : i32
    %40 = arith.cmpi eq, %arg2, %c0_i32_27 : i32
    %41 = arith.extui %40 : i1 to i32
    %c0_i32_28 = arith.constant 0 : i32
    %42 = arith.cmpi ne, %41, %c0_i32_28 : i32
    scf.if %42 {
      %c0_29 = arith.constant 0 : index
      %c0_30 = arith.constant 0 : index
      %c0_31 = arith.constant 0 : index
      %43 = vector.load %arg3[%c0_29, %c0_30, %c0_31] : memref<1x16x32xbf16, #tpu.memory_space<vmem>>, vector<1x16x32xbf16>
      %44 = vector.shape_cast %43 : vector<1x16x32xbf16> to vector<16x32xbf16>
      %45 = arith.extf %44 : vector<16x32xbf16> to vector<16x32xf32>
      %c0_32 = arith.constant 0 : index
      %c0_33 = arith.constant 0 : index
      %46 = vector.load %arg23[%c0_32, %c0_33] : memref<16x32xf32, #tpu.memory_space<vmem>>, vector<16x32xf32>
      %c0_34 = arith.constant 0 : index
      %c0_35 = arith.constant 0 : index
      %47 = vector.load %arg22[%c0_34, %c0_35] : memref<16x1xf32, #tpu.memory_space<vmem>>, vector<16x1xf32>
      %48 = tpu.reciprocal %47 {approx = true} : vector<16x1xf32> -> vector<16x1xf32>
      %49 = vector.broadcast %48 : vector<16x1xf32> to vector<16x32xf32>
      %50 = arith.mulf %46, %49 : vector<16x32xf32>
      %51 = arith.truncf %50 : vector<16x32xf32> to vector<16x32xbf16>
      %c0_36 = arith.constant 0 : index
      %c0_37 = arith.constant 0 : index
      %52 = vector.load %arg9[%c0_36, %c0_37] : memref<32x32xbf16, #tpu.memory_space<vmem>>, vector<32x32xbf16>
      %cst_38 = arith.constant dense<0.000000e+00> : vector<16x32xf32>
      %53 = tpu.matmul %51, %52, %cst_38 {dimension_numbers = #tpu.dot_dimension_numbers<[1], [0], [0], [1], [0, 0, 1, 1], [], []>} : vector<16x32xbf16>, vector<32x32xbf16>, vector<16x32xf32> -> vector<16x32xf32>
      %c0_39 = arith.constant 0 : index
      %c0_40 = arith.constant 0 : index
      %54 = vector.load %arg10[%c0_39, %c0_40] : memref<1x32xf32, #tpu.memory_space<vmem>>, vector<1x32xf32>
      %55 = vector.broadcast %54 : vector<1x32xf32> to vector<16x32xf32>
      %56 = arith.addf %53, %55 : vector<16x32xf32>
      %c0_41 = arith.constant 0 : index
      %c0_42 = arith.constant 0 : index
      %57 = vector.load %arg11[%c0_41, %c0_42] : memref<1x32xf32, #tpu.memory_space<vmem>>, vector<1x32xf32>
      %c0_43 = arith.constant 0 : index
      %c0_44 = arith.constant 0 : index
      %58 = vector.load %arg12[%c0_43, %c0_44] : memref<1x32xf32, #tpu.memory_space<vmem>>, vector<1x32xf32>
      %cst_45 = arith.constant dense<0.000000e+00> : vector<16xf32>
      %59 = vector.multi_reduction <add>, %56, %cst_45 [1] : vector<16x32xf32> to vector<16xf32>
      %60 = vector.shape_cast %59 : vector<16xf32> to vector<16x1xf32>
      %cst_46 = arith.constant 3.200000e+01 : f32
      %61 = vector.broadcast %cst_46 : f32 to vector<16x1xf32>
      %62 = arith.divf %60, %61 : vector<16x1xf32>
      %63 = vector.broadcast %62 : vector<16x1xf32> to vector<16x32xf32>
      %64 = arith.subf %56, %63 : vector<16x32xf32>
      %65 = arith.mulf %64, %64 : vector<16x32xf32>
      %cst_47 = arith.constant dense<0.000000e+00> : vector<16xf32>
      %66 = vector.multi_reduction <add>, %65, %cst_47 [1] : vector<16x32xf32> to vector<16xf32>
      %67 = vector.shape_cast %66 : vector<16xf32> to vector<16x1xf32>
      %cst_48 = arith.constant 3.200000e+01 : f32
      %68 = vector.broadcast %cst_48 : f32 to vector<16x1xf32>
      %69 = arith.divf %67, %68 : vector<16x1xf32>
      %70 = vector.broadcast %62 : vector<16x1xf32> to vector<16x32xf32>
      %71 = arith.subf %56, %70 : vector<16x32xf32>
      %cst_49 = arith.constant 9.99999974E-6 : f32
      %72 = vector.broadcast %cst_49 : f32 to vector<16x1xf32>
      %73 = arith.addf %69, %72 : vector<16x1xf32>
      %74 = math.rsqrt %73 : vector<16x1xf32>
      %75 = vector.broadcast %74 : vector<16x1xf32> to vector<16x32xf32>
      %76 = arith.mulf %71, %75 : vector<16x32xf32>
      %77 = vector.broadcast %57 : vector<1x32xf32> to vector<16x32xf32>
      %78 = arith.mulf %76, %77 : vector<16x32xf32>
      %79 = vector.broadcast %58 : vector<1x32xf32> to vector<16x32xf32>
      %80 = arith.addf %78, %79 : vector<16x32xf32>
      %81 = tpu.concatenate %45, %80 in 1 : vector<16x32xf32>, vector<16x32xf32> -> vector<16x64xf32>
      %82 = arith.truncf %81 : vector<16x64xf32> to vector<16x64xbf16>
      %c0_50 = arith.constant 0 : index
      %c0_51 = arith.constant 0 : index
      %83 = vector.load %arg13[%c0_50, %c0_51] : memref<64x256xbf16, #tpu.memory_space<vmem>>, vector<64x256xbf16>
      %cst_52 = arith.constant dense<0.000000e+00> : vector<16x256xf32>
      %84 = tpu.matmul %82, %83, %cst_52 {dimension_numbers = #tpu.dot_dimension_numbers<[1], [0], [0], [1], [0, 0, 1, 1], [], []>} : vector<16x64xbf16>, vector<64x256xbf16>, vector<16x256xf32> -> vector<16x256xf32>
      %c0_53 = arith.constant 0 : index
      %c0_54 = arith.constant 0 : index
      %85 = vector.load %arg14[%c0_53, %c0_54] : memref<1x256xf32, #tpu.memory_space<vmem>>, vector<1x256xf32>
      %86 = vector.broadcast %85 : vector<1x256xf32> to vector<16x256xf32>
      %87 = arith.addf %84, %86 : vector<16x256xf32>
      %88 = arith.mulf %87, %87 : vector<16x256xf32>
      %89 = arith.mulf %87, %88 : vector<16x256xf32>
      %cst_55 = arith.constant 4.471500e-02 : f32
      %90 = vector.broadcast %cst_55 : f32 to vector<16x256xf32>
      %91 = arith.mulf %90, %89 : vector<16x256xf32>
      %92 = arith.addf %87, %91 : vector<16x256xf32>
      %cst_56 = arith.constant 0.797884583 : f32
      %93 = vector.broadcast %cst_56 : f32 to vector<16x256xf32>
      %94 = arith.mulf %93, %92 : vector<16x256xf32>
      %95 = math.tanh %94 : vector<16x256xf32>
      %cst_57 = arith.constant 1.000000e+00 : f32
      %96 = vector.broadcast %cst_57 : f32 to vector<16x256xf32>
      %97 = arith.addf %96, %95 : vector<16x256xf32>
      %cst_58 = arith.constant 5.000000e-01 : f32
      %98 = vector.broadcast %cst_58 : f32 to vector<16x256xf32>
      %99 = arith.mulf %98, %97 : vector<16x256xf32>
      %100 = arith.mulf %87, %99 : vector<16x256xf32>
      %101 = arith.truncf %100 : vector<16x256xf32> to vector<16x256xbf16>
      %c0_59 = arith.constant 0 : index
      %c0_60 = arith.constant 0 : index
      %102 = vector.load %arg15[%c0_59, %c0_60] : memref<256x32xbf16, #tpu.memory_space<vmem>>, vector<256x32xbf16>
      %cst_61 = arith.constant dense<0.000000e+00> : vector<16x32xf32>
      %103 = tpu.matmul %101, %102, %cst_61 {dimension_numbers = #tpu.dot_dimension_numbers<[1], [0], [0], [1], [0, 0, 1, 1], [], []>} : vector<16x256xbf16>, vector<256x32xbf16>, vector<16x32xf32> -> vector<16x32xf32>
      %c0_62 = arith.constant 0 : index
      %c0_63 = arith.constant 0 : index
      %104 = vector.load %arg16[%c0_62, %c0_63] : memref<1x32xf32, #tpu.memory_space<vmem>>, vector<1x32xf32>
      %105 = vector.broadcast %104 : vector<1x32xf32> to vector<16x32xf32>
      %106 = arith.addf %103, %105 : vector<16x32xf32>
      %c0_64 = arith.constant 0 : index
      %c0_65 = arith.constant 0 : index
      %107 = vector.load %arg17[%c0_64, %c0_65] : memref<1x32xf32, #tpu.memory_space<vmem>>, vector<1x32xf32>
      %c0_66 = arith.constant 0 : index
      %c0_67 = arith.constant 0 : index
      %108 = vector.load %arg18[%c0_66, %c0_67] : memref<1x32xf32, #tpu.memory_space<vmem>>, vector<1x32xf32>
      %cst_68 = arith.constant dense<0.000000e+00> : vector<16xf32>
      %109 = vector.multi_reduction <add>, %106, %cst_68 [1] : vector<16x32xf32> to vector<16xf32>
      %110 = vector.shape_cast %109 : vector<16xf32> to vector<16x1xf32>
      %cst_69 = arith.constant 3.200000e+01 : f32
      %111 = vector.broadcast %cst_69 : f32 to vector<16x1xf32>
      %112 = arith.divf %110, %111 : vector<16x1xf32>
      %113 = vector.broadcast %112 : vector<16x1xf32> to vector<16x32xf32>
      %114 = arith.subf %106, %113 : vector<16x32xf32>
      %115 = arith.mulf %114, %114 : vector<16x32xf32>
      %cst_70 = arith.constant dense<0.000000e+00> : vector<16xf32>
      %116 = vector.multi_reduction <add>, %115, %cst_70 [1] : vector<16x32xf32> to vector<16xf32>
      %117 = vector.shape_cast %116 : vector<16xf32> to vector<16x1xf32>
      %cst_71 = arith.constant 3.200000e+01 : f32
      %118 = vector.broadcast %cst_71 : f32 to vector<16x1xf32>
      %119 = arith.divf %117, %118 : vector<16x1xf32>
      %120 = vector.broadcast %112 : vector<16x1xf32> to vector<16x32xf32>
      %121 = arith.subf %106, %120 : vector<16x32xf32>
      %cst_72 = arith.constant 9.99999974E-6 : f32
      %122 = vector.broadcast %cst_72 : f32 to vector<16x1xf32>
      %123 = arith.addf %119, %122 : vector<16x1xf32>
      %124 = math.rsqrt %123 : vector<16x1xf32>
      %125 = vector.broadcast %124 : vector<16x1xf32> to vector<16x32xf32>
      %126 = arith.mulf %121, %125 : vector<16x32xf32>
      %127 = vector.broadcast %107 : vector<1x32xf32> to vector<16x32xf32>
      %128 = arith.mulf %126, %127 : vector<16x32xf32>
      %129 = vector.broadcast %108 : vector<1x32xf32> to vector<16x32xf32>
      %130 = arith.addf %128, %129 : vector<16x32xf32>
      %131 = arith.addf %45, %130 : vector<16x32xf32>
      %132 = arith.truncf %131 : vector<16x32xf32> to vector<16x32xbf16>
      %c0_73 = arith.constant 0 : index
      %c0_74 = arith.constant 0 : index
      %c0_75 = arith.constant 0 : index
      %133 = vector.load %arg19[%c0_73, %c0_74, %c0_75] : memref<1x16x32xbf16, #tpu.memory_space<vmem>>, vector<1x16x32xbf16>
      %134 = vector.shape_cast %133 : vector<1x16x32xbf16> to vector<16x32xbf16>
      %135 = vector.shape_cast %132 : vector<16x32xbf16> to vector<1x16x32xbf16>
      tpu.vector_store %arg19[%c0_73, %c0_74, %c0_75], %135 {strides = array<i32>} : memref<1x16x32xbf16, #tpu.memory_space<vmem>>, vector<1x16x32xbf16>,
    } else {
    }
    return
  }
  func.func @transform_0(%arg0: i32, %arg1: i32, %arg2: i32) -> (i32, i32, i32) {
    %c0_i32 = arith.constant 0 : i32
    %c0_i32_0 = arith.constant 0 : i32
    return %arg0, %arg1, %c0_i32 : i32, i32, i32
  }
  func.func @transform_1(%arg0: i32, %arg1: i32, %arg2: i32) -> (i32, i32, i32) {
    %c2_i32 = arith.constant 2 : i32
    %0 = arith.addi %arg0, %c2_i32 : i32
    %c4_i32 = arith.constant 4 : i32
    %c0_i32 = arith.constant 0 : i32
    %1 = arith.cmpi eq, %c4_i32, %c0_i32 : i32
    %c1_i32 = arith.constant 1 : i32
    %2 = arith.select %1, %c1_i32, %c4_i32 : i32
    %3 = arith.remsi %0, %2 : i32
    %c0_i32_0 = arith.constant 0 : i32
    %4 = arith.cmpi ne, %3, %c0_i32_0 : i32
    %c0_i32_1 = arith.constant 0 : i32
    %5 = arith.cmpi slt, %3, %c0_i32_1 : i32
    %c0_i32_2 = arith.constant 0 : i32
    %6 = arith.cmpi slt, %2, %c0_i32_2 : i32
    %7 = arith.xori %5, %6 : i1
    %8 = arith.andi %7, %4 : i1
    %9 = arith.addi %3, %2 : i32
    %10 = arith.select %8, %9, %3 : i32
    %c0_i32_3 = arith.constant 0 : i32
    %c0_i32_4 = arith.constant 0 : i32
    return %10, %arg2, %c0_i32_3 : i32, i32, i32
  }
  func.func @transform_2(%arg0: i32, %arg1: i32, %arg2: i32) -> (i32, i32) {
    %c0_i32 = arith.constant 0 : i32
    %c0_i32_0 = arith.constant 0 : i32
    %c0_i32_1 = arith.constant 0 : i32
    return %c0_i32, %c0_i32_0 : i32, i32
  }
  func.func @transform_3(%arg0: i32, %arg1: i32, %arg2: i32) -> (i32, i32) {
    %c0_i32 = arith.constant 0 : i32
    %c0_i32_0 = arith.constant 0 : i32
    %c0_i32_1 = arith.constant 0 : i32
    return %c0_i32, %c0_i32_0 : i32, i32
  }
  func.func @transform_4(%arg0: i32, %arg1: i32, %arg2: i32) -> (i32, i32) {
    %c0_i32 = arith.constant 0 : i32
    %c0_i32_0 = arith.constant 0 : i32
    %c0_i32_1 = arith.constant 0 : i32
    return %c0_i32, %c0_i32_0 : i32, i32
  }
  func.func @transform_5(%arg0: i32, %arg1: i32, %arg2: i32) -> (i32, i32) {
    %c0_i32 = arith.constant 0 : i32
    %c0_i32_0 = arith.constant 0 : i32
    %c0_i32_1 = arith.constant 0 : i32
    return %c0_i32, %c0_i32_0 : i32, i32
  }
  func.func @transform_6(%arg0: i32, %arg1: i32, %arg2: i32) -> (i32, i32) {
    %c0_i32 = arith.constant 0 : i32
    %c0_i32_0 = arith.constant 0 : i32
    %c0_i32_1 = arith.constant 0 : i32
    return %c0_i32, %c0_i32_0 : i32, i32
  }
  func.func @transform_7(%arg0: i32, %arg1: i32, %arg2: i32) -> (i32, i32) {
    %c0_i32 = arith.constant 0 : i32
    %c0_i32_0 = arith.constant 0 : i32
    %c0_i32_1 = arith.constant 0 : i32
    return %c0_i32, %c0_i32_0 : i32, i32
  }
  func.func @transform_8(%arg0: i32, %arg1: i32, %arg2: i32) -> (i32, i32) {
    %c0_i32 = arith.constant 0 : i32
    %c0_i32_0 = arith.constant 0 : i32
    %c0_i32_1 = arith.constant 0 : i32
    return %c0_i32, %c0_i32_0 : i32, i32
  }
  func.func @transform_9(%arg0: i32, %arg1: i32, %arg2: i32) -> (i32, i32) {
    %c0_i32 = arith.constant 0 : i32
    %c0_i32_0 = arith.constant 0 : i32
    %c0_i32_1 = arith.constant 0 : i32
    return %c0_i32, %c0_i32_0 : i32, i32
  }
  func.func @transform_10(%arg0: i32, %arg1: i32, %arg2: i32) -> (i32, i32) {
    %c0_i32 = arith.constant 0 : i32
    %c0_i32_0 = arith.constant 0 : i32
    %c0_i32_1 = arith.constant 0 : i32
    return %c0_i32, %c0_i32_0 : i32, i32
  }
  func.func @transform_11(%arg0: i32, %arg1: i32, %arg2: i32) -> (i32, i32) {
    %c0_i32 = arith.constant 0 : i32
    %c0_i32_0 = arith.constant 0 : i32
    %c0_i32_1 = arith.constant 0 : i32
    return %c0_i32, %c0_i32_0 : i32, i32
  }
  func.func @transform_12(%arg0: i32, %arg1: i32, %arg2: i32) -> (i32, i32) {
    %c0_i32 = arith.constant 0 : i32
    %c0_i32_0 = arith.constant 0 : i32
    %c0_i32_1 = arith.constant 0 : i32
    return %c0_i32, %c0_i32_0 : i32, i32
  }
  func.func @transform_13(%arg0: i32, %arg1: i32, %arg2: i32) -> (i32, i32) {
    %c0_i32 = arith.constant 0 : i32
    %c0_i32_0 = arith.constant 0 : i32
    %c0_i32_1 = arith.constant 0 : i32
    return %c0_i32, %c0_i32_0 : i32, i32
  }
  func.func @transform_14(%arg0: i32, %arg1: i32, %arg2: i32) -> (i32, i32) {
    %c0_i32 = arith.constant 0 : i32
    %c0_i32_0 = arith.constant 0 : i32
    %c0_i32_1 = arith.constant 0 : i32
    return %c0_i32, %c0_i32_0 : i32, i32
  }
  func.func @transform_15(%arg0: i32, %arg1: i32, %arg2: i32) -> (i32, i32) {
    %c0_i32 = arith.constant 0 : i32
    %c0_i32_0 = arith.constant 0 : i32
    %c0_i32_1 = arith.constant 0 : i32
    return %c0_i32, %c0_i32_0 : i32, i32
  }
  func.func @transform_16(%arg0: i32, %arg1: i32, %arg2: i32) -> (i32, i32, i32) {
    %c0_i32 = arith.constant 0 : i32
    %c0_i32_0 = arith.constant 0 : i32
    return %arg0, %arg1, %c0_i32 : i32, i32, i32
  }
}

module attributes {stable_mosaic.version = 11 : i64} {
  func.func @_transformer_layer_kernel(%arg0: i32, %arg1: i32, %arg2: i32, %arg3: memref<1x16x32xbf16, #tpu.memory_space<vmem>>, %arg4: memref<1x16x32xbf16, #tpu.memory_space<vmem>>, %arg5: memref<32x32xbf16, #tpu.memory_space<vmem>>, %arg6: memref<1x32xf32, #tpu.memory_space<vmem>>, %arg7: memref<32x64xbf16, #tpu.memory_space<vmem>>, %arg8: memref<1x64xf32, #tpu.memory_space<vmem>>, %arg9: memref<32x32xbf16, #tpu.memory_space<vmem>>, %arg10: memref<1x32xf32, #tpu.memory_space<vmem>>, %arg11: memref<1x32xf32, #tpu.memory_space<vmem>>, %arg12: memref<1x32xf32, #tpu.memory_space<vmem>>, %arg13: memref<64x256xbf16, #tpu.memory_space<vmem>>, %arg14: memref<1x256xf32, #tpu.memory_space<vmem>>, %arg15: memref<256x32xbf16, #tpu.memory_space<vmem>>, %arg16: memref<1x32xf32, #tpu.memory_space<vmem>>, %arg17: memref<1x32xf32, #tpu.memory_space<vmem>>, %arg18: memref<1x32xf32, #tpu.memory_space<vmem>>, %arg19: memref<1x16x32xbf16, #tpu.memory_space<vmem>>, %arg20: memref<16x32xbf16, #tpu.memory_space<vmem>>, %arg21: memref<16x1xf32, #tpu.memory_space<vmem>>, %arg22: memref<16x1xf32, #tpu.memory_space<vmem>>, %arg23: memref<16x32xf32, #tpu.memory_space<vmem>>) attributes {dimension_semantics = [#tpu.dimension_semantics<parallel>, #tpu.dimension_semantics<parallel>, #tpu.dimension_semantics<arbitrary>], iteration_bounds = array<i64: 4, 1, 1>, scalar_prefetch = 0 : i64, scratch_operands = 4 : i64, tpu.core_type = #tpu.core_type<tc>, window_params = [{transform_indices = @transform_0, window_bounds = array<i64: 1, 16, 32>}, {transform_indices = @transform_1, window_bounds = array<i64: 1, 16, 32>}, {pipeline_mode = #tpu.pipeline_mode<synchronous>, transform_indices = @transform_2, window_bounds = array<i64: 32, 32>}, {pipeline_mode = #tpu.pipeline_mode<synchronous>, transform_indices = @transform_3, window_bounds = array<i64: 1, 32>}, {pipeline_mode = #tpu.pipeline_mode<synchronous>, transform_indices = @transform_4, window_bounds = array<i64: 32, 64>}, {pipeline_mode = #tpu.pipeline_mode<synchronous>, transform_indices = @transform_5, window_bounds = array<i64: 1, 64>}, {pipeline_mode = #tpu.pipeline_mode<synchronous>, transform_indices = @transform_6, window_bounds = array<i64: 32, 32>}, {pipeline_mode = #tpu.pipeline_mode<synchronous>, transform_indices = @transform_7, window_bounds = array<i64: 1, 32>}, {pipeline_mode = #tpu.pipeline_mode<synchronous>, transform_indices = @transform_8, window_bounds = array<i64: 1, 32>}, {pipeline_mode = #tpu.pipeline_mode<synchronous>, transform_indices = @transform_9, window_bounds = array<i64: 1, 32>}, {pipeline_mode = #tpu.pipeline_mode<synchronous>, transform_indices = @transform_10, window_bounds = array<i64: 64, 256>}, {pipeline_mode = #tpu.pipeline_mode<synchronous>, transform_indices = @transform_11, window_bounds = array<i64: 1, 256>}, {pipeline_mode = #tpu.pipeline_mode<synchronous>, transform_indices = @transform_12, window_bounds = array<i64: 256, 32>}, {pipeline_mode = #tpu.pipeline_mode<synchronous>, transform_indices = @transform_13, window_bounds = array<i64: 1, 32>}, {pipeline_mode = #tpu.pipeline_mode<synchronous>, transform_indices = @transform_14, window_bounds = array<i64: 1, 32>}, {pipeline_mode = #tpu.pipeline_mode<synchronous>, transform_indices = @transform_15, window_bounds = array<i64: 1, 32>}, {transform_indices = @transform_16, window_bounds = array<i64: 1, 16, 32>}]} {
    %c0_i32 = arith.constant 0 : i32
    %0 = arith.cmpi eq, %arg2, %c0_i32 : i32
    %1 = arith.extui %0 : i1 to i32
    %c0_i32_0 = arith.constant 0 : i32
    %2 = arith.cmpi ne, %1, %c0_i32_0 : i32
    scf.if %2 {
      %c0_29 = arith.constant 0 : index
      %c0_30 = arith.constant 0 : index
      %c0_31 = arith.constant 0 : index
      %43 = vector.load %arg3[%c0_29, %c0_30, %c0_31] : memref<1x16x32xbf16, #tpu.memory_space<vmem>>, vector<1x16x32xbf16>
      %44 = vector.shape_cast %43 : vector<1x16x32xbf16> to vector<16x32xbf16>
      %c0_32 = arith.constant 0 : index
      %c0_33 = arith.constant 0 : index
      %45 = vector.load %arg5[%c0_32, %c0_33] : memref<32x32xbf16, #tpu.memory_space<vmem>>, vector<32x32xbf16>
      %cst_34 = arith.constant dense<0.000000e+00> : vector<16x32xf32>
      %46 = tpu.matmul %44, %45, %cst_34 {dimension_numbers = #tpu.dot_dimension_numbers<[1], [0], [0], [1], [0, 0, 1, 1], [], []>} : vector<16x32xbf16>, vector<32x32xbf16>, vector<16x32xf32> -> vector<16x32xf32>
      %c0_35 = arith.constant 0 : index
      %c0_36 = arith.constant 0 : index
      %47 = vector.load %arg6[%c0_35, %c0_36] : memref<1x32xf32, #tpu.memory_space<vmem>>, vector<1x32xf32>
      %48 = vector.broadcast %47 : vector<1x32xf32> to vector<16x32xf32>
      %49 = arith.addf %46, %48 : vector<16x32xf32>
      %cst_37 = arith.constant 0.176776692 : f32
      %50 = vector.broadcast %cst_37 : f32 to vector<16x32xf32>
      %51 = arith.mulf %49, %50 : vector<16x32xf32>
      %52 = arith.truncf %51 : vector<16x32xf32> to vector<16x32xbf16>
      %c0_38 = arith.constant 0 : index
      %c0_39 = arith.constant 0 : index
      %53 = vector.load %arg20[%c0_38, %c0_39] : memref<16x32xbf16, #tpu.memory_space<vmem>>, vector<16x32xbf16>
      tpu.vector_store %arg20[%c0_38, %c0_39], %52 {strides = array<i32>} : memref<16x32xbf16, #tpu.memory_space<vmem>>, vector<16x32xbf16>,
      %cst_40 = arith.constant 0xFF800000 : f32
      %54 = vector.broadcast %cst_40 : f32 to vector<16x1xf32>
      %c0_41 = arith.constant 0 : index
      %c0_42 = arith.constant 0 : index
      %55 = vector.load %arg21[%c0_41, %c0_42] : memref<16x1xf32, #tpu.memory_space<vmem>>, vector<16x1xf32>
      tpu.vector_store %arg21[%c0_41, %c0_42], %54 {strides = array<i32>} : memref<16x1xf32, #tpu.memory_space<vmem>>, vector<16x1xf32>,
      %cst_43 = arith.constant 0.000000e+00 : f32
      %56 = vector.broadcast %cst_43 : f32 to vector<16x1xf32>
      %c0_44 = arith.constant 0 : index
      %c0_45 = arith.constant 0 : index
      %57 = vector.load %arg22[%c0_44, %c0_45] : memref<16x1xf32, #tpu.memory_space<vmem>>, vector<16x1xf32>
      tpu.vector_store %arg22[%c0_44, %c0_45], %56 {strides = array<i32>} : memref<16x1xf32, #tpu.memory_space<vmem>>, vector<16x1xf32>,
      %cst_46 = arith.constant 0.000000e+00 : f32
      %58 = vector.broadcast %cst_46 : f32 to vector<16x32xf32>
      %c0_47 = arith.constant 0 : index
      %c0_48 = arith.constant 0 : index
      %59 = vector.load %arg23[%c0_47, %c0_48] : memref<16x32xf32, #tpu.memory_space<vmem>>, vector<16x32xf32>
      tpu.vector_store %arg23[%c0_47, %c0_48], %58 {strides = array<i32>} : memref<16x32xf32, #tpu.memory_space<vmem>>, vector<16x32xf32>,
    } else {
    }
    %c0 = arith.constant 0 : index
    %c0_1 = arith.constant 0 : index
    %c0_2 = arith.constant 0 : index
    %3 = vector.load %arg4[%c0, %c0_1, %c0_2] : memref<1x16x32xbf16, #tpu.memory_space<vmem>>, vector<1x16x32xbf16>
    %4 = vector.shape_cast %3 : vector<1x16x32xbf16> to vector<16x32xbf16>
    %c0_3 = arith.constant 0 : index
    %c0_4 = arith.constant 0 : index
    %5 = vector.load %arg7[%c0_3, %c0_4] : memref<32x64xbf16, #tpu.memory_space<vmem>>, vector<32x64xbf16>
    %cst = arith.constant dense<0.000000e+00> : vector<16x64xf32>
    %6 = tpu.matmul %4, %5, %cst {dimension_numbers = #tpu.dot_dimension_numbers<[1], [0], [0], [1], [0, 0, 1, 1], [], []>} : vector<16x32xbf16>, vector<32x64xbf16>, vector<16x64xf32> -> vector<16x64xf32>
    %c0_5 = arith.constant 0 : index
    %c0_6 = arith.constant 0 : index
    %7 = vector.load %arg8[%c0_5, %c0_6] : memref<1x64xf32, #tpu.memory_space<vmem>>, vector<1x64xf32>
    %8 = vector.broadcast %7 : vector<1x64xf32> to vector<16x64xf32>
    %9 = arith.addf %6, %8 : vector<16x64xf32>
    %10 = vector.extract_strided_slice %9 {offsets = [0, 0], sizes = [16, 32], strides = [1, 1]} : vector<16x64xf32> to vector<16x32xf32>
    %11 = arith.truncf %10 : vector<16x32xf32> to vector<16x32xbf16>
    %12 = vector.extract_strided_slice %9 {offsets = [0, 32], sizes = [16, 32], strides = [1, 1]} : vector<16x64xf32> to vector<16x32xf32>
    %13 = arith.truncf %12 : vector<16x32xf32> to vector<16x32xbf16>
    %c0_7 = arith.constant 0 : index
    %c0_8 = arith.constant 0 : index
    %14 = vector.load %arg20[%c0_7, %c0_8] : memref<16x32xbf16, #tpu.memory_space<vmem>>, vector<16x32xbf16>
    %cst_9 = arith.constant dense<0.000000e+00> : vector<16x16xf32>
    %15 = tpu.matmul %14, %11, %cst_9 {dimension_numbers = #tpu.dot_dimension_numbers<[1], [1], [0], [0], [0, 0, 1, 0], [], []>} : vector<16x32xbf16>, vector<16x32xbf16>, vector<16x16xf32> -> vector<16x16xf32>
    %c0_10 = arith.constant 0 : index
    %c0_11 = arith.constant 0 : index
    %16 = vector.load %arg21[%c0_10, %c0_11] : memref<16x1xf32, #tpu.memory_space<vmem>>, vector<16x1xf32>
    %cst_12 = arith.constant dense<0xFF800000> : vector<16xf32>
    %17 = vector.multi_reduction <maximumf>, %15, %cst_12 [1] : vector<16x16xf32> to vector<16xf32>
    %18 = vector.shape_cast %17 : vector<16xf32> to vector<16x1xf32>
    %19 = arith.maximumf %16, %18 : vector<16x1xf32>
    %c0_13 = arith.constant 0 : index
    %c0_14 = arith.constant 0 : index
    %20 = vector.load %arg21[%c0_13, %c0_14] : memref<16x1xf32, #tpu.memory_space<vmem>>, vector<16x1xf32>
    %21 = arith.subf %20, %19 : vector<16x1xf32>
    %22 = math.exp %21 : vector<16x1xf32>
    %23 = vector.broadcast %19 : vector<16x1xf32> to vector<16x16xf32>
    %24 = arith.subf %15, %23 : vector<16x16xf32>
    %25 = math.exp %24 : vector<16x16xf32>
    %c0_15 = arith.constant 0 : index
    %c0_16 = arith.constant 0 : index
    %26 = vector.load %arg22[%c0_15, %c0_16] : memref<16x1xf32, #tpu.memory_space<vmem>>, vector<16x1xf32>
    %27 = arith.mulf %22, %26 : vector<16x1xf32>
    %cst_17 = arith.constant dense<0.000000e+00> : vector<16xf32>
    %28 = vector.multi_reduction <add>, %25, %cst_17 [1] : vector<16x16xf32> to vector<16xf32>
    %29 = vector.shape_cast %28 : vector<16xf32> to vector<16x1xf32>
    %30 = arith.addf %27, %29 : vector<16x1xf32>
    %c0_18 = arith.constant 0 : index
    %c0_19 = arith.constant 0 : index
    %31 = vector.load %arg22[%c0_18, %c0_19] : memref<16x1xf32, #tpu.memory_space<vmem>>, vector<16x1xf32>
    tpu.vector_store %arg22[%c0_18, %c0_19], %30 {strides = array<i32>} : memref<16x1xf32, #tpu.memory_space<vmem>>, vector<16x1xf32>,
    %c0_20 = arith.constant 0 : index
    %c0_21 = arith.constant 0 : index
    %32 = vector.load %arg23[%c0_20, %c0_21] : memref<16x32xf32, #tpu.memory_space<vmem>>, vector<16x32xf32>
    %33 = vector.broadcast %22 : vector<16x1xf32> to vector<16x32xf32>
    %34 = arith.mulf %33, %32 : vector<16x32xf32>
    %35 = arith.truncf %25 : vector<16x16xf32> to vector<16x16xbf16>
    %cst_22 = arith.constant dense<0.000000e+00> : vector<16x32xf32>
    %36 = tpu.matmul %35, %13, %cst_22 {dimension_numbers = #tpu.dot_dimension_numbers<[1], [0], [0], [1], [0, 0, 1, 1], [], []>} : vector<16x16xbf16>, vector<16x32xbf16>, vector<16x32xf32> -> vector<16x32xf32>
    %37 = arith.addf %34, %36 : vector<16x32xf32>
    %c0_23 = arith.constant 0 : index
    %c0_24 = arith.constant 0 : index
    %38 = vector.load %arg23[%c0_23, %c0_24] : memref<16x32xf32, #tpu.memory_space<vmem>>, vector<16x32xf32>
    tpu.vector_store %arg23[%c0_23, %c0_24], %37 {strides = array<i32>} : memref<16x32xf32, #tpu.memory_space<vmem>>, vector<16x32xf32>,
    %c0_25 = arith.constant 0 : index
    %c0_26 = arith.constant 0 : index
    %39 = vector.load %arg21[%c0_25, %c0_26] : memref<16x1xf32, #tpu.memory_space<vmem>>, vector<16x1xf32>
    tpu.vector_store %arg21[%c0_25, %c0_26], %19 {strides = array<i32>} : memref<16x1xf32, #tpu.memory_space<vmem>>, vector<16x1xf32>,
    %c0_i32_27 = arith.constant 0 : i32
    %40 = arith.cmpi eq, %arg2, %c0_i32_27 : i32
    %41 = arith.extui %40 : i1 to i32
    %c0_i32_28 = arith.constant 0 : i32
    %42 = arith.cmpi ne, %41, %c0_i32_28 : i32
    scf.if %42 {
      %c0_29 = arith.constant 0 : index
      %c0_30 = arith.constant 0 : index
      %c0_31 = arith.constant 0 : index
      %43 = vector.load %arg3[%c0_29, %c0_30, %c0_31] : memref<1x16x32xbf16, #tpu.memory_space<vmem>>, vector<1x16x32xbf16>
      %44 = vector.shape_cast %43 : vector<1x16x32xbf16> to vector<16x32xbf16>
      %45 = arith.extf %44 : vector<16x32xbf16> to vector<16x32xf32>
      %c0_32 = arith.constant 0 : index
      %c0_33 = arith.constant 0 : index
      %46 = vector.load %arg23[%c0_32, %c0_33] : memref<16x32xf32, #tpu.memory_space<vmem>>, vector<16x32xf32>
      %c0_34 = arith.constant 0 : index
      %c0_35 = arith.constant 0 : index
      %47 = vector.load %arg22[%c0_34, %c0_35] : memref<16x1xf32, #tpu.memory_space<vmem>>, vector<16x1xf32>
      %48 = tpu.reciprocal %47 {approx = true} : vector<16x1xf32> -> vector<16x1xf32>
      %49 = vector.broadcast %48 : vector<16x1xf32> to vector<16x32xf32>
      %50 = arith.mulf %46, %49 : vector<16x32xf32>
      %51 = arith.truncf %50 : vector<16x32xf32> to vector<16x32xbf16>
      %c0_36 = arith.constant 0 : index
      %c0_37 = arith.constant 0 : index
      %52 = vector.load %arg9[%c0_36, %c0_37] : memref<32x32xbf16, #tpu.memory_space<vmem>>, vector<32x32xbf16>
      %cst_38 = arith.constant dense<0.000000e+00> : vector<16x32xf32>
      %53 = tpu.matmul %51, %52, %cst_38 {dimension_numbers = #tpu.dot_dimension_numbers<[1], [0], [0], [1], [0, 0, 1, 1], [], []>} : vector<16x32xbf16>, vector<32x32xbf16>, vector<16x32xf32> -> vector<16x32xf32>
      %c0_39 = arith.constant 0 : index
      %c0_40 = arith.constant 0 : index
      %54 = vector.load %arg10[%c0_39, %c0_40] : memref<1x32xf32, #tpu.memory_space<vmem>>, vector<1x32xf32>
      %55 = vector.broadcast %54 : vector<1x32xf32> to vector<16x32xf32>
      %56 = arith.addf %53, %55 : vector<16x32xf32>
      %c0_41 = arith.constant 0 : index
      %c0_42 = arith.constant 0 : index
      %57 = vector.load %arg11[%c0_41, %c0_42] : memref<1x32xf32, #tpu.memory_space<vmem>>, vector<1x32xf32>
      %c0_43 = arith.constant 0 : index
      %c0_44 = arith.constant 0 : index
      %58 = vector.load %arg12[%c0_43, %c0_44] : memref<1x32xf32, #tpu.memory_space<vmem>>, vector<1x32xf32>
      %cst_45 = arith.constant dense<0.000000e+00> : vector<16xf32>
      %59 = vector.multi_reduction <add>, %56, %cst_45 [1] : vector<16x32xf32> to vector<16xf32>
      %60 = vector.shape_cast %59 : vector<16xf32> to vector<16x1xf32>
      %cst_46 = arith.constant 3.200000e+01 : f32
      %61 = vector.broadcast %cst_46 : f32 to vector<16x1xf32>
      %62 = arith.divf %60, %61 : vector<16x1xf32>
      %63 = vector.broadcast %62 : vector<16x1xf32> to vector<16x32xf32>
      %64 = arith.subf %56, %63 : vector<16x32xf32>
      %65 = arith.mulf %64, %64 : vector<16x32xf32>
      %cst_47 = arith.constant dense<0.000000e+00> : vector<16xf32>
      %66 = vector.multi_reduction <add>, %65, %cst_47 [1] : vector<16x32xf32> to vector<16xf32>
      %67 = vector.shape_cast %66 : vector<16xf32> to vector<16x1xf32>
      %cst_48 = arith.constant 3.200000e+01 : f32
      %68 = vector.broadcast %cst_48 : f32 to vector<16x1xf32>
      %69 = arith.divf %67, %68 : vector<16x1xf32>
      %70 = vector.broadcast %62 : vector<16x1xf32> to vector<16x32xf32>
      %71 = arith.subf %56, %70 : vector<16x32xf32>
      %cst_49 = arith.constant 9.99999974E-6 : f32
      %72 = vector.broadcast %cst_49 : f32 to vector<16x1xf32>
      %73 = arith.addf %69, %72 : vector<16x1xf32>
      %74 = math.rsqrt %73 : vector<16x1xf32>
      %75 = vector.broadcast %74 : vector<16x1xf32> to vector<16x32xf32>
      %76 = arith.mulf %71, %75 : vector<16x32xf32>
      %77 = vector.broadcast %57 : vector<1x32xf32> to vector<16x32xf32>
      %78 = arith.mulf %76, %77 : vector<16x32xf32>
      %79 = vector.broadcast %58 : vector<1x32xf32> to vector<16x32xf32>
      %80 = arith.addf %78, %79 : vector<16x32xf32>
      %81 = tpu.concatenate %45, %80 in 1 : vector<16x32xf32>, vector<16x32xf32> -> vector<16x64xf32>
      %82 = arith.truncf %81 : vector<16x64xf32> to vector<16x64xbf16>
      %c0_50 = arith.constant 0 : index
      %c0_51 = arith.constant 0 : index
      %83 = vector.load %arg13[%c0_50, %c0_51] : memref<64x256xbf16, #tpu.memory_space<vmem>>, vector<64x256xbf16>
      %cst_52 = arith.constant dense<0.000000e+00> : vector<16x256xf32>
      %84 = tpu.matmul %82, %83, %cst_52 {dimension_numbers = #tpu.dot_dimension_numbers<[1], [0], [0], [1], [0, 0, 1, 1], [], []>} : vector<16x64xbf16>, vector<64x256xbf16>, vector<16x256xf32> -> vector<16x256xf32>
      %c0_53 = arith.constant 0 : index
      %c0_54 = arith.constant 0 : index
      %85 = vector.load %arg14[%c0_53, %c0_54] : memref<1x256xf32, #tpu.memory_space<vmem>>, vector<1x256xf32>
      %86 = vector.broadcast %85 : vector<1x256xf32> to vector<16x256xf32>
      %87 = arith.addf %84, %86 : vector<16x256xf32>
      %88 = arith.mulf %87, %87 : vector<16x256xf32>
      %89 = arith.mulf %87, %88 : vector<16x256xf32>
      %cst_55 = arith.constant 4.471500e-02 : f32
      %90 = vector.broadcast %cst_55 : f32 to vector<16x256xf32>
      %91 = arith.mulf %90, %89 : vector<16x256xf32>
      %92 = arith.addf %87, %91 : vector<16x256xf32>
      %cst_56 = arith.constant 0.797884583 : f32
      %93 = vector.broadcast %cst_56 : f32 to vector<16x256xf32>
      %94 = arith.mulf %93, %92 : vector<16x256xf32>
      %95 = math.tanh %94 : vector<16x256xf32>
      %cst_57 = arith.constant 1.000000e+00 : f32
      %96 = vector.broadcast %cst_57 : f32 to vector<16x256xf32>
      %97 = arith.addf %96, %95 : vector<16x256xf32>
      %cst_58 = arith.constant 5.000000e-01 : f32
      %98 = vector.broadcast %cst_58 : f32 to vector<16x256xf32>
      %99 = arith.mulf %98, %97 : vector<16x256xf32>
      %100 = arith.mulf %87, %99 : vector<16x256xf32>
      %101 = arith.truncf %100 : vector<16x256xf32> to vector<16x256xbf16>
      %c0_59 = arith.constant 0 : index
      %c0_60 = arith.constant 0 : index
      %102 = vector.load %arg15[%c0_59, %c0_60] : memref<256x32xbf16, #tpu.memory_space<vmem>>, vector<256x32xbf16>
      %cst_61 = arith.constant dense<0.000000e+00> : vector<16x32xf32>
      %103 = tpu.matmul %101, %102, %cst_61 {dimension_numbers = #tpu.dot_dimension_numbers<[1], [0], [0], [1], [0, 0, 1, 1], [], []>} : vector<16x256xbf16>, vector<256x32xbf16>, vector<16x32xf32> -> vector<16x32xf32>
      %c0_62 = arith.constant 0 : index
      %c0_63 = arith.constant 0 : index
      %104 = vector.load %arg16[%c0_62, %c0_63] : memref<1x32xf32, #tpu.memory_space<vmem>>, vector<1x32xf32>
      %105 = vector.broadcast %104 : vector<1x32xf32> to vector<16x32xf32>
      %106 = arith.addf %103, %105 : vector<16x32xf32>
      %c0_64 = arith.constant 0 : index
      %c0_65 = arith.constant 0 : index
      %107 = vector.load %arg17[%c0_64, %c0_65] : memref<1x32xf32, #tpu.memory_space<vmem>>, vector<1x32xf32>
      %c0_66 = arith.constant 0 : index
      %c0_67 = arith.constant 0 : index
      %108 = vector.load %arg18[%c0_66, %c0_67] : memref<1x32xf32, #tpu.memory_space<vmem>>, vector<1x32xf32>
      %cst_68 = arith.constant dense<0.000000e+00> : vector<16xf32>
      %109 = vector.multi_reduction <add>, %106, %cst_68 [1] : vector<16x32xf32> to vector<16xf32>
      %110 = vector.shape_cast %109 : vector<16xf32> to vector<16x1xf32>
      %cst_69 = arith.constant 3.200000e+01 : f32
      %111 = vector.broadcast %cst_69 : f32 to vector<16x1xf32>
      %112 = arith.divf %110, %111 : vector<16x1xf32>
      %113 = vector.broadcast %112 : vector<16x1xf32> to vector<16x32xf32>
      %114 = arith.subf %106, %113 : vector<16x32xf32>
      %115 = arith.mulf %114, %114 : vector<16x32xf32>
      %cst_70 = arith.constant dense<0.000000e+00> : vector<16xf32>
      %116 = vector.multi_reduction <add>, %115, %cst_70 [1] : vector<16x32xf32> to vector<16xf32>
      %117 = vector.shape_cast %116 : vector<16xf32> to vector<16x1xf32>
      %cst_71 = arith.constant 3.200000e+01 : f32
      %118 = vector.broadcast %cst_71 : f32 to vector<16x1xf32>
      %119 = arith.divf %117, %118 : vector<16x1xf32>
      %120 = vector.broadcast %112 : vector<16x1xf32> to vector<16x32xf32>
      %121 = arith.subf %106, %120 : vector<16x32xf32>
      %cst_72 = arith.constant 9.99999974E-6 : f32
      %122 = vector.broadcast %cst_72 : f32 to vector<16x1xf32>
      %123 = arith.addf %119, %122 : vector<16x1xf32>
      %124 = math.rsqrt %123 : vector<16x1xf32>
      %125 = vector.broadcast %124 : vector<16x1xf32> to vector<16x32xf32>
      %126 = arith.mulf %121, %125 : vector<16x32xf32>
      %127 = vector.broadcast %107 : vector<1x32xf32> to vector<16x32xf32>
      %128 = arith.mulf %126, %127 : vector<16x32xf32>
      %129 = vector.broadcast %108 : vector<1x32xf32> to vector<16x32xf32>
      %130 = arith.addf %128, %129 : vector<16x32xf32>
      %131 = arith.addf %45, %130 : vector<16x32xf32>
      %132 = arith.truncf %131 : vector<16x32xf32> to vector<16x32xbf16>
      %c0_73 = arith.constant 0 : index
      %c0_74 = arith.constant 0 : index
      %c0_75 = arith.constant 0 : index
      %133 = vector.load %arg19[%c0_73, %c0_74, %c0_75] : memref<1x16x32xbf16, #tpu.memory_space<vmem>>, vector<1x16x32xbf16>
      %134 = vector.shape_cast %133 : vector<1x16x32xbf16> to vector<16x32xbf16>
      %135 = vector.shape_cast %132 : vector<16x32xbf16> to vector<1x16x32xbf16>
      tpu.vector_store %arg19[%c0_73, %c0_74, %c0_75], %135 {strides = array<i32>} : memref<1x16x32xbf16, #tpu.memory_space<vmem>>, vector<1x16x32xbf16>,
    } else {
    }
    return
  }
  func.func @transform_0(%arg0: i32, %arg1: i32, %arg2: i32) -> (i32, i32, i32) {
    %c0_i32 = arith.constant 0 : i32
    %c0_i32_0 = arith.constant 0 : i32
    return %arg0, %arg1, %c0_i32 : i32, i32, i32
  }
  func.func @transform_1(%arg0: i32, %arg1: i32, %arg2: i32) -> (i32, i32, i32) {
    %c0_i32 = arith.constant 0 : i32
    %c0_i32_0 = arith.constant 0 : i32
    return %arg0, %arg2, %c0_i32 : i32, i32, i32
  }
  func.func @transform_2(%arg0: i32, %arg1: i32, %arg2: i32) -> (i32, i32) {
    %c0_i32 = arith.constant 0 : i32
    %c0_i32_0 = arith.constant 0 : i32
    %c0_i32_1 = arith.constant 0 : i32
    return %c0_i32, %c0_i32_0 : i32, i32
  }
  func.func @transform_3(%arg0: i32, %arg1: i32, %arg2: i32) -> (i32, i32) {
    %c0_i32 = arith.constant 0 : i32
    %c0_i32_0 = arith.constant 0 : i32
    %c0_i32_1 = arith.constant 0 : i32
    return %c0_i32, %c0_i32_0 : i32, i32
  }
  func.func @transform_4(%arg0: i32, %arg1: i32, %arg2: i32) -> (i32, i32) {
    %c0_i32 = arith.constant 0 : i32
    %c0_i32_0 = arith.constant 0 : i32
    %c0_i32_1 = arith.constant 0 : i32
    return %c0_i32, %c0_i32_0 : i32, i32
  }
  func.func @transform_5(%arg0: i32, %arg1: i32, %arg2: i32) -> (i32, i32) {
    %c0_i32 = arith.constant 0 : i32
    %c0_i32_0 = arith.constant 0 : i32
    %c0_i32_1 = arith.constant 0 : i32
    return %c0_i32, %c0_i32_0 : i32, i32
  }
  func.func @transform_6(%arg0: i32, %arg1: i32, %arg2: i32) -> (i32, i32) {
    %c0_i32 = arith.constant 0 : i32
    %c0_i32_0 = arith.constant 0 : i32
    %c0_i32_1 = arith.constant 0 : i32
    return %c0_i32, %c0_i32_0 : i32, i32
  }
  func.func @transform_7(%arg0: i32, %arg1: i32, %arg2: i32) -> (i32, i32) {
    %c0_i32 = arith.constant 0 : i32
    %c0_i32_0 = arith.constant 0 : i32
    %c0_i32_1 = arith.constant 0 : i32
    return %c0_i32, %c0_i32_0 : i32, i32
  }
  func.func @transform_8(%arg0: i32, %arg1: i32, %arg2: i32) -> (i32, i32) {
    %c0_i32 = arith.constant 0 : i32
    %c0_i32_0 = arith.constant 0 : i32
    %c0_i32_1 = arith.constant 0 : i32
    return %c0_i32, %c0_i32_0 : i32, i32
  }
  func.func @transform_9(%arg0: i32, %arg1: i32, %arg2: i32) -> (i32, i32) {
    %c0_i32 = arith.constant 0 : i32
    %c0_i32_0 = arith.constant 0 : i32
    %c0_i32_1 = arith.constant 0 : i32
    return %c0_i32, %c0_i32_0 : i32, i32
  }
  func.func @transform_10(%arg0: i32, %arg1: i32, %arg2: i32) -> (i32, i32) {
    %c0_i32 = arith.constant 0 : i32
    %c0_i32_0 = arith.constant 0 : i32
    %c0_i32_1 = arith.constant 0 : i32
    return %c0_i32, %c0_i32_0 : i32, i32
  }
  func.func @transform_11(%arg0: i32, %arg1: i32, %arg2: i32) -> (i32, i32) {
    %c0_i32 = arith.constant 0 : i32
    %c0_i32_0 = arith.constant 0 : i32
    %c0_i32_1 = arith.constant 0 : i32
    return %c0_i32, %c0_i32_0 : i32, i32
  }
  func.func @transform_12(%arg0: i32, %arg1: i32, %arg2: i32) -> (i32, i32) {
    %c0_i32 = arith.constant 0 : i32
    %c0_i32_0 = arith.constant 0 : i32
    %c0_i32_1 = arith.constant 0 : i32
    return %c0_i32, %c0_i32_0 : i32, i32
  }
  func.func @transform_13(%arg0: i32, %arg1: i32, %arg2: i32) -> (i32, i32) {
    %c0_i32 = arith.constant 0 : i32
    %c0_i32_0 = arith.constant 0 : i32
    %c0_i32_1 = arith.constant 0 : i32
    return %c0_i32, %c0_i32_0 : i32, i32
  }
  func.func @transform_14(%arg0: i32, %arg1: i32, %arg2: i32) -> (i32, i32) {
    %c0_i32 = arith.constant 0 : i32
    %c0_i32_0 = arith.constant 0 : i32
    %c0_i32_1 = arith.constant 0 : i32
    return %c0_i32, %c0_i32_0 : i32, i32
  }
  func.func @transform_15(%arg0: i32, %arg1: i32, %arg2: i32) -> (i32, i32) {
    %c0_i32 = arith.constant 0 : i32
    %c0_i32_0 = arith.constant 0 : i32
    %c0_i32_1 = arith.constant 0 : i32
    return %c0_i32, %c0_i32_0 : i32, i32
  }
  func.func @transform_16(%arg0: i32, %arg1: i32, %arg2: i32) -> (i32, i32, i32) {
    %c0_i32 = arith.constant 0 : i32
    %c0_i32_0 = arith.constant 0 : i32
    return %arg0, %arg1, %c0_i32 : i32, i32, i32
  }
}

module attributes {stable_mosaic.version = 11 : i64} {
  func.func @_flash_vt_kernel(%arg0: i32, %arg1: i32, %arg2: i32, %arg3: memref<1x16x32xbf16, #tpu.memory_space<vmem>>, %arg4: memref<1x16x32xbf16, #tpu.memory_space<vmem>>, %arg5: memref<1x2x16xf32, #tpu.memory_space<vmem>>, %arg6: memref<1x2x16xf32, #tpu.memory_space<vmem>>, %arg7: memref<16x32xbf16, #tpu.memory_space<vmem>>, %arg8: memref<1x16xf32, #tpu.memory_space<vmem>>, %arg9: memref<1x16xf32, #tpu.memory_space<vmem>>, %arg10: memref<2x16xf32, #tpu.memory_space<vmem>>) attributes {dimension_semantics = [#tpu.dimension_semantics<parallel>, #tpu.dimension_semantics<parallel>, #tpu.dimension_semantics<arbitrary>], iteration_bounds = array<i64: 2, 1, 1>, scalar_prefetch = 0 : i64, scratch_operands = 4 : i64, tpu.core_type = #tpu.core_type<tc>, window_params = [{transform_indices = @transform_0, window_bounds = array<i64: 1, 16, 32>}, {transform_indices = @transform_1, window_bounds = array<i64: 1, 16, 32>}, {transform_indices = @transform_2, window_bounds = array<i64: 1, 2, 16>}, {transform_indices = @transform_3, window_bounds = array<i64: 1, 2, 16>}]} {
    %c0_i32 = arith.constant 0 : i32
    %0 = arith.cmpi eq, %arg2, %c0_i32 : i32
    %1 = arith.extui %0 : i1 to i32
    %c0_i32_0 = arith.constant 0 : i32
    %2 = arith.cmpi ne, %1, %c0_i32_0 : i32
    scf.if %2 {
      %c0_27 = arith.constant 0 : index
      %c0_28 = arith.constant 0 : index
      %c0_29 = arith.constant 0 : index
      %37 = vector.load %arg3[%c0_27, %c0_28, %c0_29] : memref<1x16x32xbf16, #tpu.memory_space<vmem>>, vector<1x16x32xbf16>
      %38 = vector.shape_cast %37 : vector<1x16x32xbf16> to vector<16x32xbf16>
      %39 = arith.extf %38 : vector<16x32xbf16> to vector<16x32xf32>
      %cst_30 = arith.constant 0.176776692 : f32
      %40 = vector.broadcast %cst_30 : f32 to vector<16x32xf32>
      %41 = arith.mulf %39, %40 : vector<16x32xf32>
      %42 = arith.truncf %41 : vector<16x32xf32> to vector<16x32xbf16>
      %c0_31 = arith.constant 0 : index
      %c0_32 = arith.constant 0 : index
      %43 = vector.load %arg7[%c0_31, %c0_32] : memref<16x32xbf16, #tpu.memory_space<vmem>>, vector<16x32xbf16>
      tpu.vector_store %arg7[%c0_31, %c0_32], %42 {strides = array<i32>} : memref<16x32xbf16, #tpu.memory_space<vmem>>, vector<16x32xbf16>,
      %cst_33 = arith.constant 0xFF800000 : f32
      %44 = vector.broadcast %cst_33 : f32 to vector<1x16xf32>
      %c0_34 = arith.constant 0 : index
      %c0_35 = arith.constant 0 : index
      %45 = vector.load %arg8[%c0_34, %c0_35] : memref<1x16xf32, #tpu.memory_space<vmem>>, vector<1x16xf32>
      tpu.vector_store %arg8[%c0_34, %c0_35], %44 {strides = array<i32>} : memref<1x16xf32, #tpu.memory_space<vmem>>, vector<1x16xf32>,
      %cst_36 = arith.constant 0.000000e+00 : f32
      %46 = vector.broadcast %cst_36 : f32 to vector<1x16xf32>
      %c0_37 = arith.constant 0 : index
      %c0_38 = arith.constant 0 : index
      %47 = vector.load %arg9[%c0_37, %c0_38] : memref<1x16xf32, #tpu.memory_space<vmem>>, vector<1x16xf32>
      tpu.vector_store %arg9[%c0_37, %c0_38], %46 {strides = array<i32>} : memref<1x16xf32, #tpu.memory_space<vmem>>, vector<1x16xf32>,
      %cst_39 = arith.constant 0.000000e+00 : f32
      %48 = vector.broadcast %cst_39 : f32 to vector<2x16xf32>
      %c0_40 = arith.constant 0 : index
      %c0_41 = arith.constant 0 : index
      %49 = vector.load %arg10[%c0_40, %c0_41] : memref<2x16xf32, #tpu.memory_space<vmem>>, vector<2x16xf32>
      tpu.vector_store %arg10[%c0_40, %c0_41], %48 {strides = array<i32>} : memref<2x16xf32, #tpu.memory_space<vmem>>, vector<2x16xf32>,
    } else {
    }
    %c0 = arith.constant 0 : index
    %c0_1 = arith.constant 0 : index
    %c0_2 = arith.constant 0 : index
    %3 = vector.load %arg4[%c0, %c0_1, %c0_2] : memref<1x16x32xbf16, #tpu.memory_space<vmem>>, vector<1x16x32xbf16>
    %4 = vector.shape_cast %3 : vector<1x16x32xbf16> to vector<16x32xbf16>
    %c0_3 = arith.constant 0 : index
    %c0_4 = arith.constant 0 : index
    %5 = vector.load %arg7[%c0_3, %c0_4] : memref<16x32xbf16, #tpu.memory_space<vmem>>, vector<16x32xbf16>
    %c0_5 = arith.constant 0 : index
    %c0_6 = arith.constant 0 : index
    %c0_7 = arith.constant 0 : index
    %6 = vector.load %arg5[%c0_5, %c0_6, %c0_7] : memref<1x2x16xf32, #tpu.memory_space<vmem>>, vector<1x2x16xf32>
    %7 = vector.shape_cast %6 : vector<1x2x16xf32> to vector<2x16xf32>
    %cst = arith.constant dense<0.000000e+00> : vector<16x16xf32>
    %8 = tpu.matmul %4, %5, %cst {dimension_numbers = #tpu.dot_dimension_numbers<[1], [1], [0], [0], [0, 0, 1, 0], [], []>} : vector<16x32xbf16>, vector<16x32xbf16>, vector<16x16xf32> -> vector<16x16xf32>
    %c0_8 = arith.constant 0 : index
    %c0_9 = arith.constant 0 : index
    %9 = vector.load %arg8[%c0_8, %c0_9] : memref<1x16xf32, #tpu.memory_space<vmem>>, vector<1x16xf32>
    %cst_10 = arith.constant dense<0xFF800000> : vector<16xf32>
    %10 = vector.multi_reduction <maximumf>, %8, %cst_10 [0] : vector<16x16xf32> to vector<16xf32>
    %11 = vector.shape_cast %10 : vector<16xf32> to vector<1x16xf32>
    %12 = arith.maximumf %9, %11 : vector<1x16xf32>
    %c0_11 = arith.constant 0 : index
    %c0_12 = arith.constant 0 : index
    %13 = vector.load %arg8[%c0_11, %c0_12] : memref<1x16xf32, #tpu.memory_space<vmem>>, vector<1x16xf32>
    %14 = arith.subf %13, %12 : vector<1x16xf32>
    %15 = math.exp %14 : vector<1x16xf32>
    %16 = vector.broadcast %12 : vector<1x16xf32> to vector<16x16xf32>
    %17 = arith.subf %8, %16 : vector<16x16xf32>
    %18 = math.exp %17 : vector<16x16xf32>
    %c0_13 = arith.constant 0 : index
    %c0_14 = arith.constant 0 : index
    %19 = vector.load %arg9[%c0_13, %c0_14] : memref<1x16xf32, #tpu.memory_space<vmem>>, vector<1x16xf32>
    %20 = arith.mulf %15, %19 : vector<1x16xf32>
    %cst_15 = arith.constant dense<0.000000e+00> : vector<16xf32>
    %21 = vector.multi_reduction <add>, %18, %cst_15 [0] : vector<16x16xf32> to vector<16xf32>
    %22 = vector.shape_cast %21 : vector<16xf32> to vector<1x16xf32>
    %23 = arith.addf %20, %22 : vector<1x16xf32>
    %c0_16 = arith.constant 0 : index
    %c0_17 = arith.constant 0 : index
    %24 = vector.load %arg9[%c0_16, %c0_17] : memref<1x16xf32, #tpu.memory_space<vmem>>, vector<1x16xf32>
    tpu.vector_store %arg9[%c0_16, %c0_17], %23 {strides = array<i32>} : memref<1x16xf32, #tpu.memory_space<vmem>>, vector<1x16xf32>,
    %25 = arith.truncf %7 : vector<2x16xf32> to vector<2x16xbf16>
    %26 = arith.truncf %18 : vector<16x16xf32> to vector<16x16xbf16>
    %cst_18 = arith.constant dense<0.000000e+00> : vector<2x16xf32>
    %27 = tpu.matmul %25, %26, %cst_18 {dimension_numbers = #tpu.dot_dimension_numbers<[1], [0], [0], [1], [0, 0, 1, 1], [], []>} : vector<2x16xbf16>, vector<16x16xbf16>, vector<2x16xf32> -> vector<2x16xf32>
    %c0_19 = arith.constant 0 : index
    %c0_20 = arith.constant 0 : index
    %28 = vector.load %arg10[%c0_19, %c0_20] : memref<2x16xf32, #tpu.memory_space<vmem>>, vector<2x16xf32>
    %29 = vector.broadcast %15 : vector<1x16xf32> to vector<2x16xf32>
    %30 = arith.mulf %29, %28 : vector<2x16xf32>
    %31 = arith.addf %30, %27 : vector<2x16xf32>
    %c0_21 = arith.constant 0 : index
    %c0_22 = arith.constant 0 : index
    %32 = vector.load %arg10[%c0_21, %c0_22] : memref<2x16xf32, #tpu.memory_space<vmem>>, vector<2x16xf32>
    tpu.vector_store %arg10[%c0_21, %c0_22], %31 {strides = array<i32>} : memref<2x16xf32, #tpu.memory_space<vmem>>, vector<2x16xf32>,
    %c0_23 = arith.constant 0 : index
    %c0_24 = arith.constant 0 : index
    %33 = vector.load %arg8[%c0_23, %c0_24] : memref<1x16xf32, #tpu.memory_space<vmem>>, vector<1x16xf32>
    tpu.vector_store %arg8[%c0_23, %c0_24], %12 {strides = array<i32>} : memref<1x16xf32, #tpu.memory_space<vmem>>, vector<1x16xf32>,
    %c0_i32_25 = arith.constant 0 : i32
    %34 = arith.cmpi eq, %arg2, %c0_i32_25 : i32
    %35 = arith.extui %34 : i1 to i32
    %c0_i32_26 = arith.constant 0 : i32
    %36 = arith.cmpi ne, %35, %c0_i32_26 : i32
    scf.if %36 {
      %c0_27 = arith.constant 0 : index
      %c0_28 = arith.constant 0 : index
      %37 = vector.load %arg10[%c0_27, %c0_28] : memref<2x16xf32, #tpu.memory_space<vmem>>, vector<2x16xf32>
      %c0_29 = arith.constant 0 : index
      %c0_30 = arith.constant 0 : index
      %38 = vector.load %arg9[%c0_29, %c0_30] : memref<1x16xf32, #tpu.memory_space<vmem>>, vector<1x16xf32>
      %39 = tpu.reciprocal %38 : vector<1x16xf32> -> vector<1x16xf32>
      %40 = vector.broadcast %39 : vector<1x16xf32> to vector<2x16xf32>
      %41 = arith.mulf %37, %40 : vector<2x16xf32>
      %c0_31 = arith.constant 0 : index
      %c0_32 = arith.constant 0 : index
      %c0_33 = arith.constant 0 : index
      %42 = vector.load %arg6[%c0_31, %c0_32, %c0_33] : memref<1x2x16xf32, #tpu.memory_space<vmem>>, vector<1x2x16xf32>
      %43 = vector.shape_cast %42 : vector<1x2x16xf32> to vector<2x16xf32>
      %44 = vector.shape_cast %41 : vector<2x16xf32> to vector<1x2x16xf32>
      tpu.vector_store %arg6[%c0_31, %c0_32, %c0_33], %44 {strides = array<i32>} : memref<1x2x16xf32, #tpu.memory_space<vmem>>, vector<1x2x16xf32>,
    } else {
    }
    return
  }
  func.func @transform_0(%arg0: i32, %arg1: i32, %arg2: i32) -> (i32, i32, i32) {
    %c0_i32 = arith.constant 0 : i32
    %c0_i32_0 = arith.constant 0 : i32
    return %arg0, %arg1, %c0_i32 : i32, i32, i32
  }
  func.func @transform_1(%arg0: i32, %arg1: i32, %arg2: i32) -> (i32, i32, i32) {
    %c0_i32 = arith.constant 0 : i32
    %c0_i32_0 = arith.constant 0 : i32
    return %arg0, %arg2, %c0_i32 : i32, i32, i32
  }
  func.func @transform_2(%arg0: i32, %arg1: i32, %arg2: i32) -> (i32, i32, i32) {
    %c0_i32 = arith.constant 0 : i32
    %c0_i32_0 = arith.constant 0 : i32
    %c0_i32_1 = arith.constant 0 : i32
    return %c0_i32, %c0_i32_0, %arg2 : i32, i32, i32
  }
  func.func @transform_3(%arg0: i32, %arg1: i32, %arg2: i32) -> (i32, i32, i32) {
    %c0_i32 = arith.constant 0 : i32
    %c0_i32_0 = arith.constant 0 : i32
    return %arg0, %c0_i32, %arg1 : i32, i32, i32
  }
}

module attributes {stable_mosaic.version = 11 : i64} {
  func.func @_prop_flash_vt_kernel(%arg0: i32, %arg1: i32, %arg2: i32, %arg3: memref<1x16x32xbf16, #tpu.memory_space<vmem>>, %arg4: memref<1x16x32xbf16, #tpu.memory_space<vmem>>, %arg5: memref<1x2x16xf32, #tpu.memory_space<vmem>>, %arg6: memref<32x32xbf16, #tpu.memory_space<vmem>>, %arg7: memref<1x32xf32, #tpu.memory_space<vmem>>, %arg8: memref<32x32xbf16, #tpu.memory_space<vmem>>, %arg9: memref<1x32xf32, #tpu.memory_space<vmem>>, %arg10: memref<1x2x16xf32, #tpu.memory_space<vmem>>, %arg11: memref<16x32xbf16, #tpu.memory_space<vmem>>, %arg12: memref<1x16xf32, #tpu.memory_space<vmem>>, %arg13: memref<1x16xf32, #tpu.memory_space<vmem>>, %arg14: memref<2x16xf32, #tpu.memory_space<vmem>>) attributes {dimension_semantics = [#tpu.dimension_semantics<parallel>, #tpu.dimension_semantics<parallel>, #tpu.dimension_semantics<arbitrary>], iteration_bounds = array<i64: 2, 1, 1>, scalar_prefetch = 0 : i64, scratch_operands = 4 : i64, tpu.core_type = #tpu.core_type<tc>, window_params = [{transform_indices = @transform_0, window_bounds = array<i64: 1, 16, 32>}, {transform_indices = @transform_1, window_bounds = array<i64: 1, 16, 32>}, {transform_indices = @transform_2, window_bounds = array<i64: 1, 2, 16>}, {pipeline_mode = #tpu.pipeline_mode<synchronous>, transform_indices = @transform_3, window_bounds = array<i64: 32, 32>}, {pipeline_mode = #tpu.pipeline_mode<synchronous>, transform_indices = @transform_4, window_bounds = array<i64: 1, 32>}, {pipeline_mode = #tpu.pipeline_mode<synchronous>, transform_indices = @transform_5, window_bounds = array<i64: 32, 32>}, {pipeline_mode = #tpu.pipeline_mode<synchronous>, transform_indices = @transform_6, window_bounds = array<i64: 1, 32>}, {transform_indices = @transform_7, window_bounds = array<i64: 1, 2, 16>}]} {
    %c0_i32 = arith.constant 0 : i32
    %0 = arith.cmpi eq, %arg2, %c0_i32 : i32
    %1 = arith.extui %0 : i1 to i32
    %c0_i32_0 = arith.constant 0 : i32
    %2 = arith.cmpi ne, %1, %c0_i32_0 : i32
    scf.if %2 {
      %c0_32 = arith.constant 0 : index
      %c0_33 = arith.constant 0 : index
      %c0_34 = arith.constant 0 : index
      %41 = vector.load %arg3[%c0_32, %c0_33, %c0_34] : memref<1x16x32xbf16, #tpu.memory_space<vmem>>, vector<1x16x32xbf16>
      %42 = vector.shape_cast %41 : vector<1x16x32xbf16> to vector<16x32xbf16>
      %c0_35 = arith.constant 0 : index
      %c0_36 = arith.constant 0 : index
      %43 = vector.load %arg6[%c0_35, %c0_36] : memref<32x32xbf16, #tpu.memory_space<vmem>>, vector<32x32xbf16>
      %cst_37 = arith.constant dense<0.000000e+00> : vector<16x32xf32>
      %44 = tpu.matmul %42, %43, %cst_37 {dimension_numbers = #tpu.dot_dimension_numbers<[1], [0], [0], [1], [0, 0, 1, 1], [], []>} : vector<16x32xbf16>, vector<32x32xbf16>, vector<16x32xf32> -> vector<16x32xf32>
      %c0_38 = arith.constant 0 : index
      %c0_39 = arith.constant 0 : index
      %45 = vector.load %arg7[%c0_38, %c0_39] : memref<1x32xf32, #tpu.memory_space<vmem>>, vector<1x32xf32>
      %46 = vector.broadcast %45 : vector<1x32xf32> to vector<16x32xf32>
      %47 = arith.addf %44, %46 : vector<16x32xf32>
      %cst_40 = arith.constant 0.176776692 : f32
      %48 = vector.broadcast %cst_40 : f32 to vector<16x32xf32>
      %49 = arith.mulf %47, %48 : vector<16x32xf32>
      %50 = arith.truncf %49 : vector<16x32xf32> to vector<16x32xbf16>
      %c0_41 = arith.constant 0 : index
      %c0_42 = arith.constant 0 : index
      %51 = vector.load %arg11[%c0_41, %c0_42] : memref<16x32xbf16, #tpu.memory_space<vmem>>, vector<16x32xbf16>
      tpu.vector_store %arg11[%c0_41, %c0_42], %50 {strides = array<i32>} : memref<16x32xbf16, #tpu.memory_space<vmem>>, vector<16x32xbf16>,
      %cst_43 = arith.constant 0xFF800000 : f32
      %52 = vector.broadcast %cst_43 : f32 to vector<1x16xf32>
      %c0_44 = arith.constant 0 : index
      %c0_45 = arith.constant 0 : index
      %53 = vector.load %arg12[%c0_44, %c0_45] : memref<1x16xf32, #tpu.memory_space<vmem>>, vector<1x16xf32>
      tpu.vector_store %arg12[%c0_44, %c0_45], %52 {strides = array<i32>} : memref<1x16xf32, #tpu.memory_space<vmem>>, vector<1x16xf32>,
      %cst_46 = arith.constant 0.000000e+00 : f32
      %54 = vector.broadcast %cst_46 : f32 to vector<1x16xf32>
      %c0_47 = arith.constant 0 : index
      %c0_48 = arith.constant 0 : index
      %55 = vector.load %arg13[%c0_47, %c0_48] : memref<1x16xf32, #tpu.memory_space<vmem>>, vector<1x16xf32>
      tpu.vector_store %arg13[%c0_47, %c0_48], %54 {strides = array<i32>} : memref<1x16xf32, #tpu.memory_space<vmem>>, vector<1x16xf32>,
      %cst_49 = arith.constant 0.000000e+00 : f32
      %56 = vector.broadcast %cst_49 : f32 to vector<2x16xf32>
      %c0_50 = arith.constant 0 : index
      %c0_51 = arith.constant 0 : index
      %57 = vector.load %arg14[%c0_50, %c0_51] : memref<2x16xf32, #tpu.memory_space<vmem>>, vector<2x16xf32>
      tpu.vector_store %arg14[%c0_50, %c0_51], %56 {strides = array<i32>} : memref<2x16xf32, #tpu.memory_space<vmem>>, vector<2x16xf32>,
    } else {
    }
    %c0 = arith.constant 0 : index
    %c0_1 = arith.constant 0 : index
    %c0_2 = arith.constant 0 : index
    %3 = vector.load %arg4[%c0, %c0_1, %c0_2] : memref<1x16x32xbf16, #tpu.memory_space<vmem>>, vector<1x16x32xbf16>
    %4 = vector.shape_cast %3 : vector<1x16x32xbf16> to vector<16x32xbf16>
    %c0_3 = arith.constant 0 : index
    %c0_4 = arith.constant 0 : index
    %5 = vector.load %arg8[%c0_3, %c0_4] : memref<32x32xbf16, #tpu.memory_space<vmem>>, vector<32x32xbf16>
    %cst = arith.constant dense<0.000000e+00> : vector<16x32xf32>
    %6 = tpu.matmul %4, %5, %cst {dimension_numbers = #tpu.dot_dimension_numbers<[1], [0], [0], [1], [0, 0, 1, 1], [], []>} : vector<16x32xbf16>, vector<32x32xbf16>, vector<16x32xf32> -> vector<16x32xf32>
    %c0_5 = arith.constant 0 : index
    %c0_6 = arith.constant 0 : index
    %7 = vector.load %arg9[%c0_5, %c0_6] : memref<1x32xf32, #tpu.memory_space<vmem>>, vector<1x32xf32>
    %8 = vector.broadcast %7 : vector<1x32xf32> to vector<16x32xf32>
    %9 = arith.addf %6, %8 : vector<16x32xf32>
    %10 = arith.truncf %9 : vector<16x32xf32> to vector<16x32xbf16>
    %c0_7 = arith.constant 0 : index
    %c0_8 = arith.constant 0 : index
    %11 = vector.load %arg11[%c0_7, %c0_8] : memref<16x32xbf16, #tpu.memory_space<vmem>>, vector<16x32xbf16>
    %c0_9 = arith.constant 0 : index
    %c0_10 = arith.constant 0 : index
    %c0_11 = arith.constant 0 : index
    %12 = vector.load %arg5[%c0_9, %c0_10, %c0_11] : memref<1x2x16xf32, #tpu.memory_space<vmem>>, vector<1x2x16xf32>
    %13 = vector.shape_cast %12 : vector<1x2x16xf32> to vector<2x16xf32>
    %cst_12 = arith.constant dense<0.000000e+00> : vector<16x16xf32>
    %14 = tpu.matmul %10, %11, %cst_12 {dimension_numbers = #tpu.dot_dimension_numbers<[1], [1], [0], [0], [0, 0, 1, 0], [], []>} : vector<16x32xbf16>, vector<16x32xbf16>, vector<16x16xf32> -> vector<16x16xf32>
    %c0_13 = arith.constant 0 : index
    %c0_14 = arith.constant 0 : index
    %15 = vector.load %arg12[%c0_13, %c0_14] : memref<1x16xf32, #tpu.memory_space<vmem>>, vector<1x16xf32>
    %cst_15 = arith.constant dense<0xFF800000> : vector<16xf32>
    %16 = vector.multi_reduction <maximumf>, %14, %cst_15 [0] : vector<16x16xf32> to vector<16xf32>
    %17 = vector.shape_cast %16 : vector<16xf32> to vector<1x16xf32>
    %18 = arith.maximumf %15, %17 : vector<1x16xf32>
    %c0_16 = arith.constant 0 : index
    %c0_17 = arith.constant 0 : index
    %19 = vector.load %arg12[%c0_16, %c0_17] : memref<1x16xf32, #tpu.memory_space<vmem>>, vector<1x16xf32>
    %20 = arith.subf %19, %18 : vector<1x16xf32>
    %21 = math.exp %20 : vector<1x16xf32>
    %22 = vector.broadcast %18 : vector<1x16xf32> to vector<16x16xf32>
    %23 = arith.subf %14, %22 : vector<16x16xf32>
    %24 = math.exp %23 : vector<16x16xf32>
    %c0_18 = arith.constant 0 : index
    %c0_19 = arith.constant 0 : index
    %25 = vector.load %arg13[%c0_18, %c0_19] : memref<1x16xf32, #tpu.memory_space<vmem>>, vector<1x16xf32>
    %26 = arith.mulf %21, %25 : vector<1x16xf32>
    %cst_20 = arith.constant dense<0.000000e+00> : vector<16xf32>
    %27 = vector.multi_reduction <add>, %24, %cst_20 [0] : vector<16x16xf32> to vector<16xf32>
    %28 = vector.shape_cast %27 : vector<16xf32> to vector<1x16xf32>
    %29 = arith.addf %26, %28 : vector<1x16xf32>
    %c0_21 = arith.constant 0 : index
    %c0_22 = arith.constant 0 : index
    %30 = vector.load %arg13[%c0_21, %c0_22] : memref<1x16xf32, #tpu.memory_space<vmem>>, vector<1x16xf32>
    tpu.vector_store %arg13[%c0_21, %c0_22], %29 {strides = array<i32>} : memref<1x16xf32, #tpu.memory_space<vmem>>, vector<1x16xf32>,
    %cst_23 = arith.constant dense<0.000000e+00> : vector<2x16xf32>
    %31 = tpu.matmul %13, %24, %cst_23 {dimension_numbers = #tpu.dot_dimension_numbers<[1], [0], [0], [1], [0, 0, 1, 1], [], []>} : vector<2x16xf32>, vector<16x16xf32>, vector<2x16xf32> -> vector<2x16xf32>
    %c0_24 = arith.constant 0 : index
    %c0_25 = arith.constant 0 : index
    %32 = vector.load %arg14[%c0_24, %c0_25] : memref<2x16xf32, #tpu.memory_space<vmem>>, vector<2x16xf32>
    %33 = vector.broadcast %21 : vector<1x16xf32> to vector<2x16xf32>
    %34 = arith.mulf %33, %32 : vector<2x16xf32>
    %35 = arith.addf %34, %31 : vector<2x16xf32>
    %c0_26 = arith.constant 0 : index
    %c0_27 = arith.constant 0 : index
    %36 = vector.load %arg14[%c0_26, %c0_27] : memref<2x16xf32, #tpu.memory_space<vmem>>, vector<2x16xf32>
    tpu.vector_store %arg14[%c0_26, %c0_27], %35 {strides = array<i32>} : memref<2x16xf32, #tpu.memory_space<vmem>>, vector<2x16xf32>,
    %c0_28 = arith.constant 0 : index
    %c0_29 = arith.constant 0 : index
    %37 = vector.load %arg12[%c0_28, %c0_29] : memref<1x16xf32, #tpu.memory_space<vmem>>, vector<1x16xf32>
    tpu.vector_store %arg12[%c0_28, %c0_29], %18 {strides = array<i32>} : memref<1x16xf32, #tpu.memory_space<vmem>>, vector<1x16xf32>,
    %c0_i32_30 = arith.constant 0 : i32
    %38 = arith.cmpi eq, %arg2, %c0_i32_30 : i32
    %39 = arith.extui %38 : i1 to i32
    %c0_i32_31 = arith.constant 0 : i32
    %40 = arith.cmpi ne, %39, %c0_i32_31 : i32
    scf.if %40 {
      %c0_32 = arith.constant 0 : index
      %c0_33 = arith.constant 0 : index
      %41 = vector.load %arg14[%c0_32, %c0_33] : memref<2x16xf32, #tpu.memory_space<vmem>>, vector<2x16xf32>
      %c0_34 = arith.constant 0 : index
      %c0_35 = arith.constant 0 : index
      %42 = vector.load %arg13[%c0_34, %c0_35] : memref<1x16xf32, #tpu.memory_space<vmem>>, vector<1x16xf32>
      %43 = tpu.reciprocal %42 : vector<1x16xf32> -> vector<1x16xf32>
      %44 = vector.broadcast %43 : vector<1x16xf32> to vector<2x16xf32>
      %45 = arith.mulf %41, %44 : vector<2x16xf32>
      %c0_36 = arith.constant 0 : index
      %c0_37 = arith.constant 0 : index
      %c0_38 = arith.constant 0 : index
      %46 = vector.load %arg10[%c0_36, %c0_37, %c0_38] : memref<1x2x16xf32, #tpu.memory_space<vmem>>, vector<1x2x16xf32>
      %47 = vector.shape_cast %46 : vector<1x2x16xf32> to vector<2x16xf32>
      %48 = vector.shape_cast %45 : vector<2x16xf32> to vector<1x2x16xf32>
      tpu.vector_store %arg10[%c0_36, %c0_37, %c0_38], %48 {strides = array<i32>} : memref<1x2x16xf32, #tpu.memory_space<vmem>>, vector<1x2x16xf32>,
    } else {
    }
    return
  }
  func.func @transform_0(%arg0: i32, %arg1: i32, %arg2: i32) -> (i32, i32, i32) {
    %c0_i32 = arith.constant 0 : i32
    %c0_i32_0 = arith.constant 0 : i32
    return %arg0, %arg1, %c0_i32 : i32, i32, i32
  }
  func.func @transform_1(%arg0: i32, %arg1: i32, %arg2: i32) -> (i32, i32, i32) {
    %c0_i32 = arith.constant 0 : i32
    %c0_i32_0 = arith.constant 0 : i32
    return %arg0, %arg2, %c0_i32 : i32, i32, i32
  }
  func.func @transform_2(%arg0: i32, %arg1: i32, %arg2: i32) -> (i32, i32, i32) {
    %c0_i32 = arith.constant 0 : i32
    %c0_i32_0 = arith.constant 0 : i32
    return %arg0, %c0_i32, %arg2 : i32, i32, i32
  }
  func.func @transform_3(%arg0: i32, %arg1: i32, %arg2: i32) -> (i32, i32) {
    %c0_i32 = arith.constant 0 : i32
    %c0_i32_0 = arith.constant 0 : i32
    %c0_i32_1 = arith.constant 0 : i32
    return %c0_i32, %c0_i32_0 : i32, i32
  }
  func.func @transform_4(%arg0: i32, %arg1: i32, %arg2: i32) -> (i32, i32) {
    %c0_i32 = arith.constant 0 : i32
    %c0_i32_0 = arith.constant 0 : i32
    %c0_i32_1 = arith.constant 0 : i32
    return %c0_i32, %c0_i32_0 : i32, i32
  }
  func.func @transform_5(%arg0: i32, %arg1: i32, %arg2: i32) -> (i32, i32) {
    %c0_i32 = arith.constant 0 : i32
    %c0_i32_0 = arith.constant 0 : i32
    %c0_i32_1 = arith.constant 0 : i32
    return %c0_i32, %c0_i32_0 : i32, i32
  }
  func.func @transform_6(%arg0: i32, %arg1: i32, %arg2: i32) -> (i32, i32) {
    %c0_i32 = arith.constant 0 : i32
    %c0_i32_0 = arith.constant 0 : i32
    %c0_i32_1 = arith.constant 0 : i32
    return %c0_i32, %c0_i32_0 : i32, i32
  }
  func.func @transform_7(%arg0: i32, %arg1: i32, %arg2: i32) -> (i32, i32, i32) {
    %c0_i32 = arith.constant 0 : i32
    %c0_i32_0 = arith.constant 0 : i32
    return %arg0, %c0_i32, %arg1 : i32, i32, i32
  }
}

module attributes {stable_mosaic.version = 11 : i64} {
  func.func @_upsample_kernel(%arg0: i32, %arg1: memref<1x4x4xf32, #tpu.memory_space<vmem>>, %arg2: memref<32x4xf32, #tpu.memory_space<vmem>>, %arg3: memref<4x32xf32, #tpu.memory_space<vmem>>, %arg4: memref<1x32x32xf32, #tpu.memory_space<vmem>>) attributes {dimension_semantics = [#tpu.dimension_semantics<parallel>], iteration_bounds = array<i64: 4>, scalar_prefetch = 0 : i64, scratch_operands = 0 : i64, tpu.core_type = #tpu.core_type<tc>, window_params = [{transform_indices = @transform_0, window_bounds = array<i64: 1, 4, 4>}, {pipeline_mode = #tpu.pipeline_mode<synchronous>, transform_indices = @transform_1, window_bounds = array<i64: 32, 4>}, {pipeline_mode = #tpu.pipeline_mode<synchronous>, transform_indices = @transform_2, window_bounds = array<i64: 4, 32>}, {transform_indices = @transform_3, window_bounds = array<i64: 1, 32, 32>}]} {
    %c0 = arith.constant 0 : index
    %c0_0 = arith.constant 0 : index
    %c0_1 = arith.constant 0 : index
    %0 = vector.load %arg1[%c0, %c0_0, %c0_1] : memref<1x4x4xf32, #tpu.memory_space<vmem>>, vector<1x4x4xf32>
    %1 = vector.shape_cast %0 : vector<1x4x4xf32> to vector<4x4xf32>
    %c0_2 = arith.constant 0 : index
    %c0_3 = arith.constant 0 : index
    %2 = vector.load %arg2[%c0_2, %c0_3] : memref<32x4xf32, #tpu.memory_space<vmem>>, vector<32x4xf32>
    %cst = arith.constant dense<0.000000e+00> : vector<32x4xf32>
    %3 = tpu.matmul %2, %1, %cst {dimension_numbers = #tpu.dot_dimension_numbers<[1], [0], [0], [1], [0, 0, 1, 1], [], []>} : vector<32x4xf32>, vector<4x4xf32>, vector<32x4xf32> -> vector<32x4xf32>
    %c0_4 = arith.constant 0 : index
    %c0_5 = arith.constant 0 : index
    %4 = vector.load %arg3[%c0_4, %c0_5] : memref<4x32xf32, #tpu.memory_space<vmem>>, vector<4x32xf32>
    %cst_6 = arith.constant dense<0.000000e+00> : vector<32x32xf32>
    %5 = tpu.matmul %3, %4, %cst_6 {dimension_numbers = #tpu.dot_dimension_numbers<[1], [0], [0], [1], [0, 0, 1, 1], [], []>} : vector<32x4xf32>, vector<4x32xf32>, vector<32x32xf32> -> vector<32x32xf32>
    %cst_7 = arith.constant 8.000000e+00 : f32
    %6 = vector.broadcast %cst_7 : f32 to vector<32x32xf32>
    %7 = arith.mulf %5, %6 : vector<32x32xf32>
    %c0_8 = arith.constant 0 : index
    %c0_9 = arith.constant 0 : index
    %c0_10 = arith.constant 0 : index
    %8 = vector.load %arg4[%c0_8, %c0_9, %c0_10] : memref<1x32x32xf32, #tpu.memory_space<vmem>>, vector<1x32x32xf32>
    %9 = vector.shape_cast %8 : vector<1x32x32xf32> to vector<32x32xf32>
    %10 = vector.shape_cast %7 : vector<32x32xf32> to vector<1x32x32xf32>
    tpu.vector_store %arg4[%c0_8, %c0_9, %c0_10], %10 {strides = array<i32>} : memref<1x32x32xf32, #tpu.memory_space<vmem>>, vector<1x32x32xf32>,
    return
  }
  func.func @transform_0(%arg0: i32) -> (i32, i32, i32) {
    %c0_i32 = arith.constant 0 : i32
    %c0_i32_0 = arith.constant 0 : i32
    %c0_i32_1 = arith.constant 0 : i32
    return %arg0, %c0_i32, %c0_i32_0 : i32, i32, i32
  }
  func.func @transform_1(%arg0: i32) -> (i32, i32) {
    %c0_i32 = arith.constant 0 : i32
    %c0_i32_0 = arith.constant 0 : i32
    %c0_i32_1 = arith.constant 0 : i32
    return %c0_i32, %c0_i32_0 : i32, i32
  }
  func.func @transform_2(%arg0: i32) -> (i32, i32) {
    %c0_i32 = arith.constant 0 : i32
    %c0_i32_0 = arith.constant 0 : i32
    %c0_i32_1 = arith.constant 0 : i32
    return %c0_i32, %c0_i32_0 : i32, i32
  }
  func.func @transform_3(%arg0: i32) -> (i32, i32, i32) {
    %c0_i32 = arith.constant 0 : i32
    %c0_i32_0 = arith.constant 0 : i32
    %c0_i32_1 = arith.constant 0 : i32
    return %arg0, %c0_i32, %c0_i32_0 : i32, i32, i32
  }
}

</mosaic_0001>

<bundles_post_ra>
// kernel: gmflow_forward.16
= control target key start
LH: loop header
LB: loop body
LE: loop exit
PB: predicated region body
PF: predicated region fallthrough
CT: control target
= control target key end

     0   :  { %s827_s21 = smov 0   ;;  %s829_s22 = smov 0   ;;  %s927_s0 = inlined_call_operand.vmem [shape: f32[4,16,256], index: 0, kind: input, shape index: {}]   ;;  %s928_s1 = inlined_call_operand.vmem [shape: f32[1,256], index: 1, kind: input, shape index: {}]   ;;  %s929_s2 = inlined_call_operand.vmem [shape: f32[1,256], index: 2, kind: input, shape index: {}]   ;;  %s930_s3 = inlined_call_operand.vmem [shape: bf16[256,32], index: 3, kind: input, shape index: {}]   ;;  %s931_s4 = inlined_call_operand.vmem [shape: f32[1,32], index: 4, kind: input, shape index: {}]   ;;  %s932_s5 = inlined_call_operand.vmem [shape: f32[16,32], index: 5, kind: input, shape index: {}]   ;;  %s933_s6 = inlined_call_operand.vmem [shape: bf16[4,16,32], index: 6, kind: output, shape index: {}]  }
   0x1   :  { %s831_s23 = smov 0  }
   0x2 LB: > { %s28_s24 = sadd.s32 1, %s786_s22  ;;  %p676_p0 = scmp.ge.s32.totalorder %s790_s23, 1  ;;  %s790_s23 = sphi %s831_s23, %s16_s23   ;;  %s786_s22 = sphi %s829_s22, %s935_s22   ;;  %s782_s21 = sphi %s827_s21, %s934_s21  }
   0x3   : > { %p30_p1 = scmp.ge.s32.totalorder %s28_s24, 4  ;;  %p245_p2 = scmp.lt.s32.totalorder %s790_s23, 5 }
   0x5   : > { %s937_s24 = smov (%p30_p1, %s28_s24), 0  ;;  %p246_p3 = pnand %p676_p0, %p245_p2 }
   0x6   : > { %v752_v0 = vld [vmem:[%s930_s3 + $0x40] sm:$0xff] (!%p246_p3)   ;;  %v754_v2 = vld [vmem:[%s930_s3 + $0x48] sm:$0xff] (!%p246_p3)   ;;  %p290_p4 = scmp.lt.s32.totalorder (!%p246_p3), %s782_s21, 3  ;;  %v756_v4 = vld [vmem:[%s930_s3 + $0x50] sm:$0xff] (!%p246_p3)   ;;  %v343_v8 = vlaneseq (!%p246_p3)  ;;  %vm563_vm0 = vcmask (!%p246_p3), 257024  }
   0x7   : > { %249 = sbr.rel (%p246_p3) target bundleno = 263 (0x107), region = 44  ;;  %v753_v1 = vld [vmem:[%s930_s3] sm:$0xff] (!%p246_p3)   ;;  %706 = vmatprep.subr.bf16.mxu0 (!%p246_p3), %v752_v0  ;;  %v755_v3 = vld [vmem:[%s930_s3 + $0x8] sm:$0xff] (!%p246_p3)   ;;  %v757_v5 = vld [vmem:[%s930_s3 + $0x10] sm:$0xff] (!%p246_p3)  }
   0x8   : > { %707 = vmatpush3.bf16.msra.mxu0 (!%p246_p3), %v753_v1  ;;  %v758_v6 = vld [vmem:[%s930_s3 + $0x58] sm:$0xff] (!%p246_p3)   ;;  %v760_v9 = vld [vmem:[%s930_s3 + $0x60] sm:$0xff] (!%p246_p3)   ;;  %v344_v11 = vshrl.u32 (!%p246_p3), %v343_v8, 7  ;;  %v762_v12 = vld [vmem:[%s930_s3 + $0x68] sm:$0xff] (!%p246_p3)  }
   0x9   : > { %708 = vmatprep.subr.bf16.mxu0 (!%p246_p3), %v754_v2  ;;  %v759_v7 = vld [vmem:[%s930_s3 + $0x18] sm:$0xff] (!%p246_p3)   ;;  %v761_v10 = vld [vmem:[%s930_s3 + $0x20] sm:$0xff] (!%p246_p3)   ;;  %v763_v21 = vld [vmem:[%s930_s3 + $0x28] sm:$0xff] (!%p246_p3)  }
   0xa   : > { %v349_v24 = vsub.s32 (!%p246_p3), 1, %v344_v11  ;;  %v764_v25 = vld [vmem:[%s930_s3 + $0x70] sm:$0xff] (!%p246_p3)   ;;  %v341_v26 = vld [vmem:[%s928_s1] sm:$0x3] (!%p246_p3)  ;;  %v345_v27 = vsub.s32 (!%p246_p3), 0, %v344_v11  ;;  %v766_v39 = vld [vmem:[%s930_s3 + $0x78] sm:$0xff] (!%p246_p3)  }
   0xb   : > { %v357_v32 = vld [vmem:[%s929_s2] sm:$0x3] (!%p246_p3)  ;;  %v765_v35 = vld [vmem:[%s930_s3 + $0x30] sm:$0xff] (!%p246_p3)   ;;  %v767_v49 = vld [vmem:[%s930_s3 + $0x38] sm:$0xff] (!%p246_p3)  }
   0xc   : > { %709 = vmatpush3.bf16.msra.mxu0 (!%p246_p3), %v755_v3  ;;  %v350_v38 = vrot.slane (!%p246_p3), %v341_v26, %v349_v24  ;;  %v346_v40 = vrot.slane (!%p246_p3), %v341_v26, %v345_v27  ;;  %v366_v45 = vrot.slane (!%p246_p3), %v357_v32, %v349_v24  ;;  %v362_v46 = vrot.slane (!%p246_p3), %v357_v32, %v345_v27  ;;  %v681_v61 = vld [vmem:[%s931_s4] ss:$0 sm:$0xff] (!%p246_p3) }
   0xd   : > { %710 = vmatprep.subr.bf16.mxu0 (!%p246_p3), %v756_v4  ;;  %v551_v1 = vld [vmem:[%s932_s5] sm:$0xff] (!%p246_p3) }
   0xe   : > { %s939_s21 = smov (!%p290_p4, %s782_s21), 3 }
   0xf   : > { %s702_s15 = sshll.u32 %s939_s21, 5  ;;  %s703_s29 = sshll.u32 %s939_s21, 3 }
  0x10   : > { %711 = vmatpush3.bf16.msra.mxu0 %v757_v5  ;;  %s298_s26 = scalar_lea.vmem %s927_s0, %s702_s15  ;;  %v552_v5 = vld [vmem:[%s932_s5 + $0x8] sm:$0xff]  ;;  %s314_s10 = scalar_lea.vmem %s933_s6, %s703_s29 }
  0x11   : > { %712 = vmatprep.subr.bf16.mxu0 %v758_v6  ;;  %v318_v13 = vld [vmem:[%s298_s26 + $0x8] sm:$0xff]  ;;  %v320_v14 = vld [vmem:[%s298_s26 + $0x18] sm:$0xff]  ;;  %v317_v17 = vld [vmem:[%s298_s26] sm:$0xff] }
  0x12   : > { %v322_v15 = vmul.f32 255.0, %v318_v13  ;;  %v324_v16 = vmul.f32 255.0, %v320_v14  ;;  %v319_v18 = vld [vmem:[%s298_s26 + $0x10] sm:$0xff]  ;;  %v321_v19 = vmul.f32 255.0, %v317_v17 }
  0x13   : > { %v323_v20 = vmul.f32 255.0, %v319_v18 }
  0x14   : > { %713 = vmatpush3.bf16.msra.mxu0 %v759_v7  ;;  %v326_v22 = vmax.f32 %v322_v15, 0.0  ;;  %v328_v23 = vmax.f32 %v324_v16, 0.0  ;;  %v325_v28 = vmax.f32 %v321_v19, 0.0 }
  0x15   : > { %714 = vmatprep.subr.bf16.mxu0 %v760_v9  ;;  %v327_v29 = vmax.f32 %v323_v20, 0.0 }
  0x16   : > { %v330_v30 = vmin.f32 %v326_v22, 255.0  ;;  %v332_v31 = vmin.f32 %v328_v23, 255.0  ;;  %v329_v33 = vmin.f32 %v325_v28, 255.0 }
  0x17   : > { %v331_v34 = vmin.f32 %v327_v29, 255.0 }
  0x18   : > { %715 = vmatpush3.bf16.msra.mxu0 %v761_v10  ;;  %v334_v36 = vfloor.f32 %v330_v30  ;;  %v336_v37 = vfloor.f32 %v332_v31  ;;  %v333_v41 = vfloor.f32 %v329_v33 }
  0x19   : > { %716 = vmatprep.subr.bf16.mxu0 %v762_v12  ;;  %v335_v42 = vfloor.f32 %v331_v34 }
  0x1a   : > { %v338_v43 = vmul.f32 0.003921569, %v334_v36  ;;  %v340_v44 = vmul.f32 0.003921569, %v336_v37  ;;  %v337_v47 = vmul.f32 0.003921569, %v333_v41 }
  0x1b   : > { %v339_v48 = vmul.f32 0.003921569, %v335_v42 }
  0x1c   : > { %717 = vmatpush3.bf16.msra.mxu0 %v763_v21  ;;  %v354_v50 = vsub.f32 %v338_v43, %v350_v38  ;;  %v356_v51 = vsub.f32 %v340_v44, %v350_v38  ;;  %v353_v52 = vsub.f32 %v337_v47, %v346_v40 }
  0x1d   : > { %718 = vmatprep.subr.bf16.mxu0 %v764_v25  ;;  %v355_v53 = vsub.f32 %v339_v48, %v346_v40 }
  0x1e   : > { %v370_v54 = vmul.f32 %v366_v45, %v354_v50  ;;  %v372_v55 = vmul.f32 %v366_v45, %v356_v51  ;;  %v369_v56 = vmul.f32 %v362_v46, %v353_v52 }
  0x1f   : > { %v371_v57 = vmul.f32 %v362_v46, %v355_v53 }
  0x20   : > { %719 = vmatpush3.bf16.msra.mxu0 %v765_v35  ;;  %v374_v58 = vpack.c.bf16 %v372_v55, %v370_v54 }
  0x21   : > { %720 = vmatprep.subr.bf16.mxu0 %v766_v39  ;;  %v373_v59 = vpack.c.bf16 %v371_v57, %v369_v56 }
  0x22   : > { %542 = vmatprep.mubr.bf16.mxu0 %v374_v58 }
  0x24   : > { %721 = vmatpush3.bf16.msra.mxu0 %v767_v49 }
  0x27   : > { %543 = vmatmul.mubr.bf16.vlgmr.msra.gmra.mrb[0].mxu0 %v373_v59 }
  0xfa   : > { %v722_v60 = vpop.f32.mrb[0].mxu0 }
  0xfb   : > { %v723_v62 = vpop.f32.mrb[1].mxu0 }
  0xfc   : > { %v724_v63 = vadd.f32 %v723_v62, %v722_v60  ;;  %v725_v0 = vpop.f32.mrb[2].mxu0 }
  0xfd   : > { %v726_v2 = vpop.f32.mrb[3].mxu0 }
  0xfe   : > { %v545_v3 = vadd.f32 %v724_v63, %v681_v61  ;;  %v727_v4 = vadd.f32 %v726_v2, %v725_v0 }
 0x100   : > { %v553_v6 = vadd.f32 %v551_v1, %v545_v3  ;;  %v548_v7 = vadd.f32 %v727_v4, %v681_v61 }
 0x102   : > { %v704_v8 = vpack.c.bf16 %v553_v6, %v553_v6  ;;  %v554_v9 = vadd.f32 %v552_v5, %v548_v7 }
 0x104   : > { %564 = vst.msk [vmem:[%s314_s10] sm:$0xf] %vm563_vm0, %v704_v8  ;;  %v705_v10 = vpack.c.bf16 %v554_v9, %v554_v9 }
 0x106   : > { %565 = vst.msk [vmem:[%s314_s10 + $0x4] sm:$0xf] %vm563_vm0, %v705_v10 }
 0x107 PF: > { %s16_s23 = sadd.s32 1, %s790_s23   ;;  %s934_s21 = smov %s786_s22 }
 0x108   : > { %p13_p5 = scmp.ge.s32.totalorder %s16_s23, 6   ;;  %s935_s22 = smov %s937_s24 }
 0x10a   :  { %15 = sbr.rel (!%p13_p5) target bundleno = 2 (0x2), region = 77 }

// kernel: gmflow_forward.18
= control target key start
LH: loop header
LB: loop body
LE: loop exit
PB: predicated region body
PF: predicated region fallthrough
CT: control target
= control target key end

     0   :  { %s2028_s21 = smov 0   ;;  %s2030_s22 = smov 0   ;;  %s2259_s0 = inlined_call_operand.vmem [shape: bf16[4,16,32], index: 0, kind: input, shape index: {}, may-alias: {0,1}]   ;;  %s2260_s1 = inlined_call_operand.vmem [shape: bf16[4,16,32], index: 1, kind: input, shape index: {}, may-alias: {0,1}]   ;;  %s2261_s2 = inlined_call_operand.vmem [shape: bf16[32,32], index: 2, kind: input, shape index: {}]   ;;  %s2262_s3 = inlined_call_operand.vmem [shape: f32[1,32], index: 3, kind: input, shape index: {}]   ;;  %s2263_s4 = inlined_call_operand.vmem [shape: bf16[32,64], index: 4, kind: input, shape index: {}]   ;;  %s2264_s5 = inlined_call_operand.vmem [shape: f32[1,64], index: 5, kind: input, shape index: {}]   ;;  %s2265_s6 = inlined_call_operand.vmem [shape: bf16[32,32], index: 6, kind: input, shape index: {}]   ;;  %s2266_s7 = inlined_call_operand.vmem [shape: f32[1,32], index: 7, kind: input, shape index: {}]   ;;  %s2267_s8 = inlined_call_operand.vmem [shape: f32[1,32], index: 8, kind: input, shape index: {}]   ;;  %s2268_s9 = inlined_call_operand.vmem [shape: f32[1,32], index: 9, kind: input, shape index: {}]   ;;  %s2269_s10 = inlined_call_operand.vmem [shape: bf16[64,256], index: 10, kind: input, shape index: {}]   ;;  %s2270_s11 = inlined_call_operand.vmem [shape: f32[1,256], index: 11, kind: input, shape index: {}]   ;;  %s2271_s12 = inlined_call_operand.vmem [shape: bf16[256,32], index: 12, kind: input, shape index: {}]   ;;  %s2272_s13 = inlined_call_operand.vmem [shape: f32[1,32], index: 13, kind: input, shape index: {}]   ;;  %s2273_s14 = inlined_call_operand.vmem [shape: f32[1,32], index: 14, kind: input, shape index: {}]   ;;  %s2274_s15 = inlined_call_operand.vmem [shape: f32[1,32], index: 15, kind: input, shape index: {}]   ;;  %s2275_s16 = inlined_call_operand.vmem [shape: bf16[4,16,32], index: 16, kind: output, shape index: {}]  }
   0x1   :  { %2276 = sst [smem:[#allocation6_spill]] %s2259_s0  ;;  %s2032_s23 = smov 0  }
   0x2   :  { %2277 = sst [smem:[#allocation7_spill]] %s2261_s2 }
   0x3 LB: > { %s45_s24 = sadd.s32 1, %s1931_s22  ;;  %p1672_p0 = scmp.ge.s32.totalorder %s1935_s23, 1  ;;  %s1935_s23 = sphi %s2032_s23, %s26_s23   ;;  %s1931_s22 = sphi %s2030_s22, %s2281_s22   ;;  %s1927_s21 = sphi %s2028_s21, %s2280_s21  }
   0x4   : > { %p47_p1 = scmp.ge.s32.totalorder %s45_s24, 4  ;;  %p559_p2 = scmp.lt.s32.totalorder %s1935_s23, 5 }
   0x6   : > { %s2283_s24 = smov (%p47_p1, %s45_s24), 0  ;;  %p560_p3 = pnand %p1672_p0, %p559_p2 }
   0x7   : > { %s2278_s2 = sld [smem:[#allocation7_spill]] (!%p560_p3)  ;;  %v1937_v1 = vmov (!%p560_p3), 0.0   ;;  %vm1938_vm0 = vmmov (!%p560_p3), 0   ;;  %p640_p4 = scmp.lt.s32.totalorder (!%p560_p3), %s1927_s21, 3  ;;  %vm730_vm1 = vcmask (!%p560_p3), 261120   ;;  %v1852_v3 = vld [vmem:[%s2263_s4] sm:$0xff] (!%p560_p3)  }
   0x8   : > { %563 = sbr.rel (%p560_p3) target bundleno = 2494 (0x9be), region = 84  ;;  %1776 = vmatprep.subr.bf16.mxu1 (!%p560_p3), %v1937_v1  ;;  %1792 = vmatprep.subr.bf16.mxu0 (!%p560_p3), %v1937_v1  ;;  %784 = vst.msk [vmem:[#allocation5] sm:$0xff] (!%p560_p3), %vm730_vm1, %v1937_v1  ;;  %785 = vst.msk [vmem:[#allocation5 + $0x8] sm:$0xff] (!%p560_p3), %vm730_vm1, %v1937_v1  ;;  %s649_s29 = sadd.s32 (!%p560_p3), 2, %s1927_s21  ;;  %v1853_v5 = vld [vmem:[%s2263_s4 + $0x8] sm:$0xff] (!%p560_p3)   ;;  %vm779_vm2 = vcmask (!%p560_p3), 7168  }
   0x9   : > { %1780 = vmatprep.mubr.msk.bf16.mxu1 (!%p560_p3), %vm1938_vm0, %v1937_v1  ;;  %1794 = vmatprep.mubr.msk.bf16.mxu0 (!%p560_p3), %vm1938_vm0, %v1937_v1  ;;  %p650_p5 = scmp.lt.s32.totalorder (!%p560_p3), %s649_s29, 0  ;;  %s651_s17 = ssub.s32 (!%p560_p3), 0, %s649_s29  ;;  %v1682_v7 = vld [vmem:[%s2262_s3] ss:$0 sm:$0xff] (!%p560_p3)  ;;  %v1939_v27 = vmov (!%p560_p3), -inf   ;;  %782 = vst.msk [vmem:[#allocation4] sm:$0xff] (!%p560_p3), %vm779_vm2, %v1937_v1 }
   0xa   : > { %s1675_s19 = smin.u32 (!%p560_p3), %s651_s17, %s649_s29  ;;  %s2279_s26 = sld [smem:[#allocation6_spill]] (!%p560_p3)  ;;  %v1687_v17 = vld [vmem:[%s2264_s5] ss:$0 sm:$0xff] (!%p560_p3)  ;;  %780 = vst.msk [vmem:[#allocation3] sm:$0xff] (!%p560_p3), %vm779_vm2, %v1939_v27  ;;  %781 = vst.msk [vmem:[#allocation3 + $0x8] sm:$0xff] (!%p560_p3), %vm779_vm2, %v1939_v27  ;;  %vm912_vm3 = vcmask (!%p560_p3), 130048  }
   0xb   : > { %s653_s28 = sand.u32 (!%p560_p3), 3, %s1675_s19   ;;  %783 = vst.msk [vmem:[#allocation4 + $0x8] sm:$0xff] (!%p560_p3), %vm779_vm2, %v1937_v1  ;;  %v1940_v34 = vmov (!%p560_p3), 0   ;;  %s1941_s0 = smov (!%p560_p3), 96   ;;  %vm1236_vm4 = vcmask (!%p560_p3), 523264   ;;  %vm1551_vm5 = vcmask (!%p560_p3), 257024  }
   0xc   : > { %1842 = vset.pattern.permute.xlu1 (!%p560_p3), %v1940_v34  ;;  %1843 = vset.pattern.permute.xlu0 (!%p560_p3), %v1940_v34 }
   0xd   : > { %v1849_v0 = vld [vmem:[%s2278_s2] sm:$0xff] (!%p560_p3)   ;;  %v1850_v2 = vld [vmem:[%s2278_s2 + $0x8] sm:$0xff] (!%p560_p3)   ;;  %s654_s2 = ssub.s32 (!%p560_p3), 0, %s653_s28 }
   0xe   : > { %1777 = vmatpush3.bf16.msra.mxu1 (!%p560_p3), %v1849_v0 }
   0xf   : > { %1778 = vmatprep.subr.bf16.mxu1 %v1937_v1  ;;  %s2285_s21 = smov (!%p640_p4, %s1927_s21), 3  ;;  %s2287_s2 = smov (!%p650_p5, %s654_s2), %s653_s28 }
  0x10   : > { %s1732_s18 = sshll.u32 %s2285_s21, 3  ;;  %p1677_p6 = scmp.lt.s32.totalorder %s2287_s2, 0  ;;  %v943_v59 = vld [vmem:[#allocation4] sm:$0xff] }
  0x11   : > { %s2074_s27 = scalar_lea.vmem %s2279_s26, %s1732_s18  ;;  %s660_s29 = sadd.s32 4, %s2287_s2  ;;  %v910_v35 = vld [vmem:[#allocation3] sm:$0xff]  ;;  %v911_v38 = vld [vmem:[#allocation3 + $0x8] sm:$0xff] }
  0x12   : > { %1779 = vmatpush3.bf16.msra.mxu1 %v1850_v2  ;;  %v1851_v4 = vld [vmem:[%s2074_s27] sm:$0xff]   ;;  %s2289_s29 = smov (!%p1677_p6, %s660_s29), %s2287_s2  ;;  %s1942_s28 = smov 32  }
  0x13   : > { %1784 = vmatprep.subr.bf16.mxu1 %v1937_v1  ;;  %p663_p7 = scmp.lt.s32.totalorder %s2289_s29, 3  ;;  %v944_v62 = vld [vmem:[#allocation4 + $0x8] sm:$0xff]  ;;  %s693_s26 = scalar_lea.vmem %s2275_s16, %s1732_s18 }
  0x15   : > { %1781 = vmatmul.mubr.msk.bf16.vlgmr.msra.gmra.mrb[0].mxu1 %vm730_vm1, %v1851_v4  ;;  %s2291_s29 = smov (!%p663_p7, %s2289_s29), 3 }
  0x16   : > { %1785 = vmatpush3.bf16.msra.mxu1 %v1852_v3  ;;  %1788 = vmatprep.mubr.msk.bf16.mxu1 %vm1938_vm0, %v1937_v1  ;;  %s1733_s17 = sshll.u32 %s2291_s29, 3 }
  0x17   : > { %1786 = vmatprep.subr.bf16.mxu1 %v1937_v1  ;;  %s670_s25 = scalar_lea.vmem %s2260_s1, %s1733_s17 }
  0x18   : > { %v1854_v6 = vld [vmem:[%s670_s25] sm:$0xff]  }
  0x1a   : > { %1787 = vmatpush3.bf16.msra.mxu1 %v1853_v5 }
  0x1b   : > { %1798 = vmatprep.subr.bf16.mxu1 %v1937_v1 }
  0x1d   : > { %1789 = vmatmul.mubr.msk.bf16.vlgmr.msra.gmra.mrb[4].mxu1 %vm730_vm1, %v1854_v6 }
  0x1e   : > { %1800 = vmatprep.mubr.msk.bf16.mxu1 %vm1938_vm0, %v1937_v1 }
  0xe8   : > { %v768_v8 = vpop.f32.mrb[0].mxu1 }
  0xe9   : > { %v769_v9 = vadd.f32 %v1682_v7, %v768_v8  ;;  %v1782_v10 = vpop.f32.mrb[1].mxu1 }
  0xea   : > { %v771_v11 = vpop.f32.mrb[2].mxu1  ;;  %v958_v10 = vld [vmem:[#allocation5] sm:$0xff] }
  0xeb   : > { %v775_v12 = vmul.f32 0.17677669, %v769_v9  ;;  %v772_v13 = vadd.f32 %v1682_v7, %v771_v11  ;;  %v1783_v14 = vpop.f32.mrb[3].mxu1  ;;  %v1855_v7 = vld [vmem:[%s2265_s6] sm:$0xff]   ;;  %v1856_v9 = vld [vmem:[%s2265_s6 + $0x8] sm:$0xff]  }
  0xed   : > { %v776_v15 = vmul.f32 0.17677669, %v772_v13 }
  0xef   : > { %v777_v16 = vpack.c.bf16 %v776_v15, %v775_v12  ;;  %v959_v12 = vld [vmem:[#allocation5 + $0x8] sm:$0xff] }
  0xf0   : > { %v854_v18 = vpop.f32.mrb[4].mxu1 }
  0xf1   : > { %778 = vst.msk [vmem:[#allocation2] sm:$0xff] %vm730_vm1, %v777_v16  ;;  %v1790_v19 = vpop.f32.mrb[5].mxu1  ;;  %v855_v21 = vadd.f32 %v1687_v17, %v854_v18 }
  0xf2   : > { %v857_v20 = vpop.f32.mrb[6].mxu1 }
  0xf3   : > { %v858_v22 = vadd.f32 %v1687_v17, %v857_v20  ;;  %v1791_v23 = vpop.f32.mrb[7].mxu1 }
  0xf5   : > { %v861_v24 = vpack.c.bf16 %v858_v22, %v855_v21 }
  0xf7   : > { %v867_v25 = vsel %vm730_vm1, %v861_v24, 0 }
  0xf8   : > { %1793 = vmatpush3.bf16.xpose.msra.mxu0 %v867_v25  ;;  %v862_v26 = vld [vmem:[#allocation2] sm:$0xff] }
  0xf9   : > { %1804 = vmatprep.subr.bf16.mxu0 %v1937_v1 }
  0xff   : > { %1795 = vmatmul.mubr.msk.bf16.vlgmr.msra.gmra.mrb[0].mxu0 %vm730_vm1, %v862_v26 }
 0x100   : > { %1808 = vmatprep.mubr.msk.bf16.mxu0 %vm1938_vm0, %v1937_v1  ;;  %1805 = vmatpush3.bf16.msra.mxu0 %v1855_v7 }
 0x101   : > { %1806 = vmatprep.subr.bf16.mxu0 %v1937_v1 }
 0x104   : > { %1807 = vmatpush3.bf16.msra.mxu0 %v1856_v9  ;;  %v2167_v9 = vld [vmem:[%s2074_s27] sm:$0xff]  }
 0x1d2   : > { %v903_v28 = vpop.f32.mrb[0].mxu0 }
 0x1d3   : > { %v1796_v29 = vpop.f32.mrb[1].mxu0  ;;  %v913_v30 = vsel %vm912_vm3, %v903_v28, -inf }
 0x1d4   : > { %914 = vmax.xlane.f32.xlu0 %v913_v30  ;;  %v906_v31 = vpop.f32.mrb[2].mxu0 }
 0x1d5   : > { %v1797_v32 = vpop.f32.mrb[3].mxu0  ;;  %v916_v33 = vsel %vm912_vm3, %v906_v31, -inf }
 0x1d8   : > { %917 = vmax.xlane.f32.xlu0 %v916_v33 }
 0x1ee   : > { %974 = vrot.lane.b32.xlu0 %v861_v24, %s1941_s0 }
 0x261   : > { %v915_v36 = vpop.xlane.xlu0 %914 }
 0x262   : > { %v919_v37 = vmax.f32 %v910_v35, %v915_v36 }
 0x264   : > { %v921_v39 = vsub.f32 %v910_v35, %v919_v37  ;;  %1025 = vst.msk [vmem:[#allocation3] sm:$0xff] %vm779_vm2, %v919_v37  ;;  %929 = vperm.xlu1 %1842, %v919_v37  }
 0x265   : > { %v918_v40 = vpop.xlane.xlu0 %917 }
 0x266   : > { %v920_v41 = vmax.f32 %v911_v38, %v918_v40  ;;  %v923_v53 = vmul.f32 1.442695, %v921_v39 }
 0x268   : > { %v922_v42 = vsub.f32 %v911_v38, %v920_v41  ;;  %1026 = vst.msk [vmem:[#allocation3 + $0x8] sm:$0xff] %vm779_vm2, %v920_v41  ;;  %934 = vperm.xlu1 %1842, %v920_v41  }
 0x269   : > { %v975_v43 = vpop.permute.xlu0 %974 }
 0x26a   : > { %1799 = vmatpush3.bf16.msra.mxu1 %v975_v43  ;;  %v925_v56 = vmul.f32 1.442695, %v922_v42 }
 0x2e3   : > { %v930_v44 = vpop.permute.xlu1 %929 }
 0x2e4   : > { %v937_v45 = vsub.f32 %v903_v28, %v930_v44  ;;  %v1694_v28 = vld [vmem:[%s2266_s7] ss:$0 sm:$0xff] }
 0x2e6   : > { %v939_v46 = vmul.f32 1.442695, %v937_v45 }
 0x2e7   : > { %v935_v47 = vpop.permute.xlu1 %934 }
 0x2e8   : > { %1885 = vpow2.f32 %v939_v46  ;;  %v938_v48 = vsub.f32 %v906_v31, %v935_v47  ;;  %v1857_v47 = vld [vmem:[%s2269_s10] ss:$8 sps:$4 sm:$0xff]  }
 0x2ea   : > { %v941_v49 = vmul.f32 1.442695, %v938_v48  ;;  %v1859_v48 = vld [vmem:[%s2269_s10 + $0x4] ss:$8 sps:$4 sm:$0xff]  }
 0x2eb   : > { %1240 = vmatprep.subr.bf16.mxu1 %v1859_v48 }
 0x2ec   : > { %1887 = vpow2.f32 %v941_v49  ;;  %v1862_v49 = vld [vmem:[%s2269_s10 + $0x14] ss:$8 sps:$4 sm:$0xff]  }
 0x2ed   : > { %1889 = vpow2.f32 %v923_v53 }
 0x2ee   : > { %1891 = vpow2.f32 %v925_v56 }
 0x2f2   : > { %v1886_v50 = vpop.eup %1885 }
 0x2f3   : > { %v947_v51 = vsel %vm912_vm3, %v1886_v50, 0.0 }
 0x2f4   : > { %948 = vadd.xlane.f32.xlu1 %v947_v51  ;;  %v1865_v51 = vld [vmem:[%s2269_s10 + $0x24] ss:$8 sps:$4 sm:$0xff]  }
 0x2f6   : > { %v1888_v52 = vpop.eup %1887 }
 0x2f7   : > { %v950_v54 = vsel %vm912_vm3, %v1888_v52, 0.0  ;;  %v972_v55 = vpack.c.bf16 %v1888_v52, %v1886_v50  ;;  %v1890_v57 = vpop.eup %1889  ;;  %v1860_v50 = vld [vmem:[%s2269_s10 + $0x10] ss:$8 sps:$4 sm:$0xff]   ;;  %v1863_v52 = vld [vmem:[%s2269_s10 + $0x20] ss:$8 sps:$4 sm:$0xff]  }
 0x2f8   : > { %951 = vadd.xlane.f32.xlu0 %v950_v54  ;;  %v1892_v58 = vpop.eup %1891  ;;  %v945_v60 = vmul.f32 %v1890_v57, %v943_v59  ;;  %v1868_v59 = vld [vmem:[%s2269_s10 + $0x34] ss:$8 sps:$4 sm:$0xff]  }
 0x2f9   : > { %1801 = vmatmul.mubr.msk.bf16.vlgmr.msra.gmra.mrb[8].mxu1 %vm912_vm3, %v972_v55  ;;  %v946_v0 = vmul.f32 %v1892_v58, %v944_v62 }
 0x2fa   : > { %1272 = vmatprep.mubr.bf16.mxu1 %v1940_v34  ;;  %1241 = vmatpush1.bf16.msra.mxu1 %v1857_v47 }
 0x2fb   : > { %1242 = vmatprep.subr.bf16.mxu1 %v1862_v49 }
 0x2fe   : > { %1243 = vmatpush1.bf16.msra.mxu1 %v1860_v50 }
 0x2ff   : > { %1244 = vmatprep.subr.bf16.mxu1 %v1865_v51 }
 0x302   : > { %1245 = vmatpush1.bf16.msra.mxu1 %v1863_v52 }
 0x303   : > { %1246 = vmatprep.subr.bf16.mxu1 %v1868_v59 }
 0x305   : > { %962 = vperm.xlu1 %1842, %v1890_v57  }
 0x30e   : > { %967 = vperm.xlu0 %1843, %v1892_v58  }
 0x381   : > { %v949_v61 = vpop.xlane.xlu1 %948 }
 0x382   : > { %v953_v63 = vadd.f32 %v949_v61, %v945_v60  ;;  %v1866_v61 = vld [vmem:[%s2269_s10 + $0x30] ss:$8 sps:$4 sm:$0xff]  }
 0x383   : > { %1247 = vmatpush1.bf16.msra.mxu1 %v1866_v61 }
 0x384   : > { %956 = vst.msk [vmem:[#allocation4] sm:$0xff] %vm779_vm2, %v953_v63  ;;  %v1698_v63 = vld [vmem:[%s2267_s8] ss:$0 sm:$0xff] }
 0x385   : > { %v952_v2 = vpop.xlane.xlu0 %951  ;;  %v963_v11 = vpop.permute.xlu1 %962 }
 0x386   : > { %v954_v3 = vadd.f32 %v952_v2, %v946_v0  ;;  %v970_v14 = vmul.f32 %v963_v11, %v958_v10  ;;  %v1739_v10 = vunpack.c.l.bf16 %v2167_v9  ;;  %v1740_v11 = vunpack.c.h.bf16 %v2167_v9 }
 0x388   : > { %957 = vst.msk [vmem:[#allocation4 + $0x8] sm:$0xff] %vm779_vm2, %v954_v3 }
 0x38b   : > { %v1036_v4 = vld [vmem:[#allocation4] sm:$0xff] }
 0x38c   : > { %1893 = vrcp.f32 %v1036_v4  ;;  %v1699_v4 = vld [vmem:[%s2268_s9] ss:$0 sm:$0xff] }
 0x38d   : > { %v968_v13 = vpop.permute.xlu0 %967 }
 0x38e   : > { %v971_v16 = vmul.f32 %v968_v13, %v959_v12 }
 0x38f   : > { %v1037_v5 = vld [vmem:[#allocation4 + $0x8] sm:$0xff] }
 0x390   : > { %1895 = vrcp.f32 %v1037_v5 }
 0x396   : > { %v1894_v6 = vpop.eup %1893 }
 0x397   : > { %1042 = vperm.xlu1 %1842, %v1894_v6  }
 0x39a   : > { %v1896_v8 = vpop.eup %1895 }
 0x39b   : > { %1047 = vperm.xlu1 %1842, %v1896_v8  }
 0x3cc   : > { %v1014_v15 = vpop.f32.mrb[8].mxu1 }
 0x3cd   : > { %v1021_v17 = vadd.f32 %v1014_v15, %v970_v14  ;;  %v1802_v18 = vpop.f32.mrb[9].mxu1 }
 0x3ce   : > { %v1017_v19 = vpop.f32.mrb[10].mxu1  ;;  %v1869_v18 = vld [vmem:[%s2271_s12 + $0x40] sm:$0xff]  }
 0x3cf   : > { %1023 = vst.msk [vmem:[#allocation5] sm:$0xff] %vm730_vm1, %v1021_v17  ;;  %v1022_v1 = vadd.f32 %v1017_v19, %v971_v16  ;;  %v1803_v20 = vpop.f32.mrb[11].mxu1  ;;  %v1870_v19 = vld [vmem:[%s2271_s12] sm:$0xff]   ;;  %1754 = vmatprep.subr.bf16.mxu0 %v1869_v18 }
 0x3d0   : > { %v1872_v20 = vld [vmem:[%s2271_s12 + $0x8] sm:$0xff]  }
 0x3d1   : > { %1024 = vst.msk [vmem:[#allocation5 + $0x8] sm:$0xff] %vm730_vm1, %v1022_v1  ;;  %v1871_v1 = vld [vmem:[%s2271_s12 + $0x48] sm:$0xff]  }
 0x3d6   : > { %v1034_v22 = vld [vmem:[#allocation5] sm:$0xff] }
 0x3d8   : > { %v1035_v24 = vld [vmem:[#allocation5 + $0x8] sm:$0xff] }
 0x416   : > { %v1043_v21 = vpop.permute.xlu1 %1042 }
 0x417   : > { %v1050_v25 = vmul.f32 %v1043_v21, %v1034_v22  ;;  %v1873_v21 = vld [vmem:[%s2271_s12 + $0x50] sm:$0xff]  }
 0x418   : > { %v1874_v22 = vld [vmem:[%s2271_s12 + $0x10] sm:$0xff]  }
 0x41a   : > { %v1048_v23 = vpop.permute.xlu1 %1047 }
 0x41b   : > { %v1051_v26 = vmul.f32 %v1048_v23, %v1035_v24  ;;  %v1875_v23 = vld [vmem:[%s2271_s12 + $0x58] sm:$0xff]  }
 0x41c   : > { %v1876_v24 = vld [vmem:[%s2271_s12 + $0x18] sm:$0xff]  }
 0x41d   : > { %v1052_v27 = vpack.c.bf16 %v1051_v26, %v1050_v25  ;;  %v1877_v25 = vld [vmem:[%s2271_s12 + $0x60] sm:$0xff]  }
 0x41e   : > { %v1878_v26 = vld [vmem:[%s2271_s12 + $0x20] sm:$0xff]  }
 0x41f   : > { %1809 = vmatmul.mubr.msk.bf16.vlgmr.msra.gmra.mrb[4].mxu0 %vm730_vm1, %v1052_v27  ;;  %v1879_v27 = vld [vmem:[%s2271_s12 + $0x68] sm:$0xff]  }
 0x420   : > { %1755 = vmatpush3.bf16.msra.mxu0 %v1870_v19 }
 0x421   : > { %1756 = vmatprep.subr.bf16.mxu0 %v1871_v1 }
 0x424   : > { %1757 = vmatpush3.bf16.msra.mxu0 %v1872_v20 }
 0x425   : > { %1758 = vmatprep.subr.bf16.mxu0 %v1873_v21 }
 0x428   : > { %1759 = vmatpush3.bf16.msra.mxu0 %v1874_v22 }
 0x429   : > { %1760 = vmatprep.subr.bf16.mxu0 %v1875_v23 }
 0x42c   : > { %1761 = vmatpush3.bf16.msra.mxu0 %v1876_v24 }
 0x42d   : > { %1762 = vmatprep.subr.bf16.mxu0 %v1877_v25 }
 0x430   : > { %1763 = vmatpush3.bf16.msra.mxu0 %v1878_v26 }
 0x431   : > { %1764 = vmatprep.subr.bf16.mxu0 %v1879_v27  ;;  %v1709_v27 = vld [vmem:[%s2272_s13] ss:$0 sm:$0xff] }
 0x4f2   : > { %v1113_v29 = vpop.f32.mrb[4].mxu0 }
 0x4f3   : > { %v1114_v30 = vadd.f32 %v1694_v28, %v1113_v29  ;;  %v1810_v31 = vpop.f32.mrb[5].mxu0  ;;  %v1881_v29 = vld [vmem:[%s2271_s12 + $0x70] sm:$0xff]  }
 0x4f4   : > { %v1116_v32 = vpop.f32.mrb[6].mxu0  ;;  %v1883_v31 = vld [vmem:[%s2271_s12 + $0x78] sm:$0xff]  }
 0x4f5   : > { %v1117_v33 = vadd.f32 %v1694_v28, %v1116_v32  ;;  %v1811_v34 = vpop.f32.mrb[7].mxu0  ;;  %v1122_v35 = vsel %vm730_vm1, %v1114_v30, 0.0  ;;  %v1880_v28 = vld [vmem:[%s2271_s12 + $0x28] sm:$0xff]   ;;  %v1884_v32 = vld [vmem:[%s2271_s12 + $0x38] sm:$0xff]  }
 0x4f6   : > { %1123 = vadd.xlane.f32.xlu1 %v1122_v35  ;;  %1765 = vmatpush3.bf16.msra.mxu0 %v1880_v28 }
 0x4f7   : > { %v1125_v36 = vsel %vm730_vm1, %v1117_v33, 0.0  ;;  %1766 = vmatprep.subr.bf16.mxu0 %v1881_v29 }
 0x4f8   : > { %1126 = vadd.xlane.f32.xlu0 %v1125_v36  ;;  %v1184_v36 = vld [vmem:[%s2270_s11] sm:$0x3] }
 0x583   : > { %v1124_v37 = vpop.xlane.xlu1 %1123 }
 0x584   : > { %v1129_v38 = vmul.f32 0.03125, %v1124_v37 }
 0x585   : > { %v1127_v39 = vpop.xlane.xlu0 %1126 }
 0x586   : > { %v1131_v40 = vsub.f32 %v1114_v30, %v1129_v38  ;;  %v1130_v41 = vmul.f32 0.03125, %v1127_v39  ;;  %v1882_v30 = vld [vmem:[%s2271_s12 + $0x30] sm:$0xff]  }
 0x587   : > { %1767 = vmatpush3.bf16.msra.mxu0 %v1882_v30 }
 0x588   : > { %v1132_v42 = vsub.f32 %v1117_v33, %v1130_v41  ;;  %v1133_v43 = vmul.f32 %v1131_v40, %v1131_v40  ;;  %1768 = vmatprep.subr.bf16.mxu0 %v1883_v31  ;;  %v1186_v33 = vlaneseq }
 0x58a   : > { %v1135_v44 = vsel %vm730_vm1, %v1133_v43, 0.0  ;;  %v1134_v45 = vmul.f32 %v1132_v42, %v1132_v42  ;;  %v1187_v34 = vshrl.u32 %v1186_v33, 7 }
 0x58b   : > { %1136 = vadd.xlane.f32.xlu1 %v1135_v44  ;;  %1769 = vmatpush3.bf16.msra.mxu0 %v1884_v32 }
 0x58c   : > { %v1138_v46 = vsel %vm730_vm1, %v1134_v45, 0.0  ;;  %v1188_v35 = vsub.s32 0, %v1187_v34  ;;  %v1192_v37 = vsub.s32 1, %v1187_v34 }
 0x58e   : > { %v1189_v38 = vrot.slane %v1184_v36, %v1188_v35  ;;  %v1193_v39 = vrot.slane %v1184_v36, %v1192_v37 }
 0x58f   : > { %1139 = vadd.xlane.f32.xlu1 %v1138_v46 }
 0x618   : > { %v1137_v53 = vpop.xlane.xlu1 %1136 }
 0x619   : > { %v1141_v54 = vmul.f32 0.03125, %v1137_v53 }
 0x61b   : > { %v1143_v55 = vadd.f32 1e-05, %v1141_v54 }
 0x61c   : > { %v1140_v56 = vpop.xlane.xlu1 %1139 }
 0x61d   : > { %1897 = vrsqrt.f32 %v1143_v55  ;;  %v1142_v57 = vmul.f32 0.03125, %v1140_v56 }
 0x61f   : > { %v1144_v58 = vadd.f32 1e-05, %v1142_v57 }
 0x621   : > { %1899 = vrsqrt.f32 %v1144_v58 }
 0x627   : > { %v1898_v60 = vpop.eup %1897 }
 0x628   : > { %v1147_v62 = vmul.f32 %v1898_v60, %v1131_v40 }
 0x62a   : > { %v1155_v3 = vmul.f32 %v1698_v63, %v1147_v62 }
 0x62b   : > { %v1900_v0 = vpop.eup %1899 }
 0x62c   : > { %v1148_v2 = vmul.f32 %v1900_v0, %v1132_v42  ;;  %v1163_v6 = vadd.f32 %v1699_v4, %v1155_v3 }
 0x62e   : > { %v1156_v5 = vmul.f32 %v1698_v63, %v1148_v2 }
 0x630   : > { %v1164_v7 = vadd.f32 %v1699_v4, %v1156_v5 }
 0x632   : > { %v1844_v8 = vpack.i.bf16 %v1164_v7, %v1163_v6 }
 0x634   : > { %1845 = vrot.lane.b32.xlu1 %v1844_v8, %s1942_s28 }
 0x6a6   : > { %v1846_v12 = vpop.permute.xlu1 %1845 }
 0x6a7   : > { %v1848_v13 = vunpack.i.h.bf16 %v1846_v12  ;;  %v1847_v14 = vunpack.i.l.bf16 %v1846_v12 }
 0x6a9   : > { %v1174_v15 = vsel %vm730_vm1, %v1740_v11, %v1848_v13  ;;  %v1173_v16 = vsel %vm730_vm1, %v1739_v10, %v1847_v14 }
 0x6aa   : > { %v1175_v17 = vpack.c.bf16 %v1174_v15, %v1173_v16 }
 0x6ac   : > { %1708 = vmatmul.mubr.msk.bf16.vlgmr.msra.gmra.mrb[12].mxu1 %vm1236_vm4, %v1175_v17 }
 0x77f   : > { %v1274_v40 = vpop.f32.mrb[12].mxu1 }
 0x780   : > { %v1275_v41 = vadd.f32 %v1274_v40, %v1189_v38  ;;  %v1276_v42 = vpop.f32.mrb[13].mxu1 }
 0x781   : > { %v1277_v43 = vadd.f32 %v1276_v42, %v1193_v39  ;;  %v1278_v44 = vpop.f32.mrb[14].mxu1 }
 0x782   : > { %v1283_v45 = vmul.f32 %v1275_v41, %v1275_v41  ;;  %v1279_v46 = vadd.f32 %v1278_v44, %v1189_v38  ;;  %v1280_v47 = vpop.f32.mrb[15].mxu1 }
 0x783   : > { %v1284_v48 = vmul.f32 %v1277_v43, %v1277_v43  ;;  %v1281_v49 = vadd.f32 %v1280_v47, %v1193_v39 }
 0x784   : > { %v1287_v50 = vmul.f32 %v1283_v45, %v1275_v41  ;;  %v1285_v51 = vmul.f32 %v1279_v46, %v1279_v46 }
 0x785   : > { %v1288_v52 = vmul.f32 %v1284_v48, %v1277_v43  ;;  %v1286_v53 = vmul.f32 %v1281_v49, %v1281_v49 }
 0x786   : > { %v1291_v54 = vmul.f32 0.044715, %v1287_v50  ;;  %v1289_v55 = vmul.f32 %v1285_v51, %v1279_v46 }
 0x787   : > { %v1292_v56 = vmul.f32 0.044715, %v1288_v52  ;;  %v1290_v57 = vmul.f32 %v1286_v53, %v1281_v49  ;;  %v1726_v53 = vld [vmem:[%s2273_s14] ss:$0 sm:$0xff] }
 0x788   : > { %v1295_v58 = vadd.f32 %v1291_v54, %v1275_v41  ;;  %v1293_v59 = vmul.f32 0.044715, %v1289_v55  ;;  %v1727_v55 = vld [vmem:[%s2274_s15] ss:$0 sm:$0xff] }
 0x789   : > { %v1296_v60 = vadd.f32 %v1292_v56, %v1277_v43  ;;  %v1294_v61 = vmul.f32 0.044715, %v1290_v57 }
 0x78a   : > { %v1299_v62 = vmul.f32 0.7978846, %v1295_v58  ;;  %v1297_v63 = vadd.f32 %v1293_v59, %v1279_v46 }
 0x78b   : > { %v1300_v0 = vmul.f32 0.7978846, %v1296_v60  ;;  %v1298_v2 = vadd.f32 %v1294_v61, %v1281_v49 }
 0x78c   : > { %1901 = vtanh.f32 %v1299_v62  ;;  %v1301_v3 = vmul.f32 0.7978846, %v1297_v63 }
 0x78d   : > { %1903 = vtanh.f32 %v1300_v0  ;;  %v1302_v4 = vmul.f32 0.7978846, %v1298_v2 }
 0x78e   : > { %1905 = vtanh.f32 %v1301_v3 }
 0x78f   : > { %1907 = vtanh.f32 %v1302_v4 }
 0x796   : > { %v1902_v5 = vpop.eup %1901 }
 0x797   : > { %v1904_v6 = vpop.eup %1903  ;;  %v1307_v7 = vadd.f32 1.0, %v1902_v5 }
 0x798   : > { %v1906_v8 = vpop.eup %1905  ;;  %v1308_v12 = vadd.f32 1.0, %v1904_v6 }
 0x799   : > { %v1908_v13 = vpop.eup %1907  ;;  %v1311_v14 = vmul.f32 0.5, %v1307_v7  ;;  %v1309_v15 = vadd.f32 1.0, %v1906_v8 }
 0x79a   : > { %v1310_v16 = vadd.f32 1.0, %v1908_v13  ;;  %v1312_v17 = vmul.f32 0.5, %v1308_v12 }
 0x79b   : > { %v1313_v18 = vmul.f32 0.5, %v1309_v15  ;;  %v1315_v1 = vmul.f32 %v1311_v14, %v1275_v41 }
 0x79c   : > { %v1314_v19 = vmul.f32 0.5, %v1310_v16  ;;  %v1316_v21 = vmul.f32 %v1312_v17, %v1277_v43 }
 0x79d   : > { %v1317_v20 = vmul.f32 %v1313_v18, %v1279_v46 }
 0x79e   : > { %v1318_v22 = vmul.f32 %v1314_v19, %v1281_v49 }
 0x79f   : > { %v1319_v23 = vpack.c.bf16 %v1317_v20, %v1315_v1 }
 0x7a0   : > { %v1320_v24 = vpack.c.bf16 %v1318_v22, %v1316_v21 }
 0x7a2   : > { %1488 = vmatprep.mubr.bf16.mxu0 %v1320_v24 }
 0x7a3   : > { %1489 = vmatmul.mubr.bf16.vlgmr.msra.gmra.mrb[8].mxu0 %v1319_v23 }
 0x876   : > { %v1770_v25 = vpop.f32.mrb[8].mxu0 }
 0x877   : > { %v1771_v26 = vpop.f32.mrb[9].mxu0 }
 0x878   : > { %v1772_v28 = vadd.f32 %v1771_v26, %v1770_v25  ;;  %v1773_v29 = vpop.f32.mrb[10].mxu0 }
 0x879   : > { %v1774_v30 = vpop.f32.mrb[11].mxu0 }
 0x87a   : > { %v1775_v31 = vadd.f32 %v1774_v30, %v1773_v29  ;;  %v1491_v32 = vadd.f32 %v1772_v28, %v1709_v27 }
 0x87c   : > { %v1499_v33 = vsel %vm730_vm1, %v1491_v32, 0.0  ;;  %v1494_v34 = vadd.f32 %v1775_v31, %v1709_v27 }
 0x87d   : > { %1500 = vadd.xlane.f32.xlu1 %v1499_v33 }
 0x87e   : > { %v1502_v35 = vsel %vm730_vm1, %v1494_v34, 0.0 }
 0x87f   : > { %1503 = vadd.xlane.f32.xlu0 %v1502_v35 }
 0x90a   : > { %v1501_v36 = vpop.xlane.xlu1 %1500 }
 0x90b   : > { %v1505_v37 = vmul.f32 0.03125, %v1501_v36 }
 0x90c   : > { %v1504_v38 = vpop.xlane.xlu0 %1503 }
 0x90d   : > { %v1507_v39 = vsub.f32 %v1491_v32, %v1505_v37  ;;  %v1506_v40 = vmul.f32 0.03125, %v1504_v38 }
 0x90f   : > { %v1508_v41 = vsub.f32 %v1494_v34, %v1506_v40  ;;  %v1509_v42 = vmul.f32 %v1507_v39, %v1507_v39 }
 0x911   : > { %v1511_v43 = vsel %vm730_vm1, %v1509_v42, 0.0  ;;  %v1510_v44 = vmul.f32 %v1508_v41, %v1508_v41 }
 0x912   : > { %1512 = vadd.xlane.f32.xlu0 %v1511_v43 }
 0x913   : > { %v1514_v45 = vsel %vm730_vm1, %v1510_v44, 0.0 }
 0x916   : > { %1515 = vadd.xlane.f32.xlu0 %v1514_v45 }
 0x99f   : > { %v1513_v46 = vpop.xlane.xlu0 %1512 }
 0x9a0   : > { %v1517_v47 = vmul.f32 0.03125, %v1513_v46 }
 0x9a2   : > { %v1519_v48 = vadd.f32 1e-05, %v1517_v47 }
 0x9a3   : > { %v1516_v49 = vpop.xlane.xlu0 %1515 }
 0x9a4   : > { %1909 = vrsqrt.f32 %v1519_v48  ;;  %v1518_v50 = vmul.f32 0.03125, %v1516_v49 }
 0x9a6   : > { %v1520_v51 = vadd.f32 1e-05, %v1518_v50 }
 0x9a8   : > { %1911 = vrsqrt.f32 %v1520_v51 }
 0x9ae   : > { %v1910_v52 = vpop.eup %1909 }
 0x9af   : > { %v1523_v54 = vmul.f32 %v1910_v52, %v1507_v39 }
 0x9b1   : > { %v1531_v56 = vmul.f32 %v1726_v53, %v1523_v54 }
 0x9b2   : > { %v1912_v57 = vpop.eup %1911 }
 0x9b3   : > { %v1539_v58 = vadd.f32 %v1727_v55, %v1531_v56  ;;  %v1524_v59 = vmul.f32 %v1912_v57, %v1508_v41 }
 0x9b5   : > { %v1541_v60 = vadd.f32 %v1739_v10, %v1539_v58  ;;  %v1532_v61 = vmul.f32 %v1726_v53, %v1524_v59 }
 0x9b7   : > { %v1735_v62 = vpack.c.bf16 %v1541_v60, %v1541_v60  ;;  %v1540_v63 = vadd.f32 %v1727_v55, %v1532_v61 }
 0x9b9   : > { %1552 = vst.msk [vmem:[%s693_s26] sm:$0xf] %vm1551_vm5, %v1735_v62  ;;  %v1542_v0 = vadd.f32 %v1740_v11, %v1540_v63 }
 0x9bb   : > { %v1736_v2 = vpack.c.bf16 %v1542_v0, %v1542_v0 }
 0x9bd   : > { %1553 = vst.msk [vmem:[%s693_s26 + $0x4] sm:$0xf] %vm1551_vm5, %v1736_v2 }
 0x9be PF: > { %s26_s23 = sadd.s32 1, %s1935_s23   ;;  %s2280_s21 = smov %s1931_s22 }
 0x9bf   : > { %p23_p8 = scmp.ge.s32.totalorder %s26_s23, 6   ;;  %s2281_s22 = smov %s2283_s24 }
 0x9c1   :  { %25 = sbr.rel (!%p23_p8) target bundleno = 3 (0x3), region = 125 }

// kernel: gmflow_forward.17
= control target key start
LH: loop header
LB: loop body
LE: loop exit
PB: predicated region body
PF: predicated region fallthrough
CT: control target
= control target key end

     0   :  { %s1928_s21 = smov 0   ;;  %s1930_s22 = smov 0   ;;  %s2157_s0 = inlined_call_operand.vmem [shape: bf16[4,16,32], index: 0, kind: input, shape index: {}, may-alias: {0,1}]   ;;  %s2158_s1 = inlined_call_operand.vmem [shape: bf16[4,16,32], index: 1, kind: input, shape index: {}, may-alias: {0,1}]   ;;  %s2159_s2 = inlined_call_operand.vmem [shape: bf16[32,32], index: 2, kind: input, shape index: {}]   ;;  %s2160_s3 = inlined_call_operand.vmem [shape: f32[1,32], index: 3, kind: input, shape index: {}]   ;;  %s2161_s4 = inlined_call_operand.vmem [shape: bf16[32,64], index: 4, kind: input, shape index: {}]   ;;  %s2162_s5 = inlined_call_operand.vmem [shape: f32[1,64], index: 5, kind: input, shape index: {}]   ;;  %s2163_s6 = inlined_call_operand.vmem [shape: bf16[32,32], index: 6, kind: input, shape index: {}]   ;;  %s2164_s7 = inlined_call_operand.vmem [shape: f32[1,32], index: 7, kind: input, shape index: {}]   ;;  %s2165_s8 = inlined_call_operand.vmem [shape: f32[1,32], index: 8, kind: input, shape index: {}]   ;;  %s2166_s9 = inlined_call_operand.vmem [shape: f32[1,32], index: 9, kind: input, shape index: {}]   ;;  %s2167_s10 = inlined_call_operand.vmem [shape: bf16[64,256], index: 10, kind: input, shape index: {}]   ;;  %s2168_s11 = inlined_call_operand.vmem [shape: f32[1,256], index: 11, kind: input, shape index: {}]   ;;  %s2169_s12 = inlined_call_operand.vmem [shape: bf16[256,32], index: 12, kind: input, shape index: {}]   ;;  %s2170_s13 = inlined_call_operand.vmem [shape: f32[1,32], index: 13, kind: input, shape index: {}]   ;;  %s2171_s14 = inlined_call_operand.vmem [shape: f32[1,32], index: 14, kind: input, shape index: {}]   ;;  %s2172_s15 = inlined_call_operand.vmem [shape: f32[1,32], index: 15, kind: input, shape index: {}]   ;;  %s2173_s16 = inlined_call_operand.vmem [shape: bf16[4,16,32], index: 16, kind: output, shape index: {}]  }
   0x1   :  { %2174 = sst [smem:[#allocation6_spill]] %s2157_s0  ;;  %s1932_s23 = smov 0  }
   0x2 LB: > { %s45_s24 = sadd.s32 1, %s1831_s22  ;;  %p1575_p0 = scmp.ge.s32.totalorder %s1835_s23, 1  ;;  %s1835_s23 = sphi %s1932_s23, %s26_s23   ;;  %s1831_s22 = sphi %s1930_s22, %s2177_s22   ;;  %s1827_s21 = sphi %s1928_s21, %s2176_s21  }
   0x3   : > { %p47_p1 = scmp.ge.s32.totalorder %s45_s24, 4  ;;  %p507_p2 = scmp.lt.s32.totalorder %s1835_s23, 5 }
   0x5   : > { %s2179_s24 = smov (%p47_p1, %s45_s24), 0  ;;  %p508_p3 = pnand %p1575_p0, %p507_p2 }
   0x6   : > { %v1749_v0 = vld [vmem:[%s2159_s2] sm:$0xff] (!%p508_p3)   ;;  %v1837_v1 = vmov (!%p508_p3), 0.0   ;;  %v1750_v2 = vld [vmem:[%s2159_s2 + $0x8] sm:$0xff] (!%p508_p3)   ;;  %vm1838_vm0 = vmmov (!%p508_p3), 0   ;;  %p575_p4 = scmp.lt.s32.totalorder (!%p508_p3), %s1827_s21, 3  ;;  %vm639_vm1 = vcmask (!%p508_p3), 261120  }
   0x7   : > { %511 = sbr.rel (%p508_p3) target bundleno = 2491 (0x9bb), region = 84  ;;  %1676 = vmatprep.subr.bf16.mxu1 (!%p508_p3), %v1837_v1  ;;  %1692 = vmatprep.subr.bf16.mxu0 (!%p508_p3), %v1837_v1  ;;  %693 = vst.msk [vmem:[#allocation5] sm:$0xff] (!%p508_p3), %vm639_vm1, %v1837_v1  ;;  %694 = vst.msk [vmem:[#allocation5 + $0x8] sm:$0xff] (!%p508_p3), %vm639_vm1, %v1837_v1  ;;  %v1752_v3 = vld [vmem:[%s2161_s4] sm:$0xff] (!%p508_p3)   ;;  %s2175_s19 = sld [smem:[#allocation6_spill]] (!%p508_p3)  ;;  %v1753_v5 = vld [vmem:[%s2161_s4 + $0x8] sm:$0xff] (!%p508_p3)  }
   0x8   : > { %1677 = vmatpush3.bf16.msra.mxu1 (!%p508_p3), %v1749_v0  ;;  %1680 = vmatprep.mubr.msk.bf16.mxu1 (!%p508_p3), %vm1838_vm0, %v1837_v1  ;;  %v1582_v7 = vld [vmem:[%s2160_s3] ss:$0 sm:$0xff] (!%p508_p3)  ;;  %vm688_vm2 = vcmask (!%p508_p3), 7168   ;;  %v1839_v27 = vmov (!%p508_p3), -inf   ;;  %vm821_vm3 = vcmask (!%p508_p3), 130048   ;;  %v1840_v34 = vmov (!%p508_p3), 0  }
   0x9   : > { %1678 = vmatprep.subr.bf16.mxu1 (!%p508_p3), %v1837_v1  ;;  %1694 = vmatprep.mubr.msk.bf16.mxu0 (!%p508_p3), %vm1838_vm0, %v1837_v1  ;;  %v1587_v17 = vld [vmem:[%s2162_s5] ss:$0 sm:$0xff] (!%p508_p3)  ;;  %689 = vst.msk [vmem:[#allocation3] sm:$0xff] (!%p508_p3), %vm688_vm2, %v1839_v27  ;;  %690 = vst.msk [vmem:[#allocation3 + $0x8] sm:$0xff] (!%p508_p3), %vm688_vm2, %v1839_v27  ;;  %s1842_s30 = smov (!%p508_p3), 32   ;;  %vm1145_vm4 = vcmask (!%p508_p3), 523264  }
   0xa   : > { %691 = vst.msk [vmem:[#allocation4] sm:$0xff] (!%p508_p3), %vm688_vm2, %v1837_v1  ;;  %692 = vst.msk [vmem:[#allocation4 + $0x8] sm:$0xff] (!%p508_p3), %vm688_vm2, %v1837_v1  ;;  %1742 = vset.pattern.permute.xlu1 (!%p508_p3), %v1840_v34  ;;  %1743 = vset.pattern.permute.xlu0 (!%p508_p3), %v1840_v34  ;;  %vm1460_vm5 = vcmask (!%p508_p3), 257024  }
   0xc   : > { %1679 = vmatpush3.bf16.msra.mxu1 (!%p508_p3), %v1750_v2 }
   0xd   : > { %1684 = vmatprep.subr.bf16.mxu1 (!%p508_p3), %v1837_v1 }
   0xe   : > { %s2181_s21 = smov (!%p575_p4, %s1827_s21), 3 }
   0xf   : > { %s1966_s0 = sshll.u32 %s2181_s21, 3 }
  0x10   : > { %s1972_s20 = scalar_lea.vmem %s2175_s19, %s1966_s0  ;;  %s592_s27 = scalar_lea.vmem %s2158_s1, %s1966_s0  ;;  %v819_v35 = vld [vmem:[#allocation3] sm:$0xff]  ;;  %v820_v38 = vld [vmem:[#allocation3 + $0x8] sm:$0xff] }
  0x11   : > { %v1751_v4 = vld [vmem:[%s1972_s20] sm:$0xff]   ;;  %s1841_s19 = smov 96   ;;  %v852_v59 = vld [vmem:[#allocation4] sm:$0xff]  ;;  %s602_s21 = scalar_lea.vmem %s2173_s16, %s1966_s0 }
  0x12   : > { %1681 = vmatmul.mubr.msk.bf16.vlgmr.msra.gmra.mrb[0].mxu1 %vm639_vm1, %v1751_v4  ;;  %v1754_v6 = vld [vmem:[%s592_s27] sm:$0xff]  }
  0x13   : > { %1685 = vmatpush3.bf16.msra.mxu1 %v1752_v3  ;;  %1688 = vmatprep.mubr.msk.bf16.mxu1 %vm1838_vm0, %v1837_v1  ;;  %v853_v62 = vld [vmem:[#allocation4 + $0x8] sm:$0xff] }
  0x14   : > { %1686 = vmatprep.subr.bf16.mxu1 %v1837_v1 }
  0x17   : > { %1687 = vmatpush3.bf16.msra.mxu1 %v1753_v5 }
  0x18   : > { %1698 = vmatprep.subr.bf16.mxu1 %v1837_v1 }
  0x1a   : > { %1689 = vmatmul.mubr.msk.bf16.vlgmr.msra.gmra.mrb[4].mxu1 %vm639_vm1, %v1754_v6 }
  0x1b   : > { %1700 = vmatprep.mubr.msk.bf16.mxu1 %vm1838_vm0, %v1837_v1 }
  0xe5   : > { %v677_v8 = vpop.f32.mrb[0].mxu1 }
  0xe6   : > { %v678_v9 = vadd.f32 %v1582_v7, %v677_v8  ;;  %v1682_v10 = vpop.f32.mrb[1].mxu1 }
  0xe7   : > { %v680_v11 = vpop.f32.mrb[2].mxu1  ;;  %v867_v10 = vld [vmem:[#allocation5] sm:$0xff] }
  0xe8   : > { %v681_v12 = vadd.f32 %v1582_v7, %v680_v11  ;;  %v1683_v13 = vpop.f32.mrb[3].mxu1  ;;  %v684_v14 = vmul.f32 0.17677669, %v678_v9  ;;  %v1755_v7 = vld [vmem:[%s2163_s6] sm:$0xff]   ;;  %v1756_v9 = vld [vmem:[%s2163_s6 + $0x8] sm:$0xff]  }
  0xea   : > { %v685_v15 = vmul.f32 0.17677669, %v681_v12  ;;  %v868_v12 = vld [vmem:[#allocation5 + $0x8] sm:$0xff] }
  0xec   : > { %v686_v16 = vpack.c.bf16 %v685_v15, %v684_v14 }
  0xed   : > { %v763_v18 = vpop.f32.mrb[4].mxu1 }
  0xee   : > { %687 = vst.msk [vmem:[#allocation2] sm:$0xff] %vm639_vm1, %v686_v16  ;;  %v1690_v19 = vpop.f32.mrb[5].mxu1  ;;  %v764_v21 = vadd.f32 %v1587_v17, %v763_v18 }
  0xef   : > { %v766_v20 = vpop.f32.mrb[6].mxu1 }
  0xf0   : > { %v767_v22 = vadd.f32 %v1587_v17, %v766_v20  ;;  %v1691_v23 = vpop.f32.mrb[7].mxu1 }
  0xf2   : > { %v770_v24 = vpack.c.bf16 %v767_v22, %v764_v21 }
  0xf4   : > { %v776_v25 = vsel %vm639_vm1, %v770_v24, 0 }
  0xf5   : > { %1693 = vmatpush3.bf16.xpose.msra.mxu0 %v776_v25  ;;  %v771_v26 = vld [vmem:[#allocation2] sm:$0xff] }
  0xf6   : > { %1704 = vmatprep.subr.bf16.mxu0 %v1837_v1 }
  0xfc   : > { %1695 = vmatmul.mubr.msk.bf16.vlgmr.msra.gmra.mrb[0].mxu0 %vm639_vm1, %v771_v26 }
  0xfd   : > { %1708 = vmatprep.mubr.msk.bf16.mxu0 %vm1838_vm0, %v1837_v1  ;;  %1705 = vmatpush3.bf16.msra.mxu0 %v1755_v7 }
  0xfe   : > { %1706 = vmatprep.subr.bf16.mxu0 %v1837_v1 }
 0x101   : > { %1707 = vmatpush3.bf16.msra.mxu0 %v1756_v9  ;;  %v2066_v9 = vld [vmem:[%s1972_s20] sm:$0xff]  }
 0x1cf   : > { %v812_v28 = vpop.f32.mrb[0].mxu0 }
 0x1d0   : > { %v1696_v29 = vpop.f32.mrb[1].mxu0  ;;  %v822_v30 = vsel %vm821_vm3, %v812_v28, -inf }
 0x1d1   : > { %823 = vmax.xlane.f32.xlu0 %v822_v30  ;;  %v815_v31 = vpop.f32.mrb[2].mxu0 }
 0x1d2   : > { %v1697_v32 = vpop.f32.mrb[3].mxu0  ;;  %v825_v33 = vsel %vm821_vm3, %v815_v31, -inf }
 0x1d5   : > { %826 = vmax.xlane.f32.xlu0 %v825_v33 }
 0x1eb   : > { %883 = vrot.lane.b32.xlu0 %v770_v24, %s1841_s19 }
 0x25e   : > { %v824_v36 = vpop.xlane.xlu0 %823 }
 0x25f   : > { %v828_v37 = vmax.f32 %v819_v35, %v824_v36 }
 0x261   : > { %v830_v39 = vsub.f32 %v819_v35, %v828_v37  ;;  %934 = vst.msk [vmem:[#allocation3] sm:$0xff] %vm688_vm2, %v828_v37  ;;  %838 = vperm.xlu1 %1742, %v828_v37  }
 0x262   : > { %v827_v40 = vpop.xlane.xlu0 %826 }
 0x263   : > { %v829_v41 = vmax.f32 %v820_v38, %v827_v40  ;;  %v832_v53 = vmul.f32 1.442695, %v830_v39 }
 0x265   : > { %v831_v42 = vsub.f32 %v820_v38, %v829_v41  ;;  %935 = vst.msk [vmem:[#allocation3 + $0x8] sm:$0xff] %vm688_vm2, %v829_v41  ;;  %843 = vperm.xlu1 %1742, %v829_v41  }
 0x266   : > { %v884_v43 = vpop.permute.xlu0 %883 }
 0x267   : > { %1699 = vmatpush3.bf16.msra.mxu1 %v884_v43  ;;  %v834_v56 = vmul.f32 1.442695, %v831_v42 }
 0x2e0   : > { %v839_v44 = vpop.permute.xlu1 %838 }
 0x2e1   : > { %v846_v45 = vsub.f32 %v812_v28, %v839_v44  ;;  %v1594_v28 = vld [vmem:[%s2164_s7] ss:$0 sm:$0xff] }
 0x2e3   : > { %v848_v46 = vmul.f32 1.442695, %v846_v45 }
 0x2e4   : > { %v844_v47 = vpop.permute.xlu1 %843 }
 0x2e5   : > { %1785 = vpow2.f32 %v848_v46  ;;  %v847_v48 = vsub.f32 %v815_v31, %v844_v47  ;;  %v1757_v47 = vld [vmem:[%s2167_s10] ss:$8 sps:$4 sm:$0xff]  }
 0x2e7   : > { %v850_v49 = vmul.f32 1.442695, %v847_v48  ;;  %v1759_v48 = vld [vmem:[%s2167_s10 + $0x4] ss:$8 sps:$4 sm:$0xff]  }
 0x2e8   : > { %1149 = vmatprep.subr.bf16.mxu1 %v1759_v48 }
 0x2e9   : > { %1787 = vpow2.f32 %v850_v49  ;;  %v1762_v49 = vld [vmem:[%s2167_s10 + $0x14] ss:$8 sps:$4 sm:$0xff]  }
 0x2ea   : > { %1789 = vpow2.f32 %v832_v53 }
 0x2eb   : > { %1791 = vpow2.f32 %v834_v56 }
 0x2ef   : > { %v1786_v50 = vpop.eup %1785 }
 0x2f0   : > { %v856_v51 = vsel %vm821_vm3, %v1786_v50, 0.0 }
 0x2f1   : > { %857 = vadd.xlane.f32.xlu1 %v856_v51  ;;  %v1765_v51 = vld [vmem:[%s2167_s10 + $0x24] ss:$8 sps:$4 sm:$0xff]  }
 0x2f3   : > { %v1788_v52 = vpop.eup %1787 }
 0x2f4   : > { %v859_v54 = vsel %vm821_vm3, %v1788_v52, 0.0  ;;  %v881_v55 = vpack.c.bf16 %v1788_v52, %v1786_v50  ;;  %v1790_v57 = vpop.eup %1789  ;;  %v1760_v50 = vld [vmem:[%s2167_s10 + $0x10] ss:$8 sps:$4 sm:$0xff]   ;;  %v1763_v52 = vld [vmem:[%s2167_s10 + $0x20] ss:$8 sps:$4 sm:$0xff]  }
 0x2f5   : > { %860 = vadd.xlane.f32.xlu0 %v859_v54  ;;  %v1792_v58 = vpop.eup %1791  ;;  %v854_v60 = vmul.f32 %v1790_v57, %v852_v59  ;;  %v1768_v59 = vld [vmem:[%s2167_s10 + $0x34] ss:$8 sps:$4 sm:$0xff]  }
 0x2f6   : > { %1701 = vmatmul.mubr.msk.bf16.vlgmr.msra.gmra.mrb[8].mxu1 %vm821_vm3, %v881_v55  ;;  %v855_v0 = vmul.f32 %v1792_v58, %v853_v62 }
 0x2f7   : > { %1181 = vmatprep.mubr.bf16.mxu1 %v1840_v34  ;;  %1150 = vmatpush1.bf16.msra.mxu1 %v1757_v47 }
 0x2f8   : > { %1151 = vmatprep.subr.bf16.mxu1 %v1762_v49 }
 0x2fb   : > { %1152 = vmatpush1.bf16.msra.mxu1 %v1760_v50 }
 0x2fc   : > { %1153 = vmatprep.subr.bf16.mxu1 %v1765_v51 }
 0x2ff   : > { %1154 = vmatpush1.bf16.msra.mxu1 %v1763_v52 }
 0x300   : > { %1155 = vmatprep.subr.bf16.mxu1 %v1768_v59 }
 0x302   : > { %871 = vperm.xlu1 %1742, %v1790_v57  }
 0x30b   : > { %876 = vperm.xlu0 %1743, %v1792_v58  }
 0x37e   : > { %v858_v61 = vpop.xlane.xlu1 %857 }
 0x37f   : > { %v862_v63 = vadd.f32 %v858_v61, %v854_v60  ;;  %v1766_v61 = vld [vmem:[%s2167_s10 + $0x30] ss:$8 sps:$4 sm:$0xff]  }
 0x380   : > { %1156 = vmatpush1.bf16.msra.mxu1 %v1766_v61 }
 0x381   : > { %865 = vst.msk [vmem:[#allocation4] sm:$0xff] %vm688_vm2, %v862_v63  ;;  %v1598_v63 = vld [vmem:[%s2165_s8] ss:$0 sm:$0xff] }
 0x382   : > { %v861_v2 = vpop.xlane.xlu0 %860  ;;  %v872_v11 = vpop.permute.xlu1 %871 }
 0x383   : > { %v863_v3 = vadd.f32 %v861_v2, %v855_v0  ;;  %v879_v14 = vmul.f32 %v872_v11, %v867_v10  ;;  %v1639_v10 = vunpack.c.l.bf16 %v2066_v9  ;;  %v1640_v11 = vunpack.c.h.bf16 %v2066_v9 }
 0x385   : > { %866 = vst.msk [vmem:[#allocation4 + $0x8] sm:$0xff] %vm688_vm2, %v863_v3 }
 0x388   : > { %v945_v4 = vld [vmem:[#allocation4] sm:$0xff] }
 0x389   : > { %1793 = vrcp.f32 %v945_v4  ;;  %v1599_v4 = vld [vmem:[%s2166_s9] ss:$0 sm:$0xff] }
 0x38a   : > { %v877_v13 = vpop.permute.xlu0 %876 }
 0x38b   : > { %v880_v16 = vmul.f32 %v877_v13, %v868_v12 }
 0x38c   : > { %v946_v5 = vld [vmem:[#allocation4 + $0x8] sm:$0xff] }
 0x38d   : > { %1795 = vrcp.f32 %v946_v5 }
 0x393   : > { %v1794_v6 = vpop.eup %1793 }
 0x394   : > { %951 = vperm.xlu1 %1742, %v1794_v6  }
 0x397   : > { %v1796_v8 = vpop.eup %1795 }
 0x398   : > { %956 = vperm.xlu1 %1742, %v1796_v8  }
 0x3c9   : > { %v923_v15 = vpop.f32.mrb[8].mxu1 }
 0x3ca   : > { %v930_v17 = vadd.f32 %v923_v15, %v879_v14  ;;  %v1702_v18 = vpop.f32.mrb[9].mxu1 }
 0x3cb   : > { %v926_v19 = vpop.f32.mrb[10].mxu1  ;;  %v1769_v18 = vld [vmem:[%s2169_s12 + $0x40] sm:$0xff]  }
 0x3cc   : > { %932 = vst.msk [vmem:[#allocation5] sm:$0xff] %vm639_vm1, %v930_v17  ;;  %v931_v1 = vadd.f32 %v926_v19, %v880_v16  ;;  %v1703_v20 = vpop.f32.mrb[11].mxu1  ;;  %v1770_v19 = vld [vmem:[%s2169_s12] sm:$0xff]   ;;  %1654 = vmatprep.subr.bf16.mxu0 %v1769_v18 }
 0x3cd   : > { %v1772_v20 = vld [vmem:[%s2169_s12 + $0x8] sm:$0xff]  }
 0x3ce   : > { %933 = vst.msk [vmem:[#allocation5 + $0x8] sm:$0xff] %vm639_vm1, %v931_v1  ;;  %v1771_v1 = vld [vmem:[%s2169_s12 + $0x48] sm:$0xff]  }
 0x3d3   : > { %v943_v22 = vld [vmem:[#allocation5] sm:$0xff] }
 0x3d5   : > { %v944_v24 = vld [vmem:[#allocation5 + $0x8] sm:$0xff] }
 0x413   : > { %v952_v21 = vpop.permute.xlu1 %951 }
 0x414   : > { %v959_v25 = vmul.f32 %v952_v21, %v943_v22  ;;  %v1773_v21 = vld [vmem:[%s2169_s12 + $0x50] sm:$0xff]  }
 0x415   : > { %v1774_v22 = vld [vmem:[%s2169_s12 + $0x10] sm:$0xff]  }
 0x417   : > { %v957_v23 = vpop.permute.xlu1 %956 }
 0x418   : > { %v960_v26 = vmul.f32 %v957_v23, %v944_v24  ;;  %v1775_v23 = vld [vmem:[%s2169_s12 + $0x58] sm:$0xff]  }
 0x419   : > { %v1776_v24 = vld [vmem:[%s2169_s12 + $0x18] sm:$0xff]  }
 0x41a   : > { %v961_v27 = vpack.c.bf16 %v960_v26, %v959_v25  ;;  %v1777_v25 = vld [vmem:[%s2169_s12 + $0x60] sm:$0xff]  }
 0x41b   : > { %v1778_v26 = vld [vmem:[%s2169_s12 + $0x20] sm:$0xff]  }
 0x41c   : > { %1709 = vmatmul.mubr.msk.bf16.vlgmr.msra.gmra.mrb[4].mxu0 %vm639_vm1, %v961_v27  ;;  %v1779_v27 = vld [vmem:[%s2169_s12 + $0x68] sm:$0xff]  }
 0x41d   : > { %1655 = vmatpush3.bf16.msra.mxu0 %v1770_v19 }
 0x41e   : > { %1656 = vmatprep.subr.bf16.mxu0 %v1771_v1 }
 0x421   : > { %1657 = vmatpush3.bf16.msra.mxu0 %v1772_v20 }
 0x422   : > { %1658 = vmatprep.subr.bf16.mxu0 %v1773_v21 }
 0x425   : > { %1659 = vmatpush3.bf16.msra.mxu0 %v1774_v22 }
 0x426   : > { %1660 = vmatprep.subr.bf16.mxu0 %v1775_v23 }
 0x429   : > { %1661 = vmatpush3.bf16.msra.mxu0 %v1776_v24 }
 0x42a   : > { %1662 = vmatprep.subr.bf16.mxu0 %v1777_v25 }
 0x42d   : > { %1663 = vmatpush3.bf16.msra.mxu0 %v1778_v26 }
 0x42e   : > { %1664 = vmatprep.subr.bf16.mxu0 %v1779_v27  ;;  %v1609_v27 = vld [vmem:[%s2170_s13] ss:$0 sm:$0xff] }
 0x4ef   : > { %v1022_v29 = vpop.f32.mrb[4].mxu0 }
 0x4f0   : > { %v1023_v30 = vadd.f32 %v1594_v28, %v1022_v29  ;;  %v1710_v31 = vpop.f32.mrb[5].mxu0  ;;  %v1781_v29 = vld [vmem:[%s2169_s12 + $0x70] sm:$0xff]  }
 0x4f1   : > { %v1025_v32 = vpop.f32.mrb[6].mxu0  ;;  %v1783_v31 = vld [vmem:[%s2169_s12 + $0x78] sm:$0xff]  }
 0x4f2   : > { %v1026_v33 = vadd.f32 %v1594_v28, %v1025_v32  ;;  %v1711_v34 = vpop.f32.mrb[7].mxu0  ;;  %v1031_v35 = vsel %vm639_vm1, %v1023_v30, 0.0  ;;  %v1780_v28 = vld [vmem:[%s2169_s12 + $0x28] sm:$0xff]   ;;  %v1784_v32 = vld [vmem:[%s2169_s12 + $0x38] sm:$0xff]  }
 0x4f3   : > { %1032 = vadd.xlane.f32.xlu1 %v1031_v35  ;;  %1665 = vmatpush3.bf16.msra.mxu0 %v1780_v28 }
 0x4f4   : > { %v1034_v36 = vsel %vm639_vm1, %v1026_v33, 0.0  ;;  %1666 = vmatprep.subr.bf16.mxu0 %v1781_v29 }
 0x4f5   : > { %1035 = vadd.xlane.f32.xlu0 %v1034_v36  ;;  %v1093_v36 = vld [vmem:[%s2168_s11] sm:$0x3] }
 0x580   : > { %v1033_v37 = vpop.xlane.xlu1 %1032 }
 0x581   : > { %v1038_v38 = vmul.f32 0.03125, %v1033_v37 }
 0x582   : > { %v1036_v39 = vpop.xlane.xlu0 %1035 }
 0x583   : > { %v1040_v40 = vsub.f32 %v1023_v30, %v1038_v38  ;;  %v1039_v41 = vmul.f32 0.03125, %v1036_v39  ;;  %v1782_v30 = vld [vmem:[%s2169_s12 + $0x30] sm:$0xff]  }
 0x584   : > { %1667 = vmatpush3.bf16.msra.mxu0 %v1782_v30 }
 0x585   : > { %v1041_v42 = vsub.f32 %v1026_v33, %v1039_v41  ;;  %v1042_v43 = vmul.f32 %v1040_v40, %v1040_v40  ;;  %1668 = vmatprep.subr.bf16.mxu0 %v1783_v31  ;;  %v1095_v33 = vlaneseq }
 0x587   : > { %v1044_v44 = vsel %vm639_vm1, %v1042_v43, 0.0  ;;  %v1043_v45 = vmul.f32 %v1041_v42, %v1041_v42  ;;  %v1096_v34 = vshrl.u32 %v1095_v33, 7 }
 0x588   : > { %1045 = vadd.xlane.f32.xlu1 %v1044_v44  ;;  %1669 = vmatpush3.bf16.msra.mxu0 %v1784_v32 }
 0x589   : > { %v1047_v46 = vsel %vm639_vm1, %v1043_v45, 0.0  ;;  %v1097_v35 = vsub.s32 0, %v1096_v34  ;;  %v1101_v37 = vsub.s32 1, %v1096_v34 }
 0x58b   : > { %v1098_v38 = vrot.slane %v1093_v36, %v1097_v35  ;;  %v1102_v39 = vrot.slane %v1093_v36, %v1101_v37 }
 0x58c   : > { %1048 = vadd.xlane.f32.xlu1 %v1047_v46 }
 0x615   : > { %v1046_v53 = vpop.xlane.xlu1 %1045 }
 0x616   : > { %v1050_v54 = vmul.f32 0.03125, %v1046_v53 }
 0x618   : > { %v1052_v55 = vadd.f32 1e-05, %v1050_v54 }
 0x619   : > { %v1049_v56 = vpop.xlane.xlu1 %1048 }
 0x61a   : > { %1797 = vrsqrt.f32 %v1052_v55  ;;  %v1051_v57 = vmul.f32 0.03125, %v1049_v56 }
 0x61c   : > { %v1053_v58 = vadd.f32 1e-05, %v1051_v57 }
 0x61e   : > { %1799 = vrsqrt.f32 %v1053_v58 }
 0x624   : > { %v1798_v60 = vpop.eup %1797 }
 0x625   : > { %v1056_v62 = vmul.f32 %v1798_v60, %v1040_v40 }
 0x627   : > { %v1064_v3 = vmul.f32 %v1598_v63, %v1056_v62 }
 0x628   : > { %v1800_v0 = vpop.eup %1799 }
 0x629   : > { %v1057_v2 = vmul.f32 %v1800_v0, %v1041_v42  ;;  %v1072_v6 = vadd.f32 %v1599_v4, %v1064_v3 }
 0x62b   : > { %v1065_v5 = vmul.f32 %v1598_v63, %v1057_v2 }
 0x62d   : > { %v1073_v7 = vadd.f32 %v1599_v4, %v1065_v5 }
 0x62f   : > { %v1744_v8 = vpack.i.bf16 %v1073_v7, %v1072_v6 }
 0x631   : > { %1745 = vrot.lane.b32.xlu1 %v1744_v8, %s1842_s30 }
 0x6a3   : > { %v1746_v12 = vpop.permute.xlu1 %1745 }
 0x6a4   : > { %v1748_v13 = vunpack.i.h.bf16 %v1746_v12  ;;  %v1747_v14 = vunpack.i.l.bf16 %v1746_v12 }
 0x6a6   : > { %v1083_v15 = vsel %vm639_vm1, %v1640_v11, %v1748_v13  ;;  %v1082_v16 = vsel %vm639_vm1, %v1639_v10, %v1747_v14 }
 0x6a7   : > { %v1084_v17 = vpack.c.bf16 %v1083_v15, %v1082_v16 }
 0x6a9   : > { %1608 = vmatmul.mubr.msk.bf16.vlgmr.msra.gmra.mrb[12].mxu1 %vm1145_vm4, %v1084_v17 }
 0x77c   : > { %v1183_v40 = vpop.f32.mrb[12].mxu1 }
 0x77d   : > { %v1184_v41 = vadd.f32 %v1183_v40, %v1098_v38  ;;  %v1185_v42 = vpop.f32.mrb[13].mxu1 }
 0x77e   : > { %v1186_v43 = vadd.f32 %v1185_v42, %v1102_v39  ;;  %v1187_v44 = vpop.f32.mrb[14].mxu1 }
 0x77f   : > { %v1192_v45 = vmul.f32 %v1184_v41, %v1184_v41  ;;  %v1188_v46 = vadd.f32 %v1187_v44, %v1098_v38  ;;  %v1189_v47 = vpop.f32.mrb[15].mxu1 }
 0x780   : > { %v1193_v48 = vmul.f32 %v1186_v43, %v1186_v43  ;;  %v1190_v49 = vadd.f32 %v1189_v47, %v1102_v39 }
 0x781   : > { %v1196_v50 = vmul.f32 %v1192_v45, %v1184_v41  ;;  %v1194_v51 = vmul.f32 %v1188_v46, %v1188_v46 }
 0x782   : > { %v1197_v52 = vmul.f32 %v1193_v48, %v1186_v43  ;;  %v1195_v53 = vmul.f32 %v1190_v49, %v1190_v49 }
 0x783   : > { %v1200_v54 = vmul.f32 0.044715, %v1196_v50  ;;  %v1198_v55 = vmul.f32 %v1194_v51, %v1188_v46 }
 0x784   : > { %v1201_v56 = vmul.f32 0.044715, %v1197_v52  ;;  %v1199_v57 = vmul.f32 %v1195_v53, %v1190_v49  ;;  %v1626_v53 = vld [vmem:[%s2171_s14] ss:$0 sm:$0xff] }
 0x785   : > { %v1204_v58 = vadd.f32 %v1200_v54, %v1184_v41  ;;  %v1202_v59 = vmul.f32 0.044715, %v1198_v55  ;;  %v1627_v55 = vld [vmem:[%s2172_s15] ss:$0 sm:$0xff] }
 0x786   : > { %v1205_v60 = vadd.f32 %v1201_v56, %v1186_v43  ;;  %v1203_v61 = vmul.f32 0.044715, %v1199_v57 }
 0x787   : > { %v1208_v62 = vmul.f32 0.7978846, %v1204_v58  ;;  %v1206_v63 = vadd.f32 %v1202_v59, %v1188_v46 }
 0x788   : > { %v1209_v0 = vmul.f32 0.7978846, %v1205_v60  ;;  %v1207_v2 = vadd.f32 %v1203_v61, %v1190_v49 }
 0x789   : > { %1801 = vtanh.f32 %v1208_v62  ;;  %v1210_v3 = vmul.f32 0.7978846, %v1206_v63 }
 0x78a   : > { %1803 = vtanh.f32 %v1209_v0  ;;  %v1211_v4 = vmul.f32 0.7978846, %v1207_v2 }
 0x78b   : > { %1805 = vtanh.f32 %v1210_v3 }
 0x78c   : > { %1807 = vtanh.f32 %v1211_v4 }
 0x793   : > { %v1802_v5 = vpop.eup %1801 }
 0x794   : > { %v1804_v6 = vpop.eup %1803  ;;  %v1216_v7 = vadd.f32 1.0, %v1802_v5 }
 0x795   : > { %v1806_v8 = vpop.eup %1805  ;;  %v1217_v12 = vadd.f32 1.0, %v1804_v6 }
 0x796   : > { %v1808_v13 = vpop.eup %1807  ;;  %v1220_v14 = vmul.f32 0.5, %v1216_v7  ;;  %v1218_v15 = vadd.f32 1.0, %v1806_v8 }
 0x797   : > { %v1219_v16 = vadd.f32 1.0, %v1808_v13  ;;  %v1221_v17 = vmul.f32 0.5, %v1217_v12 }
 0x798   : > { %v1222_v18 = vmul.f32 0.5, %v1218_v15  ;;  %v1224_v1 = vmul.f32 %v1220_v14, %v1184_v41 }
 0x799   : > { %v1223_v19 = vmul.f32 0.5, %v1219_v16  ;;  %v1225_v21 = vmul.f32 %v1221_v17, %v1186_v43 }
 0x79a   : > { %v1226_v20 = vmul.f32 %v1222_v18, %v1188_v46 }
 0x79b   : > { %v1227_v22 = vmul.f32 %v1223_v19, %v1190_v49 }
 0x79c   : > { %v1228_v23 = vpack.c.bf16 %v1226_v20, %v1224_v1 }
 0x79d   : > { %v1229_v24 = vpack.c.bf16 %v1227_v22, %v1225_v21 }
 0x79f   : > { %1397 = vmatprep.mubr.bf16.mxu0 %v1229_v24 }
 0x7a0   : > { %1398 = vmatmul.mubr.bf16.vlgmr.msra.gmra.mrb[8].mxu0 %v1228_v23 }
 0x873   : > { %v1670_v25 = vpop.f32.mrb[8].mxu0 }
 0x874   : > { %v1671_v26 = vpop.f32.mrb[9].mxu0 }
 0x875   : > { %v1672_v28 = vadd.f32 %v1671_v26, %v1670_v25  ;;  %v1673_v29 = vpop.f32.mrb[10].mxu0 }
 0x876   : > { %v1674_v30 = vpop.f32.mrb[11].mxu0 }
 0x877   : > { %v1675_v31 = vadd.f32 %v1674_v30, %v1673_v29  ;;  %v1400_v32 = vadd.f32 %v1672_v28, %v1609_v27 }
 0x879   : > { %v1408_v33 = vsel %vm639_vm1, %v1400_v32, 0.0  ;;  %v1403_v34 = vadd.f32 %v1675_v31, %v1609_v27 }
 0x87a   : > { %1409 = vadd.xlane.f32.xlu1 %v1408_v33 }
 0x87b   : > { %v1411_v35 = vsel %vm639_vm1, %v1403_v34, 0.0 }
 0x87c   : > { %1412 = vadd.xlane.f32.xlu0 %v1411_v35 }
 0x907   : > { %v1410_v36 = vpop.xlane.xlu1 %1409 }
 0x908   : > { %v1414_v37 = vmul.f32 0.03125, %v1410_v36 }
 0x909   : > { %v1413_v38 = vpop.xlane.xlu0 %1412 }
 0x90a   : > { %v1416_v39 = vsub.f32 %v1400_v32, %v1414_v37  ;;  %v1415_v40 = vmul.f32 0.03125, %v1413_v38 }
 0x90c   : > { %v1417_v41 = vsub.f32 %v1403_v34, %v1415_v40  ;;  %v1418_v42 = vmul.f32 %v1416_v39, %v1416_v39 }
 0x90e   : > { %v1420_v43 = vsel %vm639_vm1, %v1418_v42, 0.0  ;;  %v1419_v44 = vmul.f32 %v1417_v41, %v1417_v41 }
 0x90f   : > { %1421 = vadd.xlane.f32.xlu0 %v1420_v43 }
 0x910   : > { %v1423_v45 = vsel %vm639_vm1, %v1419_v44, 0.0 }
 0x913   : > { %1424 = vadd.xlane.f32.xlu0 %v1423_v45 }
 0x99c   : > { %v1422_v46 = vpop.xlane.xlu0 %1421 }
 0x99d   : > { %v1426_v47 = vmul.f32 0.03125, %v1422_v46 }
 0x99f   : > { %v1428_v48 = vadd.f32 1e-05, %v1426_v47 }
 0x9a0   : > { %v1425_v49 = vpop.xlane.xlu0 %1424 }
 0x9a1   : > { %1809 = vrsqrt.f32 %v1428_v48  ;;  %v1427_v50 = vmul.f32 0.03125, %v1425_v49 }
 0x9a3   : > { %v1429_v51 = vadd.f32 1e-05, %v1427_v50 }
 0x9a5   : > { %1811 = vrsqrt.f32 %v1429_v51 }
 0x9ab   : > { %v1810_v52 = vpop.eup %1809 }
 0x9ac   : > { %v1432_v54 = vmul.f32 %v1810_v52, %v1416_v39 }
 0x9ae   : > { %v1440_v56 = vmul.f32 %v1626_v53, %v1432_v54 }
 0x9af   : > { %v1812_v57 = vpop.eup %1811 }
 0x9b0   : > { %v1448_v58 = vadd.f32 %v1627_v55, %v1440_v56  ;;  %v1433_v59 = vmul.f32 %v1812_v57, %v1417_v41 }
 0x9b2   : > { %v1450_v60 = vadd.f32 %v1639_v10, %v1448_v58  ;;  %v1441_v61 = vmul.f32 %v1626_v53, %v1433_v59 }
 0x9b4   : > { %v1635_v62 = vpack.c.bf16 %v1450_v60, %v1450_v60  ;;  %v1449_v63 = vadd.f32 %v1627_v55, %v1441_v61 }
 0x9b6   : > { %1461 = vst.msk [vmem:[%s602_s21] sm:$0xf] %vm1460_vm5, %v1635_v62  ;;  %v1451_v0 = vadd.f32 %v1640_v11, %v1449_v63 }
 0x9b8   : > { %v1636_v2 = vpack.c.bf16 %v1451_v0, %v1451_v0 }
 0x9ba   : > { %1462 = vst.msk [vmem:[%s602_s21 + $0x4] sm:$0xf] %vm1460_vm5, %v1636_v2 }
 0x9bb PF: > { %s26_s23 = sadd.s32 1, %s1835_s23   ;;  %s2176_s21 = smov %s1831_s22 }
 0x9bc   : > { %p23_p5 = scmp.ge.s32.totalorder %s26_s23, 6   ;;  %s2177_s22 = smov %s2179_s24 }
 0x9be   :  { %25 = sbr.rel (!%p23_p5) target bundleno = 2 (0x2), region = 125 }

// kernel: gmflow_forward.29
= control target key start
LH: loop header
LB: loop body
LE: loop exit
PB: predicated region body
PF: predicated region fallthrough
CT: control target
= control target key end

     0   :  { %s688_s12 = smov 0   ;;  %s690_s13 = smov 0   ;;  %s743_s0 = inlined_call_operand.vmem [shape: bf16[2,16,32], index: 0, kind: input, shape index: {}]   ;;  %s744_s1 = inlined_call_operand.vmem [shape: bf16[2,16,32], index: 1, kind: input, shape index: {}]   ;;  %s745_s2 = inlined_call_operand.vmem [shape: f32[1,2,16], index: 2, kind: input, shape index: {}]   ;;  %s746_s3 = inlined_call_operand.vmem [shape: f32[2,2,16], index: 3, kind: output, shape index: {}]  }
   0x1   :  { %s692_s14 = smov 0  }
   0x2 LB: > { %s32_s15 = sadd.s32 1, %s659_s13  ;;  %p572_p0 = scmp.ge.s32.totalorder %s663_s14, 1  ;;  %s663_s14 = sphi %s692_s14, %s13_s14   ;;  %s659_s13 = sphi %s690_s13, %s748_s13   ;;  %s655_s12 = sphi %s688_s12, %s747_s12  }
   0x3   : > { %p34_p1 = scmp.ge.s32.totalorder %s32_s15, 2  ;;  %p191_p2 = scmp.lt.s32.totalorder %s663_s14, 3 }
   0x5   : > { %s750_s15 = smov (%p34_p1, %s32_s15), 0  ;;  %p192_p3 = pnand %p572_p0, %p191_p2 }
   0x6   : > { %vm279_vm0 = vcmask (!%p192_p3), 122880   ;;  %p235_p4 = scmp.lt.s32.totalorder (!%p192_p3), %s655_s12, 1  ;;  %v665_v0 = vmov (!%p192_p3), 0.0   ;;  %vm666_vm1 = vmmov (!%p192_p3), 0   ;;  %vm277_vm2 = vcmask (!%p192_p3), 261120  }
   0x7   : > { %195 = sbr.rel (%p192_p3) target bundleno = 519 (0x207), region = 32  ;;  %281 = vst.msk [vmem:[#allocation4] sm:$0x1] (!%p192_p3), %vm279_vm0, %v665_v0  ;;  %593 = vmatprep.subr.bf16.mxu0 (!%p192_p3), %v665_v0  ;;  %595 = vmatprep.mubr.msk.bf16.mxu0 (!%p192_p3), %vm666_vm1, %v665_v0  ;;  %v667_v10 = vmov (!%p192_p3), -inf   ;;  %vm282_vm3 = vcmask (!%p192_p3), 123904   ;;  %vm342_vm4 = vcmask (!%p192_p3), 130048   ;;  %v357_v20 = vlaneseq (!%p192_p3) }
   0x8   : > { %599 = vmatprep.subr.bf16.mxu1 (!%p192_p3), %v665_v0  ;;  %601 = vmatprep.mubr.msk.bf16.mxu1 (!%p192_p3), %vm666_vm1, %v665_v0  ;;  %280 = vst.msk [vmem:[#allocation3] sm:$0x1] (!%p192_p3), %vm279_vm0, %v667_v10  ;;  %v287_v39 = vld [vmem:[%s745_s2] sm:$0x3] (!%p192_p3) }
   0x9   : > { %283 = vst.msk [vmem:[#allocation5] sm:$0x3] (!%p192_p3), %vm282_vm3, %v665_v0  ;;  %v358_v23 = vshrl.u32 (!%p192_p3), %v357_v20, 7  ;;  %v382_v45 = vpack.c.bf16 (!%p192_p3), %v287_v39, %v287_v39 }
   0xb   : > { %v359_v27 = vsub.s32 (!%p192_p3), 0, %v358_v23 }
   0xe   : > { %s752_s12 = smov (!%p235_p4, %s655_s12), 1  ;;  %v368_v50 = vld [vmem:[#allocation4] sm:$0x1] }
   0xf   : > { %s583_s16 = sshll.u32 %s752_s12, 3  ;;  %v341_v25 = vld [vmem:[#allocation3] sm:$0x1]  ;;  %s577_s25 = sshll.u32 %s752_s12, 1 }
  0x10   : > { %s242_s19 = scalar_lea.vmem %s743_s0, %s583_s16  ;;  %s252_s22 = scalar_lea.vmem %s744_s1, %s583_s16  ;;  %v427_v56 = vld [vmem:[#allocation5] sm:$0x3] }
  0x11   : > { %v586_v1 = vld [vmem:[%s242_s19] sm:$0xff]   ;;  %s264_s28 = scalar_lea.vmem %s746_s3, %s577_s25 }
  0x12   : > { %v587_v2 = vunpack.c.l.bf16 %v586_v1  ;;  %v588_v3 = vunpack.c.h.bf16 %v586_v1  ;;  %v632_v9 = vld [vmem:[%s252_s22] sm:$0xff]  }
  0x14   : > { %v274_v4 = vmul.f32 0.17677669, %v587_v2  ;;  %v275_v5 = vmul.f32 0.17677669, %v588_v3 }
  0x16   : > { %v276_v6 = vpack.c.bf16 %v275_v5, %v274_v4 }
  0x18   : > { %278 = vst.msk [vmem:[#allocation2] sm:$0xff] %vm277_vm2, %v276_v6 }
  0x1f   : > { %v286_v7 = vld [vmem:[#allocation2] sm:$0xff] }
  0x20   : > { %v298_v8 = vsel %vm277_vm2, %v286_v7, 0 }
  0x21   : > { %594 = vmatpush3.bf16.xpose.msra.mxu0 %v298_v8 }
  0x28   : > { %596 = vmatmul.mubr.msk.bf16.vlgmr.msra.gmra.mrb[0].mxu0 %vm277_vm2, %v632_v9 }
  0xfb   : > { %v334_v11 = vpop.f32.mrb[0].mxu0 }
  0xfc   : > { %v597_v12 = vpop.f32.mrb[1].mxu0  ;;  %v343_v14 = vsel %vm342_vm4, %v334_v11, -inf }
  0xfd   : > { %v337_v13 = vpop.f32.mrb[2].mxu0 }
  0xfe   : > { %v344_v15 = vsel %vm342_vm4, %v337_v13, -inf  ;;  %v598_v16 = vpop.f32.mrb[3].mxu0 }
  0xff   : > { %v345_v17 = vmax.f32 %v343_v14, %v344_v15 }
 0x101   : > { %v346_v18 = vrot.slane %v345_v17, 4 }
 0x103   : > { %v347_v19 = vmax.f32 %v345_v17, %v346_v18 }
 0x105   : > { %v348_v21 = vrot.slane %v347_v19, 2 }
 0x107   : > { %v349_v22 = vmax.f32 %v347_v19, %v348_v21 }
 0x109   : > { %v350_v24 = vrot.slane %v349_v22, 1 }
 0x10b   : > { %v351_v26 = vmax.f32 %v349_v22, %v350_v24 }
 0x10d   : > { %v352_v28 = vmax.f32 %v341_v25, %v351_v26 }
 0x10f   : > { %v353_v29 = vsub.f32 %v341_v25, %v352_v28  ;;  %v360_v30 = vrot.slane %v352_v28, %v359_v27  ;;  %438 = vst.msk [vmem:[#allocation3] sm:$0x1] %vm279_vm0, %v352_v28 }
 0x111   : > { %v354_v31 = vmul.f32 1.442695, %v353_v29  ;;  %v362_v32 = vsub.f32 %v334_v11, %v360_v30  ;;  %v363_v33 = vsub.f32 %v337_v13, %v360_v30 }
 0x113   : > { %633 = vpow2.f32 %v354_v31  ;;  %v364_v34 = vmul.f32 1.442695, %v362_v32  ;;  %v366_v35 = vmul.f32 1.442695, %v363_v33 }
 0x115   : > { %635 = vpow2.f32 %v364_v34 }
 0x116   : > { %637 = vpow2.f32 %v366_v35 }
 0x11d   : > { %v634_v36 = vpop.eup %633 }
 0x11e   : > { %v432_v37 = vrot.slane %v634_v36, %v359_v27  ;;  %v369_v52 = vmul.f32 %v634_v36, %v368_v50 }
 0x11f   : > { %v636_v38 = vpop.eup %635 }
 0x120   : > { %v638_v40 = vpop.eup %637  ;;  %v370_v41 = vsel %vm342_vm4, %v636_v38, 0.0  ;;  %v434_v57 = vmul.f32 %v432_v37, %v427_v56 }
 0x121   : > { %v371_v42 = vsel %vm342_vm4, %v638_v40, 0.0  ;;  %v383_v43 = vpack.c.bf16 %v638_v40, %v636_v38 }
 0x122   : > { %v372_v44 = vadd.f32 %v371_v42, %v370_v41 }
 0x123   : > { %600 = vmatpush3.bf16.msra.mxu1 %v383_v43 }
 0x124   : > { %v373_v46 = vrot.slane %v372_v44, 4 }
 0x126   : > { %v374_v47 = vadd.f32 %v373_v46, %v372_v44  ;;  %602 = vmatmul.mubr.msk.bf16.vlgmr.msra.gmra.mrb[0].mxu1 %vm342_vm4, %v382_v45 }
 0x128   : > { %v375_v48 = vrot.slane %v374_v47, 2 }
 0x12a   : > { %v376_v49 = vadd.f32 %v375_v48, %v374_v47 }
 0x12c   : > { %v377_v51 = vrot.slane %v376_v49, 1 }
 0x12e   : > { %v378_v53 = vadd.f32 %v377_v51, %v376_v49 }
 0x130   : > { %v379_v54 = vadd.f32 %v378_v53, %v369_v52 }
 0x132   : > { %381 = vst.msk [vmem:[#allocation4] sm:$0x1] %vm279_vm0, %v379_v54 }
 0x139   : > { %v443_v55 = vld [vmem:[#allocation4] sm:$0x1] }
 0x13a   : > { %639 = vrcp.f32 %v443_v55 }
 0x144   : > { %v640_v63 = vpop.eup %639 }
 0x145   : > { %v449_v0 = vrot.slane %v640_v63, %v359_v27 }
 0x1f9   : > { %v421_v58 = vpop.f32.mrb[0].mxu1 }
 0x1fa   : > { %v435_v59 = vadd.f32 %v434_v57, %v421_v58  ;;  %v603_v60 = vpop.f32.mrb[1].mxu1 }
 0x1fb   : > { %v424_v61 = vpop.f32.mrb[2].mxu1 }
 0x1fc   : > { %437 = vst.msk [vmem:[#allocation5] sm:$0x3] %vm282_vm3, %v435_v59  ;;  %v604_v62 = vpop.f32.mrb[3].mxu1 }
 0x203   : > { %v442_v1 = vld [vmem:[#allocation5] sm:$0x3] }
 0x204   : > { %v451_v2 = vmul.f32 %v449_v0, %v442_v1 }
 0x206   : > { %452 = vst.msk [vmem:[%s264_s28] sm:$0x3] %vm282_vm3, %v451_v2 }
 0x207 PF: > { %s13_s14 = sadd.s32 1, %s663_s14   ;;  %s747_s12 = smov %s659_s13 }
 0x208   : > { %p10_p5 = scmp.ge.s32.totalorder %s13_s14, 4   ;;  %s748_s13 = smov %s750_s15 }
 0x20a   :  { %12 = sbr.rel (!%p10_p5) target bundleno = 2 (0x2), region = 76 }

// kernel: gmflow_forward.30
= control target key start
LH: loop header
LB: loop body
LE: loop exit
PB: predicated region body
PF: predicated region fallthrough
CT: control target
= control target key end

     0   :  { %s1031_s24 = smov 0   ;;  %s1033_s25 = smov 0   ;;  %s1117_s0 = inlined_call_operand.vmem [shape: bf16[2,16,32], index: 0, kind: input, shape index: {}, may-alias: {0,1}]   ;;  %s1118_s1 = inlined_call_operand.vmem [shape: bf16[2,16,32], index: 1, kind: input, shape index: {}, may-alias: {0,1}]   ;;  %s1119_s2 = inlined_call_operand.vmem [shape: f32[2,2,16], index: 2, kind: input, shape index: {}]   ;;  %s1120_s3 = inlined_call_operand.vmem [shape: bf16[32,32], index: 3, kind: input, shape index: {}]   ;;  %s1121_s4 = inlined_call_operand.vmem [shape: f32[1,32], index: 4, kind: input, shape index: {}]   ;;  %s1122_s5 = inlined_call_operand.vmem [shape: bf16[32,32], index: 5, kind: input, shape index: {}]   ;;  %s1123_s6 = inlined_call_operand.vmem [shape: f32[1,32], index: 6, kind: input, shape index: {}]   ;;  %s1124_s7 = inlined_call_operand.vmem [shape: f32[2,2,16], index: 7, kind: output, shape index: {}]  }
   0x1   :  { %s1035_s26 = smov 0  }
   0x2 LB: > { %s36_s27 = sadd.s32 1, %s981_s25  ;;  %p855_p0 = scmp.ge.s32.totalorder %s985_s26, 1  ;;  %s985_s26 = sphi %s1035_s26, %s17_s26   ;;  %s981_s25 = sphi %s1033_s25, %s1126_s25   ;;  %s977_s24 = sphi %s1031_s24, %s1125_s24  }
   0x3   : > { %p38_p1 = scmp.ge.s32.totalorder %s36_s27, 2  ;;  %p296_p2 = scmp.lt.s32.totalorder %s985_s26, 3 }
   0x5   : > { %s1128_s27 = smov (%p38_p1, %s36_s27), 0  ;;  %p297_p3 = pnand %p855_p0, %p296_p2 }
   0x6   : > { %v949_v0 = vld [vmem:[%s1120_s3] sm:$0xff] (!%p297_p3)   ;;  %v987_v1 = vmov (!%p297_p3), 0.0   ;;  %v950_v2 = vld [vmem:[%s1120_s3 + $0x8] sm:$0xff] (!%p297_p3)   ;;  %vm988_vm0 = vmmov (!%p297_p3), 0   ;;  %p351_p4 = scmp.lt.s32.totalorder (!%p297_p3), %s977_s24, 1  ;;  %vm419_vm1 = vcmask (!%p297_p3), 261120   ;;  %v614_v38 = vlaneseq (!%p297_p3) }
   0x7   : > { %300 = sbr.rel (%p297_p3) target bundleno = 733 (0x2dd), region = 48  ;;  %889 = vmatprep.subr.bf16.mxu0 (!%p297_p3), %v987_v1  ;;  %897 = vmatprep.subr.bf16.mxu1 (!%p297_p3), %v987_v1  ;;  %v952_v3 = vld [vmem:[%s1122_s5] sm:$0xff] (!%p297_p3)   ;;  %v953_v4 = vld [vmem:[%s1122_s5 + $0x8] sm:$0xff] (!%p297_p3)   ;;  %vm468_vm2 = vcmask (!%p297_p3), 122880   ;;  %v989_v27 = vmov (!%p297_p3), -inf   ;;  %vm471_vm3 = vcmask (!%p297_p3), 123904  }
   0x8   : > { %890 = vmatpush3.bf16.msra.mxu0 (!%p297_p3), %v949_v0  ;;  %893 = vmatprep.mubr.msk.bf16.mxu0 (!%p297_p3), %vm988_vm0, %v987_v1  ;;  %v862_v7 = vld [vmem:[%s1121_s4] ss:$0 sm:$0xff] (!%p297_p3)  ;;  %469 = vst.msk [vmem:[#allocation3] sm:$0x1] (!%p297_p3), %vm468_vm2, %v989_v27  ;;  %470 = vst.msk [vmem:[#allocation4] sm:$0x1] (!%p297_p3), %vm468_vm2, %v987_v1 }
   0x9   : > { %891 = vmatprep.subr.bf16.mxu0 (!%p297_p3), %v987_v1  ;;  %901 = vmatprep.mubr.msk.bf16.mxu1 (!%p297_p3), %vm988_vm0, %v987_v1  ;;  %v867_v9 = vld [vmem:[%s1123_s6] ss:$0 sm:$0xff] (!%p297_p3)  ;;  %472 = vst.msk [vmem:[#allocation5] sm:$0x3] (!%p297_p3), %vm471_vm3, %v987_v1  ;;  %v990_v28 = vmov (!%p297_p3), 0.0|0.0   ;;  %vm599_vm4 = vcmask (!%p297_p3), 130048  }
   0xa   : > { %898 = vmatpush3.bf16.msra.mxu1 (!%p297_p3), %v952_v3  ;;  %v615_v41 = vshrl.u32 (!%p297_p3), %v614_v38, 7 }
   0xb   : > { %899 = vmatprep.subr.bf16.mxu1 (!%p297_p3), %v987_v1 }
   0xc   : > { %892 = vmatpush3.bf16.msra.mxu0 (!%p297_p3), %v950_v2  ;;  %v616_v45 = vsub.s32 (!%p297_p3), 0, %v615_v41 }
   0xd   : > { %905 = vmatprep.subr.bf16.mxu0 (!%p297_p3), %v987_v1 }
   0xe   : > { %s1130_s24 = smov (!%p351_p4, %s977_s24), 1  ;;  %900 = vmatpush3.bf16.msra.mxu1 %v953_v4 }
   0xf   : > { %s876_s13 = sshll.u32 %s1130_s24, 3  ;;  %918 = vmatprep.subr.bf16.mxu1 %v990_v28  ;;  %v598_v43 = vld [vmem:[#allocation3] sm:$0x1]  ;;  %s860_s28 = sshll.u32 %s1130_s24, 1  ;;  %v625_v3 = vld [vmem:[#allocation4] sm:$0x1] }
  0x10   : > { %s358_s16 = scalar_lea.vmem %s1117_s0, %s876_s13  ;;  %s368_s19 = scalar_lea.vmem %s1118_s1, %s876_s13 }
  0x11   : > { %v951_v5 = vld [vmem:[%s358_s16] sm:$0xff]   ;;  %s376_s8 = scalar_lea.vmem %s1119_s2, %s860_s28  ;;  %s383_s11 = scalar_lea.vmem %s1124_s7, %s860_s28 }
  0x12   : > { %v954_v6 = vld [vmem:[%s368_s19] sm:$0xff]   ;;  %894 = vmatmul.mubr.msk.bf16.vlgmr.msra.gmra.mrb[0].mxu0 %vm419_vm1, %v951_v5 }
  0x13   : > { %907 = vmatprep.mubr.msk.bf16.mxu0 %vm988_vm0, %v987_v1  ;;  %902 = vmatmul.mubr.msk.bf16.vlgmr.msra.gmra.mrb[0].mxu1 %vm419_vm1, %v954_v6  ;;  %v550_v62 = vld [vmem:[%s376_s8] sm:$0x3] }
  0x14   : > { %915 = vmatprep.mubr.msk.f32.mxu1 %vm988_vm0, %v987_v1 }
  0xe5   : > { %v457_v8 = vpop.f32.mrb[0].mxu0 }
  0xe6   : > { %v458_v10 = vadd.f32 %v862_v7, %v457_v8  ;;  %v895_v11 = vpop.f32.mrb[1].mxu0  ;;  %v541_v13 = vpop.f32.mrb[0].mxu1 }
  0xe7   : > { %v460_v12 = vpop.f32.mrb[2].mxu0  ;;  %v542_v16 = vadd.f32 %v867_v9, %v541_v13  ;;  %v903_v17 = vpop.f32.mrb[1].mxu1 }
  0xe8   : > { %v461_v14 = vadd.f32 %v862_v7, %v460_v12  ;;  %v896_v15 = vpop.f32.mrb[3].mxu0  ;;  %v544_v18 = vpop.f32.mrb[2].mxu1  ;;  %v464_v19 = vmul.f32 0.17677669, %v458_v10 }
  0xe9   : > { %v545_v21 = vadd.f32 %v867_v9, %v544_v18  ;;  %v904_v22 = vpop.f32.mrb[3].mxu1  ;;  %v712_v9 = vld [vmem:[#allocation5] sm:$0x3] }
  0xea   : > { %v465_v20 = vmul.f32 0.17677669, %v461_v14 }
  0xeb   : > { %v548_v24 = vpack.c.bf16 %v545_v21, %v542_v16 }
  0xec   : > { %v466_v23 = vpack.c.bf16 %v465_v20, %v464_v19 }
  0xee   : > { %467 = vst.msk [vmem:[#allocation2] sm:$0xff] %vm419_vm1, %v466_v23 }
  0xf5   : > { %v549_v25 = vld [vmem:[#allocation2] sm:$0xff] }
  0xf6   : > { %v555_v26 = vsel %vm419_vm1, %v549_v25, 0 }
  0xf7   : > { %906 = vmatpush3.bf16.xpose.msra.mxu0 %v555_v26 }
  0xfe   : > { %908 = vmatmul.mubr.msk.bf16.vlgmr.msra.gmra.mrb[4].mxu0 %vm419_vm1, %v548_v24 }
 0x1d1   : > { %v591_v29 = vpop.f32.mrb[4].mxu0 }
 0x1d2   : > { %v909_v30 = vpop.f32.mrb[5].mxu0  ;;  %v600_v32 = vsel %vm599_vm4, %v591_v29, -inf }
 0x1d3   : > { %v594_v31 = vpop.f32.mrb[6].mxu0 }
 0x1d4   : > { %v601_v33 = vsel %vm599_vm4, %v594_v31, -inf  ;;  %v910_v34 = vpop.f32.mrb[7].mxu0 }
 0x1d5   : > { %v602_v35 = vmax.f32 %v600_v32, %v601_v33 }
 0x1d7   : > { %v603_v36 = vrot.slane %v602_v35, 4 }
 0x1d9   : > { %v604_v37 = vmax.f32 %v602_v35, %v603_v36 }
 0x1db   : > { %v605_v39 = vrot.slane %v604_v37, 2 }
 0x1dd   : > { %v606_v40 = vmax.f32 %v604_v37, %v605_v39 }
 0x1df   : > { %v607_v42 = vrot.slane %v606_v40, 1 }
 0x1e1   : > { %v608_v44 = vmax.f32 %v606_v40, %v607_v42 }
 0x1e3   : > { %v609_v46 = vmax.f32 %v598_v43, %v608_v44 }
 0x1e5   : > { %v610_v47 = vsub.f32 %v598_v43, %v609_v46  ;;  %v617_v48 = vrot.slane %v609_v46, %v616_v45  ;;  %723 = vst.msk [vmem:[#allocation3] sm:$0x1] %vm468_vm2, %v609_v46 }
 0x1e7   : > { %v611_v49 = vmul.f32 1.442695, %v610_v47  ;;  %v619_v50 = vsub.f32 %v591_v29, %v617_v48  ;;  %v620_v51 = vsub.f32 %v594_v31, %v617_v48 }
 0x1e9   : > { %955 = vpow2.f32 %v611_v49  ;;  %v621_v52 = vmul.f32 1.442695, %v619_v50  ;;  %v623_v53 = vmul.f32 1.442695, %v620_v51 }
 0x1eb   : > { %957 = vpow2.f32 %v621_v52 }
 0x1ec   : > { %959 = vpow2.f32 %v623_v53 }
 0x1f3   : > { %v956_v54 = vpop.eup %955 }
 0x1f4   : > { %v717_v55 = vrot.slane %v956_v54, %v616_v45  ;;  %v626_v5 = vmul.f32 %v956_v54, %v625_v3 }
 0x1f5   : > { %v958_v56 = vpop.eup %957 }
 0x1f6   : > { %v960_v57 = vpop.eup %959  ;;  %v627_v58 = vsel %vm599_vm4, %v958_v56, 0.0  ;;  %v719_v10 = vmul.f32 %v717_v55, %v712_v9 }
 0x1f7   : > { %v628_v59 = vsel %vm599_vm4, %v960_v57, 0.0  ;;  %v919_v60 = vpack.c.bf16 %v960_v57, %v958_v56 }
 0x1f8   : > { %v629_v61 = vadd.f32 %v628_v59, %v627_v58 }
 0x1f9   : > { %920 = vmatpush3.bf16.msra.mxu1 %v919_v60 }
 0x1fa   : > { %v630_v63 = vrot.slane %v629_v61, 4 }
 0x1fc   : > { %v631_v0 = vadd.f32 %v630_v63, %v629_v61  ;;  %916 = vmatmul.mubr.msk.f32.vlgmr.msra.gmra.mrb[4].mxu1 %vm599_vm4, %v550_v62 }
 0x1fe   : > { %v632_v1 = vrot.slane %v631_v0, 2 }
 0x200   : > { %v633_v2 = vadd.f32 %v632_v1, %v631_v0 }
 0x202   : > { %v634_v4 = vrot.slane %v633_v2, 1 }
 0x204   : > { %v635_v6 = vadd.f32 %v634_v4, %v633_v2 }
 0x206   : > { %v636_v7 = vadd.f32 %v635_v6, %v626_v5 }
 0x208   : > { %638 = vst.msk [vmem:[#allocation4] sm:$0x1] %vm468_vm2, %v636_v7 }
 0x20f   : > { %v728_v8 = vld [vmem:[#allocation4] sm:$0x1] }
 0x210   : > { %961 = vrcp.f32 %v728_v8 }
 0x21a   : > { %v962_v14 = vpop.eup %961 }
 0x21b   : > { %v734_v15 = vrot.slane %v962_v14, %v616_v45 }
 0x2cf   : > { %v708_v11 = vpop.f32.mrb[4].mxu1 }
 0x2d0   : > { %v720_v12 = vadd.f32 %v719_v10, %v708_v11  ;;  %v917_v13 = vpop.f32.mrb[5].mxu1 }
 0x2d2   : > { %722 = vst.msk [vmem:[#allocation5] sm:$0x3] %vm471_vm3, %v720_v12 }
 0x2d9   : > { %v727_v16 = vld [vmem:[#allocation5] sm:$0x3] }
 0x2da   : > { %v736_v17 = vmul.f32 %v734_v15, %v727_v16 }
 0x2dc   : > { %737 = vst.msk [vmem:[%s383_s11] sm:$0x3] %vm471_vm3, %v736_v17 }
 0x2dd PF: > { %s17_s26 = sadd.s32 1, %s985_s26   ;;  %s1125_s24 = smov %s981_s25 }
 0x2de   : > { %p14_p5 = scmp.ge.s32.totalorder %s17_s26, 4   ;;  %s1126_s25 = smov %s1128_s27 }
 0x2e0   :  { %16 = sbr.rel (!%p14_p5) target bundleno = 2 (0x2), region = 92 }

// kernel: gmflow_forward.31
= control target key start
LH: loop header
LB: loop body
LE: loop exit
PB: predicated region body
PF: predicated region fallthrough
CT: control target
= control target key end

     0   :  { %8 = vsyncpa [#allocation3], 0  ;;  %s765_s0 = inlined_call_operand.vmem [shape: f32[4,4,4], index: 0, kind: input, shape index: {}]   ;;  %s766_s1 = inlined_call_operand.vmem [shape: f32[32,4], index: 1, kind: input, shape index: {}]   ;;  %s767_s2 = inlined_call_operand.vmem [shape: f32[4,32], index: 2, kind: input, shape index: {}]   ;;  %s768_s3 = inlined_call_operand.hbm [shape: f32[4,32,32], index: 3, kind: output, shape index: {}]  }
   0x1   :  { %10 = vsyncpa [#allocation3 + $0x1], 0  ;;  %s635_s12 = smov 0   ;;  %s637_s13 = smov 0  }
   0x2   :  { %s639_s14 = smov 0   ;;  %s641_s15 = smov 0  }
   0x3 LB: > { %s656_s16 = sadd.s32 4294967295, %s610_s15   ;;  %s459_s17 = sadd.s32 4294967294, %s610_s15   ;;  %s610_s15 = sphi %s641_s15, %s774_s15   ;;  %s606_s14 = sphi %s639_s14, %s773_s14   ;;  %s602_s13 = sphi %s637_s13, %s772_s13   ;;  %s598_s12 = sphi %s635_s12, %s771_s12  }
   0x4   : > { %s660_s18 = sadd.s32 1, %s610_s15   ;;  %s91_s19 = sadd.s32 1, %s606_s14 }
   0x5   : > { %s88_s20 = ssub.s32 %s610_s15, %s660_s18  ;;  %p101_p0 = scmp.ne.s32.totalorder %s606_s14, %s602_s13 }
   0x6   : > { %p89_p1 = scmp.eq.s32.totalorder %s88_s20, 0  ;;  %p102_p2 = scmp.eq.s32.totalorder %s656_s16, 3 }
   0x7   : > { %p107_p3 = scmp.ne.s32.totalorder %s602_s13, %s598_s12  ;;  %p108_p4 = scmp.eq.s32.totalorder %s459_s17, 3 }
   0x8   : > { %s671_s21 = scalar_select %p89_p1, %s606_s14, %s91_s19  }
   0x9   : > { %p673_p5 = por %p102_p2, %p101_p0  ;;  %p677_p6 = por %p108_p4, %p107_p3 }
   0xa   : > { %p462_p7 = scmp.ge.s32.totalorder %s610_s15, 1  ;;  %p139_p8 = scmp.lt.s32.totalorder %s610_s15, 5 }
   0xc   : > { %p140_p9 = pnand %p462_p7, %p139_p8 }
   0xd   : > { %p162_p10 = scmp.lt.s32.totalorder (!%p140_p9), %s656_s16, 3  ;;  %v167_v0 = vld [vmem:[%s766_s1] sm:$0xff] (!%p140_p9)  ;;  %vm171_vm0 = vcmask (!%p140_p9), 31744   ;;  %vm184_vm1 = vcmask (!%p140_p9), 1043456   ;;  %v168_v2 = vld [vmem:[%s766_s1 + $0x8] sm:$0xff] (!%p140_p9)  ;;  %v169_v3 = vld [vmem:[%s766_s1 + $0x10] sm:$0xff] (!%p140_p9) }
   0xe   : > { %143 = sbr.rel (%p140_p9) target bundleno = 476 (0x1dc), region = 32  ;;  %493 = vmatprep.mubr.msk.f32.mxu0 (!%p140_p9), %vm171_vm0, %v167_v0  ;;  %v170_v4 = vld [vmem:[%s766_s1 + $0x18] sm:$0xff] (!%p140_p9)  ;;  %v273_v5 = vld [vmem:[%s767_s2] sm:$0xf] (!%p140_p9)  ;;  %s159_s17 = sand.u32 (!%p140_p9), 1, %s602_s13   ;;  %vm378_vm2 = vcmask (!%p140_p9), 261120  }
   0xf   : > { %499 = vmatprep.subr.msk.mxu1 (!%p140_p9), %vm184_vm1, %v273_v5  ;;  %s463_s19 = sshll.u32 (!%p140_p9), %s159_s17, 5  ;;  %s480_s25 = sshll.u32 (!%p140_p9), %s656_s16, 9 }
  0x10   : > { %500 = vmatpush3.msk.msra.mxu1 (!%p140_p9), %vm184_vm1, %v273_v5  ;;  %s161_s20 = scalar_lea.vmem (!%p140_p9), [#allocation2], %s463_s19  ;;  %s720_s28 = scalar_lea.hbm (!%p140_p9), %s768_s3, %s480_s25 }
  0x11   : > { %s397_s24 = sshll.u32 (!%p140_p9), %s161_s20, 4  ;;  %s715_s24 = int_to_ptr.vmem [resolvable:$true] %s397_s24 }
  0x12   : > { %s548_s29 = scalar_lea.vmem (!%p140_p9), %s715_s24, 512 }
  0x13   : > { %p549_p11 = scmp.ne.s32.totalorder (!%p140_p9), %s715_s24, %s548_s29 }
  0x15   : > { %s163_s26 = scalar_select %p162_p10, %s656_s16, 3 }
  0x16   : > { %s724_s16 = scalar_lea.sflag [#allocation3], %s159_s17  ;;  %p550_p12 = pnand %p549_p11, %p673_p5 }
  0x17   : > { %s464_s27 = sshll.u32 %s163_s26, 2 }
  0x18   : > { %s165_s30 = scalar_lea.vmem %s765_s0, %s464_s27  ;;  %p551_p13 = pneg %p550_p12 }
  0x19   : > { %v166_v1 = vld [vmem:[%s165_s30] sm:$0xf]  ;;  %s612_s30 = smov [#allocation2]  }
  0x1a   : > { %491 = vmatprep.subr.msk.mxu0 %vm184_vm1, %v166_v1  ;;  %s552_s4 = sshll.u32 %s612_s30, 4  ;;  %s553_s4 = int_to_ptr.vmem [resolvable:$false] %s552_s4 }
  0x1b   : > { %492 = vmatpush3.msk.msra.mxu0 %vm184_vm1, %v166_v1  ;;  %s554_s5 = scalar_lea.vmem %s553_s4, 1024  ;;  %p555_p0 = scmp.lt.s32.totalorder %s715_s24, %s553_s4 }
  0x1c   : > { %494 = vmatmul.mubr.msk.f32.vlgmr.msra.gmra.mrb[0].mxu0 %vm171_vm0, %v168_v2  ;;  %p556_p1 = scmp.lt.s32.totalorder %s554_s5, %s548_s29 }
  0x1d   : > { %496 = vmatprep.mubr.msk.f32.mxu0 %vm171_vm0, %v169_v3 }
  0x1e   : > { %p557_p2 = por %p556_p1, %p555_p0 }
  0x20   : > { %497 = vmatmul.mubr.msk.f32.gmra.mrb[2].mxu0 %vm171_vm0, %v170_v4  ;;  %p558_p3 = pnand %p557_p2, %p551_p13 }
  0xef   : > { %v495_v6 = vpop.f32.mrb[0].mxu0 }
  0xf0   : > { %v254_v7 = vpop.f32.mrb[1].mxu0 }
  0xf1   : > { %501 = vmatprep.mubr.msk.f32.mxu1 %vm171_vm0, %v254_v7 }
  0xf2   : > { %502 = vmatmul.mubr.msk.f32.vlgmr.msra.gmra.mrb[0].mxu1 %vm171_vm0, %v495_v6 }
  0xf3   : > { %v498_v8 = vpop.f32.mrb[2].mxu0 }
  0xf4   : > { %v264_v9 = vpop.f32.mrb[3].mxu0 }
  0xf5   : > { %504 = vmatprep.mubr.msk.f32.mxu1 %vm171_vm0, %v264_v9 }
  0xf6   : > { %505 = vmatmul.mubr.msk.f32.gmra.mrb[2].mxu1 %vm171_vm0, %v498_v8 }
 0x1c5   : > { %v503_v10 = vpop.f32.mrb[0].mxu1 }
 0x1c6   : > { %v375_v11 = vmul.f32 8.0, %v503_v10  ;;  %v355_v12 = vpop.f32.mrb[1].mxu1 }
 0x1c7   : > { %v374_v13 = vmul.f32 8.0, %v355_v12 }
 0x1c8   : > { %380 = vst.msk [vmem:[%s161_s20 + $0x8] sm:$0xff] %vm378_vm2, %v375_v11 }
 0x1c9   : > { %379 = vst.msk [vmem:[%s161_s20] sm:$0xff] %vm378_vm2, %v374_v13  ;;  %v506_v14 = vpop.f32.mrb[2].mxu1 }
 0x1ca   : > { %v377_v15 = vmul.f32 8.0, %v506_v14  ;;  %v365_v16 = vpop.f32.mrb[3].mxu1 }
 0x1cb   : > { %v376_v17 = vmul.f32 8.0, %v365_v16 }
 0x1cc   : > { %382 = vst.msk [vmem:[%s161_s20 + $0x18] sm:$0xff] %vm378_vm2, %v377_v15 }
 0x1cd   : > { %381 = vst.msk [vmem:[%s161_s20 + $0x10] sm:$0xff] %vm378_vm2, %v376_v17 }
 0x1ce   : > { %561 = shalt.err (!%p558_p3)
}
 0x1cf   : > { %s562_s6 = scalar_lea.hbm %s720_s28, 512  ;;  %s566_s9 = scalar_lea.hbm %s768_s3, 2048 }
 0x1d0   : > { %p563_p4 = scmp.ne.s32.totalorder %s720_s28, %s562_s6  ;;  %p567_p9 = scmp.lt.u32.totalorder %s720_s28, %s768_s3 }
 0x1d1   : > { %p568_p10 = scmp.lt.u32.totalorder %s566_s9, %s562_s6  ;;  %p570_p12 = scmp.lt.u32.totalorder %s562_s6, %s720_s28 }
 0x1d2   : > { %p564_p7 = pnand %p563_p4, %p673_p5 }
 0x1d3   : > { %p569_p11 = por %p568_p10, %p567_p9 }
 0x1d4   : > { %p565_p8 = pneg %p564_p7 }
 0x1d5   : > { %p571_p13 = por %p570_p12, %p569_p11 }
 0x1d7   : > { %p572_p0 = pnand %p571_p13, %p565_p8 }
 0x1d9   : > { %575 = shalt.err (!%p572_p0)
}
 0x1da   : > { %s613_s17 = smov 128   ;;  %s614_s19 = smov 8  }
 0x1db   : > { %507 = dma.vmem_to_hbm [thread:$0]  (%p673_p5), %s715_s24, 512, %s720_s28, %s724_s16, %s613_s17, %s613_s17, %s614_s19  }
 0x1dc PF: > { %p513_p1 = scmp.ge.s32.totalorder %s610_s15, 2  ;;  %s412_s20 = sand.u32 1, %s598_s12  }
 0x1dd   : > { %s413_s25 = scalar_lea.sflag [#allocation3], %s412_s20 }
 0x1de   : > { %p510_p2 = pnand %p513_p1, %p677_p6 }
 0x1e0   : > { %593 = dma.done.wait (!%p510_p2), %s413_s25, 512  }
 0x1e1   : > { %595 = vsyncadd (!%p510_p2), %s413_s25, 4294966784  ;;  %p13_p3 = scmp.ge.s32.totalorder %s660_s18, 6   ;;  %s771_s12 = smov %s602_s13 }
 0x1e2   : > { %s772_s13 = smov %s606_s14  ;;  %s773_s14 = smov %s671_s21 }
 0x1e3   : > { %s774_s15 = smov %s660_s18  ;;  %15 = sbr.rel (!%p13_p3) target bundleno = 3 (0x3), region = 67 }
 0x1ea   :  { %418 = vsyncpa [#allocation3], 1 }
 0x1eb   :  { %420 = vsyncpa [#allocation3 + $0x1], 1 }

</bundles_post_ra>
